<compile_context>
chip_gen: v6e
topology: v6e:2x2x1
jax: 0.10.0
libtpu: 0.0.40
codegen_flags: <defaults>
</compile_context>

<pallas_src>
import functools

import jax
import jax.numpy as jnp
from jax.experimental import pallas as pl
from jax.experimental.pallas import tpu as pltpu

_NT_DIMS = (((1,), (1,)), ((), ()))   # a @ b.T  (contract last dims of both)
_M_INIT = -1e30                        # finite "-inf" for the running max


def _abmil_kernel(n_valid, tile_n, tiles_per_shard,
                  x_ref, w1_ref, b1_ref, wvu_ref, bvu_ref, wa_ref, ba_ref,
                  a_ref, m_out_ref, l_out_ref, acc_out_ref,
                  m_sc, l_sc, acc_sc):
    c = pl.program_id(0)                       # bag shard ("parallel")
    i = pl.program_id(1)                       # tile within shard ("arbitrary")
    tile_idx = c * tiles_per_shard + i         # UNclamped global tile index

    @pl.when(i == 0)
    def _init():
        m_sc[...] = jnp.full((1, 1), _M_INIT, jnp.float32)
        l_sc[...] = jnp.zeros((1, 1), jnp.float32)
        acc_sc[...] = jnp.zeros(acc_sc.shape, jnp.float32)

    row0 = tile_idx * tile_n
    rows = jax.lax.broadcasted_iota(jnp.int32, (tile_n, 1), 0)
    valid_rows = (row0 + rows) < n_valid                          # (tn, 1)

    # ---- feature_extractor_part2: Linear(F, L) + ReLU (bf16 MXU, f32 acc)
    h = jnp.dot(x_ref[...], w1_ref[...], preferred_element_type=jnp.float32)
    h = jnp.maximum(h + b1_ref[...], 0.0)                         # (tn, Lp) f32
    # Zero out-of-bag rows (partial edge tile / clamped duplicate tile) so no
    # undefined data can reach the pooling matmul; keep ONE bf16 copy of h.
    h = jnp.where(valid_rows, h, 0.0)
    h_bf = h.astype(jnp.bfloat16)

    # ---- fused attention_V | attention_U projection: single (Lp, 2D) matmul
    vu = jnp.dot(h_bf, wvu_ref[...],
                 preferred_element_type=jnp.float32) + bvu_ref[...]  # (tn, 2D)
    d = wa_ref.shape[1]
    gate = jnp.tanh(vu[:, :d]) * jax.nn.sigmoid(vu[:, d:])           # (tn, D)

    # ---- attention score (K = 1), lane-dense: (1,D) @ (tn,D)^T -> (1,tn)
    scores = jax.lax.dot_general(wa_ref[...], gate, _NT_DIMS,
                                 preferred_element_type=jnp.float32)
    scores = scores + ba_ref[...]                                 # (1, tn)
    a_ref[...] = scores                                           # raw A scores

    # ---- online-softmax pooling over this shard of the bag
    lanes = jax.lax.broadcasted_iota(jnp.int32, (1, tile_n), 1)
    s = jnp.where((row0 + lanes) < n_valid, scores, -jnp.inf)

    m_old = m_sc[...]                                             # (1, 1)
    m_new = jnp.maximum(m_old, jnp.max(s, axis=1, keepdims=True))
    alpha = jnp.exp(m_old - m_new)
    p = jnp.exp(s - m_new)                                        # invalid -> 0
    l_sc[...] = alpha * l_sc[...] + jnp.sum(p, axis=1, keepdims=True)
    acc_sc[...] = alpha * acc_sc[...] + jnp.dot(
        p.astype(jnp.bfloat16), h_bf, preferred_element_type=jnp.float32)
    m_sc[...] = m_new

    # ---- emit this shard's partial softmax state (merged in the wrapper)
    @pl.when(i == pl.num_programs(1) - 1)
    def _fin():
        m_out_ref[...] = m_sc[...].reshape(1, 1, 1)
        l_out_ref[...] = l_sc[...].reshape(1, 1, 1)
        acc_out_ref[...] = acc_sc[...].reshape(acc_out_ref.shape)


def abmil_forward(x, params, *, tile_n=512, num_shards=2):
    """x: (1, N, F) float32. Returns a dict matching the PyTorch module."""
    xs = x[0].astype(jnp.bfloat16)               # squeeze(0) + one-pass bf16 cast
    N, F = xs.shape
    L = params["w1"].shape[1]                    # 500
    D = params["wv"].shape[1]                    # 128
    C = params["wc"].shape[1]                    # num_classes
    Lp = ((L + 127) // 128) * 128                # 500 -> 512

    total_tiles = int(pl.cdiv(N, tile_n))
    nc = max(1, min(num_shards, total_tiles))    # bag shards (v7x: one per TC)
    tpc = int(pl.cdiv(total_tiles, nc))          # tiles per shard
    a_lanes = nc * tpc * tile_n                  # padded width of the A output

    f32, bf16 = jnp.float32, jnp.bfloat16

    # ---- one-time weight prep: pad L->Lp, fuse V|U, cast MXU operands to bf16
    w1 = jnp.zeros((F, Lp), bf16).at[:, :L].set(params["w1"].astype(bf16))
    b1 = jnp.zeros((1, Lp), f32).at[:, :L].set(params["b1"].reshape(1, L))
    wvu = jnp.zeros((Lp, 2 * D), bf16)
    wvu = wvu.at[:L, :D].set(params["wv"].astype(bf16))
    wvu = wvu.at[:L, D:].set(params["wu"].astype(bf16))
    bvu = jnp.concatenate([params["bv"].reshape(1, D),
                           params["bu"].reshape(1, D)], axis=1).astype(f32)
    wa_row = params["wa"].reshape(1, D).astype(f32)               # (1, D)
    ba = params["ba"].reshape(1, 1).astype(f32)

    const = lambda c, i: (0, 0)
    # The last shard may own "overhang" steps past the real tile count: clamp
    # their DMA to the last real tile (rows are masked in-kernel and their A
    # lanes land in the padded tail that the wrapper slices away).
    x_map = lambda c, i: (jnp.minimum(c * tpc + i, total_tiles - 1), 0)

    kernel = functools.partial(_abmil_kernel, N, tile_n, tpc)

    a_raw, m_part, l_part, acc_part = pl.pallas_call(
        kernel,
        out_shape=(
            jax.ShapeDtypeStruct((1, a_lanes), f32),   # raw attention scores
            jax.ShapeDtypeStruct((nc, 1, 1), f32),     # per-shard running max
            jax.ShapeDtypeStruct((nc, 1, 1), f32),     # per-shard running sum
            jax.ShapeDtypeStruct((nc, 1, Lp), f32),    # per-shard weighted-H acc
        ),
        grid=(nc, tpc),
        in_specs=[
            pl.BlockSpec((tile_n, F), x_map),          # x tile (bf16, streamed)
            pl.BlockSpec((F, Lp), const),              # w1 (resident)
            pl.BlockSpec((1, Lp), const),              # b1
            pl.BlockSpec((Lp, 2 * D), const),          # [wv | wu]
            pl.BlockSpec((1, 2 * D), const),           # [bv | bu]
            pl.BlockSpec((1, D), const),               # wa row
            pl.BlockSpec((1, 1), const),               # ba
        ],
        out_specs=(
            pl.BlockSpec((1, tile_n), lambda c, i: (0, c * tpc + i)),
            pl.BlockSpec((1, 1, 1), lambda c, i: (c, 0, 0)),
            pl.BlockSpec((1, 1, 1), lambda c, i: (c, 0, 0)),
            pl.BlockSpec((1, 1, Lp), lambda c, i: (c, 0, 0)),
        ),
        scratch_shapes=[
            pltpu.VMEM((1, 1), f32),    # running max
            pltpu.VMEM((1, 1), f32),    # running sum
            pltpu.VMEM((1, Lp), f32),   # running weighted-H accumulator
        ],
        compiler_params=pltpu.CompilerParams(
            dimension_semantics=("parallel", "arbitrary")),
    )(xs, w1, b1, wvu, bvu, wa_row, ba)

    # ---- tiny epilogue: merge per-shard online-softmax states, classify
    m_part = m_part.reshape(nc, 1)
    l_part = l_part.reshape(nc, 1)
    acc_part = acc_part.reshape(nc, Lp)
    m_all = jnp.max(m_part, axis=0, keepdims=True)                 # (1, 1)
    scale = jnp.exp(m_part - m_all)                                # (nc, 1)
    l_all = jnp.sum(l_part * scale, axis=0, keepdims=True)         # (1, 1)
    acc_all = jnp.sum(acc_part * scale, axis=0, keepdims=True)     # (1, Lp)
    m_feat = acc_all[:, :L] / l_all                                # (1, L)

    logits = m_feat @ params["wc"].astype(f32) + params["bc"].reshape(1, C)
    y_prob = jax.nn.softmax(logits, axis=1)
    y_hat = jnp.argmax(logits, axis=1)

    return {
        "logits": logits,                # (1, C)
        "A": a_raw[:, :N],               # (1, N) pre-softmax scores (o_A)
        "Y_prob": y_prob,                # (1, C)
        "Y_hat": y_hat,                  # (1,)
        "features": m_feat,              # (1, L)
    }


def init_params(key, feature_dim, L, D, K, num_classes):
    ks = jax.random.split(key, 5)
    scale = 0.05
    return {
        "w1": scale * jax.random.normal(ks[0], (feature_dim, L), jnp.float32),
        "b1": jnp.zeros((1, L), jnp.float32),
        "wv": scale * jax.random.normal(ks[1], (L, D), jnp.float32),
        "bv": jnp.zeros((1, D), jnp.float32),
        "wu": scale * jax.random.normal(ks[2], (L, D), jnp.float32),
        "bu": jnp.zeros((1, D), jnp.float32),
        "wa": scale * jax.random.normal(ks[3], (D, K), jnp.float32),
        "ba": jnp.zeros((1, K), jnp.float32),
        "wc": scale * jax.random.normal(ks[4], (L * K, num_classes), jnp.float32),
        "bc": jnp.zeros((1, num_classes), jnp.float32),
    }


def abmil_reference(x, p):
    """Pure-JAX f32 reference mirroring the PyTorch forward()."""
    xs = x[0]
    H = jnp.maximum(xs @ p["w1"] + p["b1"], 0.0)
    A_V = jnp.tanh(H @ p["wv"] + p["bv"])
    A_U = jax.nn.sigmoid(H @ p["wu"] + p["bu"])
    A = (A_V * A_U) @ p["wa"] + p["ba"]        # (N, 1)
    o_A = A.T                                  # (1, N) -- returned as 'A'
    w = jax.nn.softmax(o_A, axis=1)
    M = w @ H                                  # (1, L)
    logits = M @ p["wc"] + p["bc"]
    return {
        "logits": logits,
        "A": o_A,
        "Y_prob": jax.nn.softmax(logits, axis=1),
        "Y_hat": jnp.argmax(logits, axis=1),
        "features": M.reshape(1, -1),
    }


if __name__ == "__main__":
    # Bag of N=700 instances, module-default feature_dim=1024, L=500, D=128,
    # K=1, 4 classes.  N=700 with tile_n=256 exercises: two bag shards, a
    # partial masked edge tile, and a clamped duplicate tail tile.
    N, FEAT, L, D, K, NUM_CLASSES = 700, 1024, 500, 128, 1, 4

    key = jax.random.PRNGKey(0)
    kx, kp = jax.random.split(key)
    x = jax.random.normal(kx, (1, N, FEAT), jnp.float32)
    params = init_params(kp, FEAT, L, D, K, NUM_CLASSES)

    # TODO(synk): feature_extractor_part1 (Conv2d/MaxPool stack) is defined in
    # __init__ but never called in forward(); intentionally not implemented.

    fwd = jax.jit(abmil_forward, static_argnames=("tile_n", "num_shards"))
    ref = abmil_reference(x, params)
    atol = rtol = 2e-2   # bf16 MXU inputs with f32 accumulation

    # Run 1: tile_n=256 (partial edge tile + duplicated overhang tile on shard 1)
    out = fwd(x, params, tile_n=256)
    jax.block_until_ready(out)
    for name in ("logits", "A", "Y_prob", "features"):
        assert jnp.allclose(out[name], ref[name], atol=atol, rtol=rtol), name
    assert int(out["Y_hat"][0]) == int(jnp.argmax(out["logits"], axis=1)[0])

    # Run 2: default tile_n=512 (one tile per shard, partial tile on shard 1)
    out2 = fwd(x, params)
    jax.block_until_ready(out2)
    for name in ("logits", "A", "Y_prob", "features"):
        assert jnp.allclose(out2[name], ref[name], atol=atol, rtol=rtol), name
    assert int(out2["Y_hat"][0]) == int(jnp.argmax(out2["logits"], axis=1)[0])

    print("KERNEL_OK")
</pallas_src>

<mosaic_0001>
module attributes {stable_mosaic.version = 11 : i64} {
  func.func @_abmil_kernel(%arg0: i32, %arg1: i32, %arg2: memref<256x1024xbf16, #tpu.memory_space<vmem>>, %arg3: memref<1024x512xbf16, #tpu.memory_space<vmem>>, %arg4: memref<1x512xf32, #tpu.memory_space<vmem>>, %arg5: memref<512x256xbf16, #tpu.memory_space<vmem>>, %arg6: memref<1x256xf32, #tpu.memory_space<vmem>>, %arg7: memref<1x128xf32, #tpu.memory_space<vmem>>, %arg8: memref<1x1xf32, #tpu.memory_space<vmem>>, %arg9: memref<1x256xf32, #tpu.memory_space<vmem>>, %arg10: memref<1x1x1xf32, #tpu.memory_space<vmem>>, %arg11: memref<1x1x1xf32, #tpu.memory_space<vmem>>, %arg12: memref<1x1x512xf32, #tpu.memory_space<vmem>>, %arg13: memref<1x1xf32, #tpu.memory_space<vmem>>, %arg14: memref<1x1xf32, #tpu.memory_space<vmem>>, %arg15: memref<1x512xf32, #tpu.memory_space<vmem>>) attributes {dimension_semantics = [#tpu.dimension_semantics<parallel>, #tpu.dimension_semantics<arbitrary>], iteration_bounds = array<i64: 2, 2>, scalar_prefetch = 0 : i64, scratch_operands = 3 : i64, tpu.core_type = #tpu.core_type<tc>, window_params = [{transform_indices = @transform_0, window_bounds = array<i64: 256, 1024>}, {pipeline_mode = #tpu.pipeline_mode<synchronous>, transform_indices = @transform_1, window_bounds = array<i64: 1024, 512>}, {pipeline_mode = #tpu.pipeline_mode<synchronous>, transform_indices = @transform_2, window_bounds = array<i64: 1, 512>}, {pipeline_mode = #tpu.pipeline_mode<synchronous>, transform_indices = @transform_3, window_bounds = array<i64: 512, 256>}, {pipeline_mode = #tpu.pipeline_mode<synchronous>, transform_indices = @transform_4, window_bounds = array<i64: 1, 256>}, {pipeline_mode = #tpu.pipeline_mode<synchronous>, transform_indices = @transform_5, window_bounds = array<i64: 1, 128>}, {pipeline_mode = #tpu.pipeline_mode<synchronous>, transform_indices = @transform_6, window_bounds = array<i64: 1, 1>}, {transform_indices = @transform_7, window_bounds = array<i64: 1, 256>}, {transform_indices = @transform_8, window_bounds = array<i64: 1, 1, 1>}, {transform_indices = @transform_9, window_bounds = array<i64: 1, 1, 1>}, {transform_indices = @transform_10, window_bounds = array<i64: 1, 1, 512>}]} {
    %c2_i32 = arith.constant 2 : i32
    %0 = arith.muli %arg0, %c2_i32 : i32
    %1 = arith.addi %0, %arg1 : i32
    %c0_i32 = arith.constant 0 : i32
    %2 = arith.cmpi eq, %arg1, %c0_i32 : i32
    %3 = arith.extui %2 : i1 to i32
    %c0_i32_0 = arith.constant 0 : i32
    %4 = arith.cmpi ne, %3, %c0_i32_0 : i32
    scf.if %4 {
      %cst_39 = arith.constant -1.000000e+30 : f32
      %77 = vector.broadcast %cst_39 : f32 to vector<1x1xf32>
      %c0_40 = arith.constant 0 : index
      %c0_41 = arith.constant 0 : index
      %78 = vector.load %arg13[%c0_40, %c0_41] : memref<1x1xf32, #tpu.memory_space<vmem>>, vector<1x1xf32>
      tpu.vector_store %arg13[%c0_40, %c0_41], %77 {strides = array<i32>} : memref<1x1xf32, #tpu.memory_space<vmem>>, vector<1x1xf32>,
      %cst_42 = arith.constant 0.000000e+00 : f32
      %79 = vector.broadcast %cst_42 : f32 to vector<1x1xf32>
      %c0_43 = arith.constant 0 : index
      %c0_44 = arith.constant 0 : index
      %80 = vector.load %arg14[%c0_43, %c0_44] : memref<1x1xf32, #tpu.memory_space<vmem>>, vector<1x1xf32>
      tpu.vector_store %arg14[%c0_43, %c0_44], %79 {strides = array<i32>} : memref<1x1xf32, #tpu.memory_space<vmem>>, vector<1x1xf32>,
      %cst_45 = arith.constant 0.000000e+00 : f32
      %81 = vector.broadcast %cst_45 : f32 to vector<1x512xf32>
      %c0_46 = arith.constant 0 : index
      %c0_47 = arith.constant 0 : index
      %82 = vector.load %arg15[%c0_46, %c0_47] : memref<1x512xf32, #tpu.memory_space<vmem>>, vector<1x512xf32>
      tpu.vector_store %arg15[%c0_46, %c0_47], %81 {strides = array<i32>} : memref<1x512xf32, #tpu.memory_space<vmem>>, vector<1x512xf32>,
    } else {
    }
    %c256_i32 = arith.constant 256 : i32
    %5 = arith.muli %1, %c256_i32 : i32
    %6 = tpu.iota {dimensions = array<i32: 0>} : vector<256x1xi32>
    %7 = vector.broadcast %5 : i32 to vector<256x1xi32>
    %8 = arith.addi %7, %6 : vector<256x1xi32>
    %c700_i32 = arith.constant 700 : i32
    %9 = vector.broadcast %c700_i32 : i32 to vector<256x1xi32>
    %10 = arith.cmpi slt, %8, %9 : vector<256x1xi32>
    %c0 = arith.constant 0 : index
    %c0_1 = arith.constant 0 : index
    %11 = vector.load %arg2[%c0, %c0_1] : memref<256x1024xbf16, #tpu.memory_space<vmem>>, vector<256x1024xbf16>
    %c0_2 = arith.constant 0 : index
    %c0_3 = arith.constant 0 : index
    %12 = vector.load %arg3[%c0_2, %c0_3] : memref<1024x512xbf16, #tpu.memory_space<vmem>>, vector<1024x512xbf16>
    %cst = arith.constant dense<0.000000e+00> : vector<256x512xf32>
    %13 = tpu.matmul %11, %12, %cst {dimension_numbers = #tpu.dot_dimension_numbers<[1], [0], [0], [1], [0, 0, 1, 1], [], []>} : vector<256x1024xbf16>, vector<1024x512xbf16>, vector<256x512xf32> -> vector<256x512xf32>
    %c0_4 = arith.constant 0 : index
    %c0_5 = arith.constant 0 : index
    %14 = vector.load %arg4[%c0_4, %c0_5] : memref<1x512xf32, #tpu.memory_space<vmem>>, vector<1x512xf32>
    %15 = vector.broadcast %14 : vector<1x512xf32> to vector<256x512xf32>
    %16 = arith.addf %13, %15 : vector<256x512xf32>
    %cst_6 = arith.constant 0.000000e+00 : f32
    %17 = vector.broadcast %cst_6 : f32 to vector<256x512xf32>
    %18 = arith.maximumf %16, %17 : vector<256x512xf32>
    %cst_7 = arith.constant 0.000000e+00 : f32
    %19 = vector.shape_cast %10 : vector<256x1xi1> to vector<256x1xi1>
    %20 = vector.broadcast %19 : vector<256x1xi1> to vector<256x512xi1>
    %21 = vector.broadcast %cst_7 : f32 to vector<256x512xf32>
    %22 = arith.select %20, %18, %21 : vector<256x512xi1>, vector<256x512xf32>
    %23 = arith.truncf %22 : vector<256x512xf32> to vector<256x512xbf16>
    %c0_8 = arith.constant 0 : index
    %c0_9 = arith.constant 0 : index
    %24 = vector.load %arg5[%c0_8, %c0_9] : memref<512x256xbf16, #tpu.memory_space<vmem>>, vector<512x256xbf16>
    %cst_10 = arith.constant dense<0.000000e+00> : vector<256x256xf32>
    %25 = tpu.matmul %23, %24, %cst_10 {dimension_numbers = #tpu.dot_dimension_numbers<[1], [0], [0], [1], [0, 0, 1, 1], [], []>} : vector<256x512xbf16>, vector<512x256xbf16>, vector<256x256xf32> -> vector<256x256xf32>
    %c0_11 = arith.constant 0 : index
    %c0_12 = arith.constant 0 : index
    %26 = vector.load %arg6[%c0_11, %c0_12] : memref<1x256xf32, #tpu.memory_space<vmem>>, vector<1x256xf32>
    %27 = vector.broadcast %26 : vector<1x256xf32> to vector<256x256xf32>
    %28 = arith.addf %25, %27 : vector<256x256xf32>
    %29 = vector.extract_strided_slice %28 {offsets = [0, 0], sizes = [256, 128], strides = [1, 1]} : vector<256x256xf32> to vector<256x128xf32>
    %30 = math.tanh %29 : vector<256x128xf32>
    %31 = vector.extract_strided_slice %28 {offsets = [0, 128], sizes = [256, 128], strides = [1, 1]} : vector<256x256xf32> to vector<256x128xf32>
    %32 = arith.negf %31 : vector<256x128xf32>
    %33 = math.exp %32 : vector<256x128xf32>
    %cst_13 = arith.constant 1.000000e+00 : f32
    %34 = vector.broadcast %cst_13 : f32 to vector<256x128xf32>
    %35 = arith.addf %34, %33 : vector<256x128xf32>
    %36 = arith.divf %34, %35 : vector<256x128xf32>
    %37 = arith.mulf %30, %36 : vector<256x128xf32>
    %c0_14 = arith.constant 0 : index
    %c0_15 = arith.constant 0 : index
    %38 = vector.load %arg7[%c0_14, %c0_15] : memref<1x128xf32, #tpu.memory_space<vmem>>, vector<1x128xf32>
    %cst_16 = arith.constant dense<0.000000e+00> : vector<1x256xf32>
    %39 = tpu.matmul %38, %37, %cst_16 {dimension_numbers = #tpu.dot_dimension_numbers<[1], [1], [0], [0], [0, 0, 1, 0], [], []>} : vector<1x128xf32>, vector<256x128xf32>, vector<1x256xf32> -> vector<1x256xf32>
    %c0_17 = arith.constant 0 : index
    %c0_18 = arith.constant 0 : index
    %40 = vector.load %arg8[%c0_17, %c0_18] : memref<1x1xf32, #tpu.memory_space<vmem>>, vector<1x1xf32>
    %41 = vector.broadcast %40 : vector<1x1xf32> to vector<1x256xf32>
    %42 = arith.addf %39, %41 : vector<1x256xf32>
    %c0_19 = arith.constant 0 : index
    %c0_20 = arith.constant 0 : index
    %43 = vector.load %arg9[%c0_19, %c0_20] : memref<1x256xf32, #tpu.memory_space<vmem>>, vector<1x256xf32>
    tpu.vector_store %arg9[%c0_19, %c0_20], %42 {strides = array<i32>} : memref<1x256xf32, #tpu.memory_space<vmem>>, vector<1x256xf32>,
    %44 = tpu.iota {dimensions = array<i32: 1>} : vector<1x256xi32>
    %45 = vector.broadcast %5 : i32 to vector<1x256xi32>
    %46 = arith.addi %45, %44 : vector<1x256xi32>
    %c700_i32_21 = arith.constant 700 : i32
    %47 = vector.broadcast %c700_i32_21 : i32 to vector<1x256xi32>
    %48 = arith.cmpi slt, %46, %47 : vector<1x256xi32>
    %cst_22 = arith.constant 0xFF800000 : f32
    %49 = vector.broadcast %cst_22 : f32 to vector<1x256xf32>
    %50 = arith.select %48, %42, %49 : vector<1x256xi1>, vector<1x256xf32>
    %c0_23 = arith.constant 0 : index
    %c0_24 = arith.constant 0 : index
    %51 = vector.load %arg13[%c0_23, %c0_24] : memref<1x1xf32, #tpu.memory_space<vmem>>, vector<1x1xf32>
    %cst_25 = arith.constant dense<0xFF800000> : vector<1xf32>
    %52 = vector.multi_reduction <maximumf>, %50, %cst_25 [1] : vector<1x256xf32> to vector<1xf32>
    %53 = vector.shape_cast %52 : vector<1xf32> to vector<1x1xf32>
    %54 = arith.maximumf %51, %53 : vector<1x1xf32>
    %55 = arith.subf %51, %54 : vector<1x1xf32>
    %56 = math.exp %55 : vector<1x1xf32>
    %57 = vector.broadcast %54 : vector<1x1xf32> to vector<1x256xf32>
    %58 = arith.subf %50, %57 : vector<1x256xf32>
    %59 = math.exp %58 : vector<1x256xf32>
    %c0_26 = arith.constant 0 : index
    %c0_27 = arith.constant 0 : index
    %60 = vector.load %arg14[%c0_26, %c0_27] : memref<1x1xf32, #tpu.memory_space<vmem>>, vector<1x1xf32>
    %61 = arith.mulf %56, %60 : vector<1x1xf32>
    %cst_28 = arith.constant dense<0.000000e+00> : vector<1xf32>
    %62 = vector.multi_reduction <add>, %59, %cst_28 [1] : vector<1x256xf32> to vector<1xf32>
    %63 = vector.shape_cast %62 : vector<1xf32> to vector<1x1xf32>
    %64 = arith.addf %61, %63 : vector<1x1xf32>
    %c0_29 = arith.constant 0 : index
    %c0_30 = arith.constant 0 : index
    %65 = vector.load %arg14[%c0_29, %c0_30] : memref<1x1xf32, #tpu.memory_space<vmem>>, vector<1x1xf32>
    tpu.vector_store %arg14[%c0_29, %c0_30], %64 {strides = array<i32>} : memref<1x1xf32, #tpu.memory_space<vmem>>, vector<1x1xf32>,
    %c0_31 = arith.constant 0 : index
    %c0_32 = arith.constant 0 : index
    %66 = vector.load %arg15[%c0_31, %c0_32] : memref<1x512xf32, #tpu.memory_space<vmem>>, vector<1x512xf32>
    %67 = vector.broadcast %56 : vector<1x1xf32> to vector<1x512xf32>
    %68 = arith.mulf %67, %66 : vector<1x512xf32>
    %69 = arith.truncf %59 : vector<1x256xf32> to vector<1x256xbf16>
    %cst_33 = arith.constant dense<0.000000e+00> : vector<1x512xf32>
    %70 = tpu.matmul %69, %23, %cst_33 {dimension_numbers = #tpu.dot_dimension_numbers<[1], [0], [0], [1], [0, 0, 1, 1], [], []>} : vector<1x256xbf16>, vector<256x512xbf16>, vector<1x512xf32> -> vector<1x512xf32>
    %71 = arith.addf %68, %70 : vector<1x512xf32>
    %c0_34 = arith.constant 0 : index
    %c0_35 = arith.constant 0 : index
    %72 = vector.load %arg15[%c0_34, %c0_35] : memref<1x512xf32, #tpu.memory_space<vmem>>, vector<1x512xf32>
    tpu.vector_store %arg15[%c0_34, %c0_35], %71 {strides = array<i32>} : memref<1x512xf32, #tpu.memory_space<vmem>>, vector<1x512xf32>,
    %c0_36 = arith.constant 0 : index
    %c0_37 = arith.constant 0 : index
    %73 = vector.load %arg13[%c0_36, %c0_37] : memref<1x1xf32, #tpu.memory_space<vmem>>, vector<1x1xf32>
    tpu.vector_store %arg13[%c0_36, %c0_37], %54 {strides = array<i32>} : memref<1x1xf32, #tpu.memory_space<vmem>>, vector<1x1xf32>,
    %c1_i32 = arith.constant 1 : i32
    %74 = arith.cmpi eq, %arg1, %c1_i32 : i32
    %75 = arith.extui %74 : i1 to i32
    %c0_i32_38 = arith.constant 0 : i32
    %76 = arith.cmpi ne, %75, %c0_i32_38 : i32
    scf.if %76 {
      %c0_39 = arith.constant 0 : index
      %c0_40 = arith.constant 0 : index
      %77 = vector.load %arg13[%c0_39, %c0_40] : memref<1x1xf32, #tpu.memory_space<vmem>>, vector<1x1xf32>
      %78 = vector.shape_cast %77 : vector<1x1xf32> to vector<1x1x1xf32>
      %c0_41 = arith.constant 0 : index
      %c0_42 = arith.constant 0 : index
      %c0_43 = arith.constant 0 : index
      %79 = vector.load %arg10[%c0_41, %c0_42, %c0_43] : memref<1x1x1xf32, #tpu.memory_space<vmem>>, vector<1x1x1xf32>
      tpu.vector_store %arg10[%c0_41, %c0_42, %c0_43], %78 {strides = array<i32>} : memref<1x1x1xf32, #tpu.memory_space<vmem>>, vector<1x1x1xf32>,
      %c0_44 = arith.constant 0 : index
      %c0_45 = arith.constant 0 : index
      %80 = vector.load %arg14[%c0_44, %c0_45] : memref<1x1xf32, #tpu.memory_space<vmem>>, vector<1x1xf32>
      %81 = vector.shape_cast %80 : vector<1x1xf32> to vector<1x1x1xf32>
      %c0_46 = arith.constant 0 : index
      %c0_47 = arith.constant 0 : index
      %c0_48 = arith.constant 0 : index
      %82 = vector.load %arg11[%c0_46, %c0_47, %c0_48] : memref<1x1x1xf32, #tpu.memory_space<vmem>>, vector<1x1x1xf32>
      tpu.vector_store %arg11[%c0_46, %c0_47, %c0_48], %81 {strides = array<i32>} : memref<1x1x1xf32, #tpu.memory_space<vmem>>, vector<1x1x1xf32>,
      %c0_49 = arith.constant 0 : index
      %c0_50 = arith.constant 0 : index
      %83 = vector.load %arg15[%c0_49, %c0_50] : memref<1x512xf32, #tpu.memory_space<vmem>>, vector<1x512xf32>
      %84 = vector.shape_cast %83 : vector<1x512xf32> to vector<1x1x512xf32>
      %c0_51 = arith.constant 0 : index
      %c0_52 = arith.constant 0 : index
      %c0_53 = arith.constant 0 : index
      %85 = vector.load %arg12[%c0_51, %c0_52, %c0_53] : memref<1x1x512xf32, #tpu.memory_space<vmem>>, vector<1x1x512xf32>
      tpu.vector_store %arg12[%c0_51, %c0_52, %c0_53], %84 {strides = array<i32>} : memref<1x1x512xf32, #tpu.memory_space<vmem>>, vector<1x1x512xf32>,
    } else {
    }
    return
  }
  func.func @transform_0(%arg0: i32, %arg1: i32) -> (i32, i32) {
    %c2_i32 = arith.constant 2 : i32
    %0 = arith.muli %arg0, %c2_i32 : i32
    %1 = arith.addi %0, %arg1 : i32
    %c2_i32_0 = arith.constant 2 : i32
    %2 = arith.minsi %1, %c2_i32_0 : i32
    %c0_i32 = arith.constant 0 : i32
    %c0_i32_1 = arith.constant 0 : i32
    return %2, %c0_i32 : i32, i32
  }
  func.func @transform_1(%arg0: i32, %arg1: i32) -> (i32, i32) {
    %c0_i32 = arith.constant 0 : i32
    %c0_i32_0 = arith.constant 0 : i32
    %c0_i32_1 = arith.constant 0 : i32
    return %c0_i32, %c0_i32_0 : i32, i32
  }
  func.func @transform_2(%arg0: i32, %arg1: i32) -> (i32, i32) {
    %c0_i32 = arith.constant 0 : i32
    %c0_i32_0 = arith.constant 0 : i32
    %c0_i32_1 = arith.constant 0 : i32
    return %c0_i32, %c0_i32_0 : i32, i32
  }
  func.func @transform_3(%arg0: i32, %arg1: i32) -> (i32, i32) {
    %c0_i32 = arith.constant 0 : i32
    %c0_i32_0 = arith.constant 0 : i32
    %c0_i32_1 = arith.constant 0 : i32
    return %c0_i32, %c0_i32_0 : i32, i32
  }
  func.func @transform_4(%arg0: i32, %arg1: i32) -> (i32, i32) {
    %c0_i32 = arith.constant 0 : i32
    %c0_i32_0 = arith.constant 0 : i32
    %c0_i32_1 = arith.constant 0 : i32
    return %c0_i32, %c0_i32_0 : i32, i32
  }
  func.func @transform_5(%arg0: i32, %arg1: i32) -> (i32, i32) {
    %c0_i32 = arith.constant 0 : i32
    %c0_i32_0 = arith.constant 0 : i32
    %c0_i32_1 = arith.constant 0 : i32
    return %c0_i32, %c0_i32_0 : i32, i32
  }
  func.func @transform_6(%arg0: i32, %arg1: i32) -> (i32, i32) {
    %c0_i32 = arith.constant 0 : i32
    %c0_i32_0 = arith.constant 0 : i32
    %c0_i32_1 = arith.constant 0 : i32
    return %c0_i32, %c0_i32_0 : i32, i32
  }
  func.func @transform_7(%arg0: i32, %arg1: i32) -> (i32, i32) {
    %c2_i32 = arith.constant 2 : i32
    %0 = arith.muli %arg0, %c2_i32 : i32
    %1 = arith.addi %0, %arg1 : i32
    %c0_i32 = arith.constant 0 : i32
    %c0_i32_0 = arith.constant 0 : i32
    return %c0_i32, %1 : i32, i32
  }
  func.func @transform_8(%arg0: i32, %arg1: i32) -> (i32, i32, i32) {
    %c0_i32 = arith.constant 0 : i32
    %c0_i32_0 = arith.constant 0 : i32
    %c0_i32_1 = arith.constant 0 : i32
    return %arg0, %c0_i32, %c0_i32_0 : i32, i32, i32
  }
  func.func @transform_9(%arg0: i32, %arg1: i32) -> (i32, i32, i32) {
    %c0_i32 = arith.constant 0 : i32
    %c0_i32_0 = arith.constant 0 : i32
    %c0_i32_1 = arith.constant 0 : i32
    return %arg0, %c0_i32, %c0_i32_0 : i32, i32, i32
  }
  func.func @transform_10(%arg0: i32, %arg1: i32) -> (i32, i32, i32) {
    %c0_i32 = arith.constant 0 : i32
    %c0_i32_0 = arith.constant 0 : i32
    %c0_i32_1 = arith.constant 0 : i32
    return %arg0, %c0_i32, %c0_i32_0 : i32, i32, i32
  }
}

</mosaic_0001>

<bundles_post_ra>
// kernel: abmil_forward.1
= control target key start
LH: loop header
LB: loop body
LE: loop exit
PB: predicated region body
PF: predicated region fallthrough
CT: control target
= control target key end

     0   :  { %s8059_s15 = smov 0   ;;  %s8061_s16 = smov 0   ;;  %s11395_s0 = inlined_call_operand.vmem [shape: bf16[700,1024], index: 0, kind: input, shape index: {}]   ;;  %s11396_s1 = inlined_call_operand.vmem [shape: bf16[1024,512], index: 1, kind: input, shape index: {}]   ;;  %s11397_s2 = inlined_call_operand.vmem [shape: f32[1,512], index: 2, kind: input, shape index: {}]   ;;  %s11398_s3 = inlined_call_operand.vmem [shape: bf16[512,256], index: 3, kind: input, shape index: {}]   ;;  %s11399_s4 = inlined_call_operand.vmem [shape: f32[1,256], index: 4, kind: input, shape index: {}]   ;;  %s11400_s5 = inlined_call_operand.vmem [shape: f32[1,128], index: 5, kind: input, shape index: {}]   ;;  %s11401_s6 = inlined_call_operand.<no memory space> [shape: f32[1,1], index: 6, kind: input, shape index: {}]   ;;  %s11402_s7 = inlined_call_operand.vmem [shape: f32[1,1024], index: 7, kind: output, shape index: {0}]   ;;  %s11403_s8 = inlined_call_operand.vmem [shape: f32[2,1,1], index: 8, kind: output, shape index: {1}]   ;;  %s11404_s9 = inlined_call_operand.vmem [shape: f32[2,1,1], index: 9, kind: output, shape index: {2}]   ;;  %s11405_s10 = inlined_call_operand.vmem [shape: f32[2,1,512], index: 10, kind: output, shape index: {3}]  }
   0x1   :  { %v16_v0 = vstv %s11401_s6  ;;  %s8063_s17 = smov 0   ;;  %s8065_s18 = smov 0  }
   0x2   :  { %17 = vst [vmem:[#allocation5] sm:$0x1] %v16_v0  ;;  %s8067_s19 = smov 0  }
   0x3 LB: > { %11592 = sst [smem:[#allocation6_spill]] %s7991_s18  ;;  %s32_s6 = sadd.s32 1, %s7987_s17  ;;  %s7995_s19 = sphi %s8067_s19, %s23_s19   ;;  %s7991_s18 = sphi %s8065_s18, %s12140_s18   ;;  %s7987_s17 = sphi %s8063_s17, %s12142_s17   ;;  %s7983_s16 = sphi %s8061_s16, %s12138_s16   ;;  %s7979_s15 = sphi %s8059_s15, %s12141_s15  }
   0x4   : > { %s35_s20 = sadd.s32 1, %s7991_s18  ;;  %p33_p0 = scmp.ge.s32.totalorder %s32_s6, 2 }
   0x5   : > { %p6319_p1 = scmp.ge.s32.totalorder %s7995_s19, 1  ;;  %p365_p2 = scmp.lt.s32.totalorder %s7995_s19, 5 }
   0x6   : > { %s12144_s6 = smov (%p33_p0, %s32_s6), 0  ;;  %s12146_s20 = smov (!%p33_p0, %s35_s20), %s7991_s18 }
   0x7   : > { %11593 = sst [smem:[#allocation7_spill]] %s12144_s6  ;;  %p366_p3 = pnand %p6319_p1, %p365_p2 }
   0x8   : > { %p37_p4 = scmp.ge.s32.totalorder %s12146_s20, 2 }
   0x9   : > { %369 = sbr.rel (%p366_p3) target bundleno = 1810 (0x712), region = 48 }
   0xa   : > { %s12148_s20 = smov (%p37_p4, %s12146_s20), 0 }
   0xb   : > { %11594 = sst [smem:[#allocation8_spill]] %s12148_s20 }
   0xe   : > { %s6320_s21 = sshll.u32 %s7983_s16, 1  ;;  %p458_p7 = scmp.lt.s32.totalorder %s7983_s16, 1 }
   0xf   : > { %s8092_s22 = sadd.s32 %s7979_s15, %s6320_s21  ;;  %p6328_p9 = scmp.ne.s32.totalorder %s7979_s15, 0 }
  0x10   : > { %p426_p5 = scmp.lt.s32.totalorder %s8092_s22, 2  ;;  %s6325_s23 = sshll.u32 %s8092_s22, 1 }
  0x11   : > { %p452_p6 = scmp.lt.s32.totalorder %s6325_s23, 7  ;;  %s12152_s16 = smov (!%p458_p7, %s7983_s16), 1 }
  0x12   : > { %s427_s24 = scalar_select %p426_p5, %s8092_s22, 2 }
  0x13   : > { %s12150_s23 = smov (!%p452_p6, %s6325_s23), 7  ;;  %s460_s11 = scalar_lea.vmem %s11403_s8, %s12152_s16 }
  0x14   : > { %s6321_s25 = sshll.u32 %s427_s24, 5  ;;  %s463_s14 = scalar_lea.vmem %s11404_s9, %s12152_s16 }
  0x15   : > { %p434_p8 = scmp.lt.s32.totalorder %s6321_s25, 87  ;;  %s6326_s24 = sshll.u32 %s12152_s16, 2 }
  0x16   : > { %s8122_s18 = scalar_lea.vmem %s11405_s10, %s6326_s24  ;;  %473 = sbr.rel (%p6328_p9) target bundleno = 31 (0x1f), region = 52 }
  0x17   : > { %s12154_s25 = smov (!%p434_p8, %s6321_s25), 87 }
  0x18   : > { %s7197_s21 = sshll.u32 %s12154_s25, 5 }
  0x19   : > { %s8117_s26 = scalar_lea.vmem %s11395_s0, %s7197_s21 }
  0x1b   : > { %vm474_vm0 = vcmask 0   ;;  %v477_v1 = vlaneseq  ;;  %v7997_v2 = vmov -1e+30   ;;  %v7998_v3 = vmov 0.0  }
  0x1c   : > { %475 = vst.msk [vmem:[#allocation2] sm:$0x1] %vm474_vm0, %v7997_v2  ;;  %476 = vst.msk [vmem:[#allocation3] sm:$0x1] %vm474_vm0, %v7998_v3 }
  0x1d   : > { %vm479_vm1 = vcmp.lt.s32.totalorder %v477_v1, 512 }
  0x1e   : > { %481 = vst.msk [vmem:[#allocation4] sm:$0xf] %vm479_vm1, %v7998_v3 }
  0x1f PF: > { %v7278_v4 = vld [vmem:[%s11396_s1 + $0xe4] ss:$16 sps:$4 sm:$0xff]   ;;  %v7282_v6 = vld [vmem:[%s11396_s1 + $0xe0] ss:$16 sps:$4 sm:$0xff]   ;;  %v582_v52 = vld [vmem:[%s8117_s26 + $0x8] sm:$0xff]  ;;  %s6329_s28 = sshll.u32 %s8092_s22, 8  ;;  %s12137_s24 = scalar_lea.vmem %s11402_s7, %s12150_s23 }
  0x20   : > { %v7280_v5 = vld [vmem:[%s11396_s1 + $0x2e4] ss:$16 sps:$4 sm:$0xff]   ;;  %2907 = vmatprep.subr.bf16.mxu0 %v7278_v4  ;;  %v7283_v7 = vld [vmem:[%s11396_s1 + $0x2e0] ss:$16 sps:$4 sm:$0xff]   ;;  %v586_v53 = vld [vmem:[%s8117_s26 + $0x28] sm:$0xff]  ;;  %p7194_p10 = scmp.ne.s32.totalorder %s7979_s15, 1 }
  0x21   : > { %3100 = vmatprep.subr.bf16.mxu1 %v7280_v5  ;;  %v7284_v8 = vld [vmem:[%s11396_s1 + $0xc4] ss:$16 sps:$4 sm:$0xff]   ;;  %2908 = vmatpush1.bf16.msra.mxu0 %v7282_v6  ;;  %v7288_v10 = vld [vmem:[%s11396_s1 + $0xc0] ss:$16 sps:$4 sm:$0xff]   ;;  %v8281_v59 = vcombine.high %v582_v52, %v586_v53 }
  0x22   : > { %3101 = vmatpush1.bf16.msra.mxu1 %v7283_v7  ;;  %v7286_v9 = vld [vmem:[%s11396_s1 + $0x2c4] ss:$16 sps:$4 sm:$0xff]   ;;  %2909 = vmatprep.subr.bf16.mxu0 %v7284_v8  ;;  %v7289_v11 = vld [vmem:[%s11396_s1 + $0x2c0] ss:$16 sps:$4 sm:$0xff]  }
  0x23   : > { %3102 = vmatprep.subr.bf16.mxu1 %v7286_v9  ;;  %v7290_v12 = vld [vmem:[%s11396_s1 + $0xa4] ss:$16 sps:$4 sm:$0xff]   ;;  %v7294_v14 = vld [vmem:[%s11396_s1 + $0xa0] ss:$16 sps:$4 sm:$0xff]   ;;  %3132 = vmatprep.mubr.bf16.mxu1 %v8281_v59 }
  0x24   : > { %v7292_v13 = vld [vmem:[%s11396_s1 + $0x2a4] ss:$16 sps:$4 sm:$0xff]   ;;  %v7295_v15 = vld [vmem:[%s11396_s1 + $0x2a0] ss:$16 sps:$4 sm:$0xff]  }
  0x25   : > { %2910 = vmatpush1.bf16.msra.mxu0 %v7288_v10  ;;  %v7296_v16 = vld [vmem:[%s11396_s1 + $0x84] ss:$16 sps:$4 sm:$0xff]   ;;  %v7300_v18 = vld [vmem:[%s11396_s1 + $0x80] ss:$16 sps:$4 sm:$0xff]  }
  0x26   : > { %3103 = vmatpush1.bf16.msra.mxu1 %v7289_v11  ;;  %2911 = vmatprep.subr.bf16.mxu0 %v7290_v12  ;;  %v7298_v17 = vld [vmem:[%s11396_s1 + $0x284] ss:$16 sps:$4 sm:$0xff]   ;;  %v7301_v19 = vld [vmem:[%s11396_s1 + $0x280] ss:$16 sps:$4 sm:$0xff]   ;;  %v590_v12 = vld [vmem:[%s8117_s26 + $0x48] sm:$0xff] }
  0x27   : > { %3104 = vmatprep.subr.bf16.mxu1 %v7292_v13  ;;  %v7302_v20 = vld [vmem:[%s11396_s1 + $0x64] ss:$16 sps:$4 sm:$0xff]   ;;  %v7306_v22 = vld [vmem:[%s11396_s1 + $0x60] ss:$16 sps:$4 sm:$0xff]   ;;  %v594_v13 = vld [vmem:[%s8117_s26 + $0x68] sm:$0xff] }
  0x28   : > { %v7304_v21 = vld [vmem:[%s11396_s1 + $0x264] ss:$16 sps:$4 sm:$0xff]   ;;  %v7307_v23 = vld [vmem:[%s11396_s1 + $0x260] ss:$16 sps:$4 sm:$0xff]  }
  0x29   : > { %2912 = vmatpush1.bf16.msra.mxu0 %v7294_v14  ;;  %v7308_v24 = vld [vmem:[%s11396_s1 + $0x44] ss:$16 sps:$4 sm:$0xff]   ;;  %v7312_v26 = vld [vmem:[%s11396_s1 + $0x40] ss:$16 sps:$4 sm:$0xff]  }
  0x2a   : > { %3105 = vmatpush1.bf16.msra.mxu1 %v7295_v15  ;;  %2913 = vmatprep.subr.bf16.mxu0 %v7296_v16  ;;  %v7310_v25 = vld [vmem:[%s11396_s1 + $0x244] ss:$16 sps:$4 sm:$0xff]   ;;  %v7313_v27 = vld [vmem:[%s11396_s1 + $0x240] ss:$16 sps:$4 sm:$0xff]  }
  0x2b   : > { %3106 = vmatprep.subr.bf16.mxu1 %v7298_v17  ;;  %v7314_v28 = vld [vmem:[%s11396_s1 + $0x24] ss:$16 sps:$4 sm:$0xff]   ;;  %v7318_v30 = vld [vmem:[%s11396_s1 + $0x20] ss:$16 sps:$4 sm:$0xff]   ;;  %v8339_v17 = vcombine.low %v582_v52, %v586_v53 }
  0x2c   : > { %v7316_v29 = vld [vmem:[%s11396_s1 + $0x224] ss:$16 sps:$4 sm:$0xff]   ;;  %v7319_v31 = vld [vmem:[%s11396_s1 + $0x220] ss:$16 sps:$4 sm:$0xff]  }
  0x2d   : > { %2914 = vmatpush1.bf16.msra.mxu0 %v7300_v18  ;;  %v7320_v32 = vld [vmem:[%s11396_s1 + $0x4] ss:$16 sps:$4 sm:$0xff]   ;;  %v7324_v34 = vld [vmem:[%s11396_s1] ss:$16 sps:$4 sm:$0xff]  }
  0x2e   : > { %3107 = vmatpush1.bf16.msra.mxu1 %v7301_v19  ;;  %2915 = vmatprep.subr.bf16.mxu0 %v7302_v20  ;;  %v7322_v33 = vld [vmem:[%s11396_s1 + $0x204] ss:$16 sps:$4 sm:$0xff]   ;;  %v7325_v35 = vld [vmem:[%s11396_s1 + $0x200] ss:$16 sps:$4 sm:$0xff]   ;;  %v8343_v19 = vcombine.high %v590_v12, %v594_v13 }
  0x2f   : > { %3108 = vmatprep.subr.bf16.mxu1 %v7304_v21  ;;  %v7326_v36 = vld [vmem:[%s11396_s1 + $0x1e4] ss:$16 sps:$4 sm:$0xff]   ;;  %v7330_v38 = vld [vmem:[%s11396_s1 + $0x1e0] ss:$16 sps:$4 sm:$0xff]  }
  0x30   : > { %v7328_v37 = vld [vmem:[%s11396_s1 + $0x3e4] ss:$16 sps:$4 sm:$0xff]   ;;  %v7331_v39 = vld [vmem:[%s11396_s1 + $0x3e0] ss:$16 sps:$4 sm:$0xff]  }
  0x31   : > { %2916 = vmatpush1.bf16.msra.mxu0 %v7306_v22  ;;  %v7332_v40 = vld [vmem:[%s11396_s1 + $0x1c4] ss:$16 sps:$4 sm:$0xff]   ;;  %v7336_v42 = vld [vmem:[%s11396_s1 + $0x1c0] ss:$16 sps:$4 sm:$0xff]  }
  0x32   : > { %3109 = vmatpush1.bf16.msra.mxu1 %v7307_v23  ;;  %2917 = vmatprep.subr.bf16.mxu0 %v7308_v24  ;;  %v7334_v41 = vld [vmem:[%s11396_s1 + $0x3c4] ss:$16 sps:$4 sm:$0xff]   ;;  %v7337_v43 = vld [vmem:[%s11396_s1 + $0x3c0] ss:$16 sps:$4 sm:$0xff]  }
  0x33   : > { %3110 = vmatprep.subr.bf16.mxu1 %v7310_v25  ;;  %v7338_v44 = vld [vmem:[%s11396_s1 + $0x1a4] ss:$16 sps:$4 sm:$0xff]   ;;  %v7342_v46 = vld [vmem:[%s11396_s1 + $0x1a0] ss:$16 sps:$4 sm:$0xff]  }
  0x34   : > { %v7340_v45 = vld [vmem:[%s11396_s1 + $0x3a4] ss:$16 sps:$4 sm:$0xff]   ;;  %v7343_v47 = vld [vmem:[%s11396_s1 + $0x3a0] ss:$16 sps:$4 sm:$0xff]  }
  0x35   : > { %2918 = vmatpush1.bf16.msra.mxu0 %v7312_v26  ;;  %v7344_v48 = vld [vmem:[%s11396_s1 + $0x184] ss:$16 sps:$4 sm:$0xff]   ;;  %v7348_v54 = vld [vmem:[%s11396_s1 + $0x180] ss:$16 sps:$4 sm:$0xff]   ;;  %v598_v26 = vld [vmem:[%s8117_s26 + $0x88] sm:$0xff] }
  0x36   : > { %3111 = vmatpush1.bf16.msra.mxu1 %v7313_v27  ;;  %2919 = vmatprep.subr.bf16.mxu0 %v7314_v28  ;;  %v7346_v49 = vld [vmem:[%s11396_s1 + $0x384] ss:$16 sps:$4 sm:$0xff]   ;;  %v7349_v55 = vld [vmem:[%s11396_s1 + $0x380] ss:$16 sps:$4 sm:$0xff]   ;;  %v602_v27 = vld [vmem:[%s8117_s26 + $0xa8] sm:$0xff] }
  0x37   : > { %3112 = vmatprep.subr.bf16.mxu1 %v7316_v29  ;;  %v581_v50 = vld [vmem:[%s8117_s26] sm:$0xff] }
  0x38   : > { %v585_v51 = vld [vmem:[%s8117_s26 + $0x20] sm:$0xff] }
  0x39   : > { %2920 = vmatpush1.bf16.msra.mxu0 %v7318_v30  ;;  %v8273_v56 = vcombine.high %v581_v50, %v585_v51  ;;  %v7350_v57 = vld [vmem:[%s11396_s1 + $0x164] ss:$16 sps:$4 sm:$0xff]   ;;  %v7354_v60 = vld [vmem:[%s11396_s1 + $0x160] ss:$16 sps:$4 sm:$0xff]   ;;  %v8337_v16 = vcombine.low %v581_v50, %v585_v51 }
  0x3a   : > { %3113 = vmatpush1.bf16.msra.mxu1 %v7319_v31  ;;  %2921 = vmatprep.subr.bf16.mxu0 %v7320_v32  ;;  %v7352_v58 = vld [vmem:[%s11396_s1 + $0x364] ss:$16 sps:$4 sm:$0xff]   ;;  %v7355_v61 = vld [vmem:[%s11396_s1 + $0x360] ss:$16 sps:$4 sm:$0xff]  }
  0x3b   : > { %3114 = vmatprep.subr.bf16.mxu1 %v7322_v33  ;;  %2939 = vmatprep.mubr.bf16.mxu0 %v8273_v56  ;;  %v7356_v62 = vld [vmem:[%s11396_s1 + $0x144] ss:$16 sps:$4 sm:$0xff]   ;;  %v7360_v0 = vld [vmem:[%s11396_s1 + $0x140] ss:$16 sps:$4 sm:$0xff]   ;;  %v8379_v33 = vcombine.low %v590_v12, %v594_v13  ;;  %v622_v12 = vld [vmem:[%s8117_s26 + $0x148] sm:$0xff] }
  0x3c   : > { %v7358_v63 = vld [vmem:[%s11396_s1 + $0x344] ss:$16 sps:$4 sm:$0xff]   ;;  %v7361_v1 = vld [vmem:[%s11396_s1 + $0x340] ss:$16 sps:$4 sm:$0xff]   ;;  %v626_v13 = vld [vmem:[%s8117_s26 + $0x168] sm:$0xff] }
  0x3d   : > { %2922 = vmatpush1.bf16.msra.mxu0 %v7324_v34  ;;  %v7362_v2 = vld [vmem:[%s11396_s1 + $0x124] ss:$16 sps:$4 sm:$0xff]   ;;  %v7366_v4 = vld [vmem:[%s11396_s1 + $0x120] ss:$16 sps:$4 sm:$0xff]  }
  0x3e   : > { %3115 = vmatpush1.bf16.msra.mxu1 %v7325_v35  ;;  %2923 = vmatprep.subr.bf16.mxu0 %v7326_v36  ;;  %v7364_v3 = vld [vmem:[%s11396_s1 + $0x324] ss:$16 sps:$4 sm:$0xff]   ;;  %v7367_v5 = vld [vmem:[%s11396_s1 + $0x320] ss:$16 sps:$4 sm:$0xff]   ;;  %v8383_v35 = vcombine.high %v598_v26, %v602_v27 }
  0x3f   : > { %3116 = vmatprep.subr.bf16.mxu1 %v7328_v37  ;;  %v7368_v6 = vld [vmem:[%s11396_s1 + $0x104] ss:$16 sps:$4 sm:$0xff]   ;;  %v7372_v8 = vld [vmem:[%s11396_s1 + $0x100] ss:$16 sps:$4 sm:$0xff]  }
  0x40   : > { %v7370_v7 = vld [vmem:[%s11396_s1 + $0x304] ss:$16 sps:$4 sm:$0xff]   ;;  %v7373_v9 = vld [vmem:[%s11396_s1 + $0x300] ss:$16 sps:$4 sm:$0xff]  }
  0x41   : > { %2924 = vmatpush2.bf16.msra.mxu0 %v7330_v38  ;;  %v589_v10 = vld [vmem:[%s8117_s26 + $0x40] sm:$0xff] }
  0x42   : > { %3117 = vmatpush2.bf16.msra.mxu1 %v7331_v39  ;;  %2925 = vmatprep.subr.bf16.mxu0 %v7332_v40  ;;  %v593_v11 = vld [vmem:[%s8117_s26 + $0x60] sm:$0xff] }
  0x43   : > { %3118 = vmatprep.subr.bf16.mxu1 %v7334_v41  ;;  %v7376_v14 = vld [vmem:[%s11396_s1 + $0x4e4] ss:$16 sps:$4 sm:$0xff]   ;;  %v8341_v18 = vcombine.high %v589_v10, %v593_v11  ;;  %v7374_v20 = vld [vmem:[%s11396_s1 + $0x4e0] ss:$16 sps:$4 sm:$0xff]   ;;  %v8377_v32 = vcombine.low %v589_v10, %v593_v11 }
  0x44   : > { %v7379_v15 = vld [vmem:[%s11396_s1 + $0x6e4] ss:$16 sps:$4 sm:$0xff]   ;;  %v7377_v21 = vld [vmem:[%s11396_s1 + $0x6e0] ss:$16 sps:$4 sm:$0xff]  }
  0x45   : > { %2926 = vmatpush2.bf16.msra.mxu0 %v7336_v42  ;;  %v7382_v22 = vld [vmem:[%s11396_s1 + $0x4c4] ss:$16 sps:$4 sm:$0xff]   ;;  %v7380_v28 = vld [vmem:[%s11396_s1 + $0x4c0] ss:$16 sps:$4 sm:$0xff]   ;;  %v606_v42 = vld [vmem:[%s8117_s26 + $0xc8] sm:$0xff] }
  0x46   : > { %3119 = vmatpush2.bf16.msra.mxu1 %v7337_v43  ;;  %2927 = vmatprep.subr.bf16.mxu0 %v7338_v44  ;;  %v7385_v23 = vld [vmem:[%s11396_s1 + $0x6c4] ss:$16 sps:$4 sm:$0xff]   ;;  %v7383_v29 = vld [vmem:[%s11396_s1 + $0x6c0] ss:$16 sps:$4 sm:$0xff]   ;;  %v610_v43 = vld [vmem:[%s8117_s26 + $0xe8] sm:$0xff] }
  0x47   : > { %3120 = vmatprep.subr.bf16.mxu1 %v7340_v45  ;;  %v597_v24 = vld [vmem:[%s8117_s26 + $0x80] sm:$0xff]  ;;  %v8423_v51 = vcombine.high %v606_v42, %v610_v43 }
  0x48   : > { %v601_v25 = vld [vmem:[%s8117_s26 + $0xa0] sm:$0xff] }
  0x49   : > { %2928 = vmatpush2.bf16.msra.mxu0 %v7342_v46  ;;  %v7388_v30 = vld [vmem:[%s11396_s1 + $0x4a4] ss:$16 sps:$4 sm:$0xff]   ;;  %v8381_v34 = vcombine.high %v597_v24, %v601_v25  ;;  %v7386_v36 = vld [vmem:[%s11396_s1 + $0x4a0] ss:$16 sps:$4 sm:$0xff]  }
  0x4a   : > { %3121 = vmatpush2.bf16.msra.mxu1 %v7343_v47  ;;  %2929 = vmatprep.subr.bf16.mxu0 %v7344_v48  ;;  %v7391_v31 = vld [vmem:[%s11396_s1 + $0x6a4] ss:$16 sps:$4 sm:$0xff]   ;;  %v7389_v37 = vld [vmem:[%s11396_s1 + $0x6a0] ss:$16 sps:$4 sm:$0xff]   ;;  %v8417_v48 = vcombine.low %v597_v24, %v601_v25  ;;  %v8503_v25 = vcombine.high %v622_v12, %v626_v13 }
  0x4b   : > { %3122 = vmatprep.subr.bf16.mxu1 %v7346_v49  ;;  %v7394_v38 = vld [vmem:[%s11396_s1 + $0x484] ss:$16 sps:$4 sm:$0xff]   ;;  %v7392_v44 = vld [vmem:[%s11396_s1 + $0x480] ss:$16 sps:$4 sm:$0xff]   ;;  %v8419_v49 = vcombine.low %v598_v26, %v602_v27 }
  0x4c   : > { %v7397_v39 = vld [vmem:[%s11396_s1 + $0x684] ss:$16 sps:$4 sm:$0xff]   ;;  %v7395_v45 = vld [vmem:[%s11396_s1 + $0x680] ss:$16 sps:$4 sm:$0xff]  }
  0x4d   : > { %2930 = vmatpush2.bf16.msra.mxu0 %v7348_v54  ;;  %v605_v40 = vld [vmem:[%s8117_s26 + $0xc0] sm:$0xff] }
  0x4e   : > { %3123 = vmatpush2.bf16.msra.mxu1 %v7349_v55  ;;  %2931 = vmatprep.subr.bf16.mxu0 %v7350_v57  ;;  %v609_v41 = vld [vmem:[%s8117_s26 + $0xe0] sm:$0xff] }
  0x4f   : > { %3124 = vmatprep.subr.bf16.mxu1 %v7352_v58  ;;  %v7400_v46 = vld [vmem:[%s11396_s1 + $0x464] ss:$16 sps:$4 sm:$0xff]   ;;  %v8421_v50 = vcombine.high %v605_v40, %v609_v41  ;;  %v7398_v52 = vld [vmem:[%s11396_s1 + $0x460] ss:$16 sps:$4 sm:$0xff]  }
  0x50   : > { %v7403_v47 = vld [vmem:[%s11396_s1 + $0x664] ss:$16 sps:$4 sm:$0xff]   ;;  %v7401_v53 = vld [vmem:[%s11396_s1 + $0x660] ss:$16 sps:$4 sm:$0xff]  }
  0x51   : > { %2932 = vmatpush2.bf16.msra.mxu0 %v7354_v60  ;;  %v7406_v54 = vld [vmem:[%s11396_s1 + $0x444] ss:$16 sps:$4 sm:$0xff]   ;;  %v614_v60 = vld [vmem:[%s8117_s26 + $0x108] sm:$0xff]  ;;  %v7422_v26 = vld [vmem:[%s11396_s1 + $0x5e0] ss:$16 sps:$4 sm:$0xff]  }
  0x52   : > { %3125 = vmatpush2.bf16.msra.mxu1 %v7355_v61  ;;  %2933 = vmatprep.subr.bf16.mxu0 %v7356_v62  ;;  %v7409_v55 = vld [vmem:[%s11396_s1 + $0x644] ss:$16 sps:$4 sm:$0xff]   ;;  %v618_v61 = vld [vmem:[%s8117_s26 + $0x128] sm:$0xff]  ;;  %v7404_v62 = vld [vmem:[%s11396_s1 + $0x440] ss:$16 sps:$4 sm:$0xff]  }
  0x53   : > { %3126 = vmatprep.subr.bf16.mxu1 %v7358_v63  ;;  %v613_v57 = vld [vmem:[%s8117_s26 + $0x100] sm:$0xff] }
  0x54   : > { %v617_v58 = vld [vmem:[%s8117_s26 + $0x120] sm:$0xff] }
  0x55   : > { %2934 = vmatpush2.bf16.msra.mxu0 %v7360_v0  ;;  %v7407_v63 = vld [vmem:[%s11396_s1 + $0x640] ss:$16 sps:$4 sm:$0xff]   ;;  %v7412_v0 = vld [vmem:[%s11396_s1 + $0x424] ss:$16 sps:$4 sm:$0xff]  }
  0x56   : > { %3127 = vmatpush2.bf16.msra.mxu1 %v7361_v1  ;;  %2935 = vmatprep.subr.bf16.mxu0 %v7362_v2  ;;  %v7415_v1 = vld [vmem:[%s11396_s1 + $0x624] ss:$16 sps:$4 sm:$0xff]   ;;  %v8457_v2 = vcombine.low %v605_v40, %v609_v41  ;;  %v7425_v27 = vld [vmem:[%s11396_s1 + $0x7e0] ss:$16 sps:$4 sm:$0xff]  }
  0x57   : > { %3128 = vmatprep.subr.bf16.mxu1 %v7364_v3  ;;  %v8459_v3 = vcombine.low %v606_v42, %v610_v43  ;;  %v621_v10 = vld [vmem:[%s8117_s26 + $0x140] sm:$0xff]  ;;  %v8539_v43 = vcombine.low %v622_v12, %v626_v13 }
  0x58   : > { %v625_v11 = vld [vmem:[%s8117_s26 + $0x160] sm:$0xff] }
  0x59   : > { %2936 = vmatpush2.bf16.msra.mxu0 %v7366_v4  ;;  %v8461_v4 = vcombine.high %v613_v57, %v617_v58  ;;  %v8501_v24 = vcombine.high %v621_v10, %v625_v11  ;;  %v7436_v40 = vld [vmem:[%s11396_s1 + $0x5a4] ss:$16 sps:$4 sm:$0xff]   ;;  %v8537_v42 = vcombine.low %v621_v10, %v625_v11 }
  0x5a   : > { %3129 = vmatpush2.bf16.msra.mxu1 %v7367_v5  ;;  %2937 = vmatprep.subr.bf16.mxu0 %v7368_v6  ;;  %v8463_v5 = vcombine.high %v614_v60, %v618_v61  ;;  %v7410_v6 = vld [vmem:[%s11396_s1 + $0x420] ss:$16 sps:$4 sm:$0xff]   ;;  %v7439_v41 = vld [vmem:[%s11396_s1 + $0x7a4] ss:$16 sps:$4 sm:$0xff]  }
  0x5b   : > { %3130 = vmatprep.subr.bf16.mxu1 %v7370_v7  ;;  %v7413_v7 = vld [vmem:[%s11396_s1 + $0x620] ss:$16 sps:$4 sm:$0xff]   ;;  %v7454_v10 = vld [vmem:[%s11396_s1 + $0x544] ss:$16 sps:$4 sm:$0xff]  }
  0x5c   : > { %v7457_v11 = vld [vmem:[%s11396_s1 + $0x744] ss:$16 sps:$4 sm:$0xff]  }
  0x5d   : > { %2938 = vmatpush2.bf16.msra.mxu0 %v7372_v8  ;;  %v7418_v8 = vld [vmem:[%s11396_s1 + $0x404] ss:$16 sps:$4 sm:$0xff]  }
  0x5e   : > { %3131 = vmatpush2.bf16.msra.mxu1 %v7373_v9  ;;  %3293 = vmatprep.subr.bf16.mxu0 %v7376_v14  ;;  %v7421_v9 = vld [vmem:[%s11396_s1 + $0x604] ss:$16 sps:$4 sm:$0xff]   ;;  %v7416_v14 = vld [vmem:[%s11396_s1 + $0x400] ss:$16 sps:$4 sm:$0xff]  }
  0x5f   : > { %3486 = vmatprep.subr.bf16.mxu1 %v7379_v15  ;;  %v7419_v15 = vld [vmem:[%s11396_s1 + $0x600] ss:$16 sps:$4 sm:$0xff]  }
  0x60   : > { %2940 = vmatmul.mubr.bf16.vlgmr.msra.gmra.mxu0 %v8337_v16  ;;  %v645_v12 = vld [vmem:[%s8117_s26 + $0x200] sm:$0xff] }
  0x61   : > { %3133 = vmatmul.mubr.bf16.vlgmr.msra.gmra.mxu1 %v8339_v17  ;;  %2949 = vmatprep.mubr.bf16.mxu0 %v8341_v18  ;;  %v649_v13 = vld [vmem:[%s8117_s26 + $0x220] sm:$0xff] }
  0x62   : > { %3142 = vmatprep.mubr.bf16.mxu1 %v8343_v19  ;;  %3294 = vmatpush1.bf16.msra.mxu0 %v7374_v20  ;;  %v7424_v20 = vld [vmem:[%s11396_s1 + $0x5e4] ss:$16 sps:$4 sm:$0xff]  }
  0x63   : > { %3487 = vmatpush1.bf16.msra.mxu1 %v7377_v21  ;;  %3295 = vmatprep.subr.bf16.mxu0 %v7382_v22  ;;  %v7427_v21 = vld [vmem:[%s11396_s1 + $0x7e4] ss:$16 sps:$4 sm:$0xff]   ;;  %v8497_v22 = vcombine.low %v613_v57, %v617_v58  ;;  %v638_v57 = vld [vmem:[%s8117_s26 + $0x1c8] sm:$0xff] }
  0x64   : > { %3488 = vmatprep.subr.bf16.mxu1 %v7385_v23  ;;  %v8499_v23 = vcombine.low %v614_v60, %v618_v61  ;;  %v642_v58 = vld [vmem:[%s8117_s26 + $0x1e8] sm:$0xff]  ;;  %v7440_v60 = vld [vmem:[%s11396_s1 + $0x580] ss:$16 sps:$4 sm:$0xff]  }
  0x65   : > { %v7443_v61 = vld [vmem:[%s11396_s1 + $0x780] ss:$16 sps:$4 sm:$0xff]  }
  0x66   : > { %3296 = vmatpush1.bf16.msra.mxu0 %v7380_v28  ;;  %v7430_v28 = vld [vmem:[%s11396_s1 + $0x5c4] ss:$16 sps:$4 sm:$0xff]  }
  0x67   : > { %3489 = vmatpush1.bf16.msra.mxu1 %v7383_v29  ;;  %3297 = vmatprep.subr.bf16.mxu0 %v7388_v30  ;;  %v7433_v29 = vld [vmem:[%s11396_s1 + $0x7c4] ss:$16 sps:$4 sm:$0xff]  }
  0x68   : > { %3490 = vmatprep.subr.bf16.mxu1 %v7391_v31  ;;  %2950 = vmatmul.mubr.bf16.gmra.mxu0 %v8377_v32  ;;  %v629_v30 = vld [vmem:[%s8117_s26 + $0x180] sm:$0xff] }
  0x69   : > { %3143 = vmatmul.mubr.bf16.gmra.mxu1 %v8379_v33  ;;  %2959 = vmatprep.mubr.bf16.mxu0 %v8381_v34  ;;  %v633_v31 = vld [vmem:[%s8117_s26 + $0x1a0] sm:$0xff] }
  0x6a   : > { %3152 = vmatprep.mubr.bf16.mxu1 %v8383_v35  ;;  %3298 = vmatpush1.bf16.msra.mxu0 %v7386_v36  ;;  %v630_v36 = vld [vmem:[%s8117_s26 + $0x188] sm:$0xff] }
  0x6b   : > { %3491 = vmatpush1.bf16.msra.mxu1 %v7389_v37  ;;  %3299 = vmatprep.subr.bf16.mxu0 %v7394_v38  ;;  %v634_v37 = vld [vmem:[%s8117_s26 + $0x1a8] sm:$0xff]  ;;  %v7428_v38 = vld [vmem:[%s11396_s1 + $0x5c0] ss:$16 sps:$4 sm:$0xff]  }
  0x6c   : > { %3492 = vmatprep.subr.bf16.mxu1 %v7397_v39  ;;  %v7431_v39 = vld [vmem:[%s11396_s1 + $0x7c0] ss:$16 sps:$4 sm:$0xff]  }
  0x6e   : > { %3300 = vmatpush1.bf16.msra.mxu0 %v7392_v44  ;;  %v8541_v44 = vcombine.high %v629_v30, %v633_v31 }
  0x6f   : > { %3493 = vmatpush1.bf16.msra.mxu1 %v7395_v45  ;;  %3301 = vmatprep.subr.bf16.mxu0 %v7400_v46  ;;  %v8543_v45 = vcombine.high %v630_v36, %v634_v37  ;;  %v7434_v46 = vld [vmem:[%s11396_s1 + $0x5a0] ss:$16 sps:$4 sm:$0xff]  }
  0x70   : > { %3494 = vmatprep.subr.bf16.mxu1 %v7403_v47  ;;  %2960 = vmatmul.mubr.bf16.gmra.mxu0 %v8417_v48  ;;  %v7437_v47 = vld [vmem:[%s11396_s1 + $0x7a0] ss:$16 sps:$4 sm:$0xff]  }
  0x71   : > { %3153 = vmatmul.mubr.bf16.gmra.mxu1 %v8419_v49  ;;  %2969 = vmatprep.mubr.bf16.mxu0 %v8421_v50 }
  0x72   : > { %3162 = vmatprep.mubr.bf16.mxu1 %v8423_v51  ;;  %3302 = vmatpush1.bf16.msra.mxu0 %v7398_v52  ;;  %v7442_v52 = vld [vmem:[%s11396_s1 + $0x584] ss:$16 sps:$4 sm:$0xff]  }
  0x73   : > { %3495 = vmatpush1.bf16.msra.mxu1 %v7401_v53  ;;  %3303 = vmatprep.subr.bf16.mxu0 %v7406_v54  ;;  %v7445_v53 = vld [vmem:[%s11396_s1 + $0x784] ss:$16 sps:$4 sm:$0xff]  }
  0x74   : > { %3496 = vmatprep.subr.bf16.mxu1 %v7409_v55  ;;  %v637_v54 = vld [vmem:[%s8117_s26 + $0x1c0] sm:$0xff] }
  0x75   : > { %v641_v55 = vld [vmem:[%s8117_s26 + $0x1e0] sm:$0xff] }
  0x76   : > { %3304 = vmatpush1.bf16.msra.mxu0 %v7404_v62  ;;  %v7448_v62 = vld [vmem:[%s11396_s1 + $0x564] ss:$16 sps:$4 sm:$0xff]  }
  0x77   : > { %3497 = vmatpush1.bf16.msra.mxu1 %v7407_v63  ;;  %3305 = vmatprep.subr.bf16.mxu0 %v7412_v0  ;;  %v7451_v63 = vld [vmem:[%s11396_s1 + $0x764] ss:$16 sps:$4 sm:$0xff]   ;;  %v8577_v0 = vcombine.low %v629_v30, %v633_v31  ;;  %v7458_v30 = vld [vmem:[%s11396_s1 + $0x520] ss:$16 sps:$4 sm:$0xff]  }
  0x78   : > { %3498 = vmatprep.subr.bf16.mxu1 %v7415_v1  ;;  %2970 = vmatmul.mubr.bf16.gmra.mxu0 %v8457_v2  ;;  %v8579_v1 = vcombine.low %v630_v36, %v634_v37  ;;  %v7461_v31 = vld [vmem:[%s11396_s1 + $0x720] ss:$16 sps:$4 sm:$0xff]   ;;  %v8627_v36 = vcombine.high %v645_v12, %v649_v13 }
  0x79   : > { %3163 = vmatmul.mubr.bf16.gmra.mxu1 %v8459_v3  ;;  %2979 = vmatprep.mubr.bf16.mxu0 %v8461_v4 }
  0x7a   : > { %3172 = vmatprep.mubr.bf16.mxu1 %v8463_v5  ;;  %3306 = vmatpush1.bf16.msra.mxu0 %v7410_v6  ;;  %v8581_v6 = vcombine.high %v637_v54, %v641_v55 }
  0x7b   : > { %3499 = vmatpush1.bf16.msra.mxu1 %v7413_v7  ;;  %3307 = vmatprep.subr.bf16.mxu0 %v7418_v8  ;;  %v8583_v7 = vcombine.high %v638_v57, %v642_v58  ;;  %v7446_v8 = vld [vmem:[%s11396_s1 + $0x560] ss:$16 sps:$4 sm:$0xff]  }
  0x7c   : > { %3500 = vmatprep.subr.bf16.mxu1 %v7421_v9  ;;  %v7449_v9 = vld [vmem:[%s11396_s1 + $0x760] ss:$16 sps:$4 sm:$0xff]  }
  0x7e   : > { %3308 = vmatpush1.bf16.msra.mxu0 %v7416_v14  ;;  %v646_v14 = vld [vmem:[%s8117_s26 + $0x208] sm:$0xff] }
  0x7f   : > { %3501 = vmatpush1.bf16.msra.mxu1 %v7419_v15  ;;  %3309 = vmatprep.subr.bf16.mxu0 %v7424_v20  ;;  %v650_v15 = vld [vmem:[%s8117_s26 + $0x228] sm:$0xff]  ;;  %v7452_v20 = vld [vmem:[%s11396_s1 + $0x540] ss:$16 sps:$4 sm:$0xff]  }
  0x80   : > { %3502 = vmatprep.subr.bf16.mxu1 %v7427_v21  ;;  %2980 = vmatmul.mubr.bf16.gmra.mxu0 %v8497_v22  ;;  %v7455_v21 = vld [vmem:[%s11396_s1 + $0x740] ss:$16 sps:$4 sm:$0xff]   ;;  %v8629_v37 = vcombine.high %v646_v14, %v650_v15 }
  0x81   : > { %3173 = vmatmul.mubr.bf16.gmra.mxu1 %v8499_v23  ;;  %2989 = vmatprep.mubr.bf16.mxu0 %v8501_v24 }
  0x82   : > { %3182 = vmatprep.mubr.bf16.mxu1 %v8503_v25  ;;  %3310 = vmatpush2.bf16.msra.mxu0 %v7422_v26  ;;  %v7460_v26 = vld [vmem:[%s11396_s1 + $0x524] ss:$16 sps:$4 sm:$0xff]  }
  0x83   : > { %3503 = vmatpush2.bf16.msra.mxu1 %v7425_v27  ;;  %3311 = vmatprep.subr.bf16.mxu0 %v7430_v28  ;;  %v7463_v27 = vld [vmem:[%s11396_s1 + $0x724] ss:$16 sps:$4 sm:$0xff]   ;;  %v8617_v28 = vcombine.low %v637_v54, %v641_v55  ;;  %v8651_v54 = vcombine.low %v645_v12, %v649_v13  ;;  %v8653_v55 = vcombine.low %v646_v14, %v650_v15 }
  0x84   : > { %3504 = vmatprep.subr.bf16.mxu1 %v7433_v29  ;;  %v8619_v29 = vcombine.low %v638_v57, %v642_v58  ;;  %v669_v14 = vld [vmem:[%s8117_s26 + $0x2c0] sm:$0xff] }
  0x85   : > { %v673_v15 = vld [vmem:[%s8117_s26 + $0x2e0] sm:$0xff] }
  0x86   : > { %3312 = vmatpush2.bf16.msra.mxu0 %v7428_v38  ;;  %v7466_v38 = vld [vmem:[%s11396_s1 + $0x504] ss:$16 sps:$4 sm:$0xff]  }
  0x87   : > { %3505 = vmatpush2.bf16.msra.mxu1 %v7431_v39  ;;  %3313 = vmatprep.subr.bf16.mxu0 %v7436_v40  ;;  %v7469_v39 = vld [vmem:[%s11396_s1 + $0x704] ss:$16 sps:$4 sm:$0xff]  }
  0x88   : > { %3506 = vmatprep.subr.bf16.mxu1 %v7439_v41  ;;  %2990 = vmatmul.mubr.bf16.gmra.mxu0 %v8537_v42  ;;  %v653_v40 = vld [vmem:[%s8117_s26 + $0x240] sm:$0xff] }
  0x89   : > { %3183 = vmatmul.mubr.bf16.gmra.mxu1 %v8539_v43  ;;  %2999 = vmatprep.mubr.bf16.mxu0 %v8541_v44  ;;  %v657_v41 = vld [vmem:[%s8117_s26 + $0x260] sm:$0xff] }
  0x8a   : > { %3192 = vmatprep.mubr.bf16.mxu1 %v8543_v45  ;;  %3314 = vmatpush2.bf16.msra.mxu0 %v7434_v46  ;;  %v654_v46 = vld [vmem:[%s8117_s26 + $0x248] sm:$0xff]  ;;  %v8655_v57 = vcombine.high %v653_v40, %v657_v41 }
  0x8b   : > { %3507 = vmatpush2.bf16.msra.mxu1 %v7437_v47  ;;  %3315 = vmatprep.subr.bf16.mxu0 %v7442_v52  ;;  %v658_v47 = vld [vmem:[%s8117_s26 + $0x268] sm:$0xff]  ;;  %v7464_v52 = vld [vmem:[%s11396_s1 + $0x500] ss:$16 sps:$4 sm:$0xff]  }
  0x8c   : > { %3508 = vmatprep.subr.bf16.mxu1 %v7445_v53  ;;  %v7467_v53 = vld [vmem:[%s11396_s1 + $0x700] ss:$16 sps:$4 sm:$0xff]   ;;  %v8657_v58 = vcombine.high %v654_v46, %v658_v47 }
  0x8e   : > { %3316 = vmatpush2.bf16.msra.mxu0 %v7440_v60  ;;  %11595 = vst [vmem:[#allocation9_spill] sm:$0xff] %v8657_v58  ;;  %v7472_v60 = vld [vmem:[%s11396_s1 + $0xec] ss:$16 sps:$4 sm:$0xff]  }
  0x8f   : > { %3509 = vmatpush2.bf16.msra.mxu1 %v7443_v61  ;;  %3317 = vmatprep.subr.bf16.mxu0 %v7448_v62  ;;  %v7475_v61 = vld [vmem:[%s11396_s1 + $0x2ec] ss:$16 sps:$4 sm:$0xff]   ;;  %v661_v62 = vld [vmem:[%s8117_s26 + $0x280] sm:$0xff] }
  0x90   : > { %3510 = vmatprep.subr.bf16.mxu1 %v7451_v63  ;;  %3000 = vmatmul.mubr.bf16.gmra.mxu0 %v8577_v0  ;;  %v665_v63 = vld [vmem:[%s8117_s26 + $0x2a0] sm:$0xff] }
  0x91   : > { %3193 = vmatmul.mubr.bf16.gmra.mxu1 %v8579_v1  ;;  %3009 = vmatprep.mubr.bf16.mxu0 %v8581_v6  ;;  %v8677_v12 = vcombine.high %v661_v62, %v665_v63 }
  0x92   : > { %3202 = vmatprep.mubr.bf16.mxu1 %v8583_v7  ;;  %3318 = vmatpush2.bf16.msra.mxu0 %v7446_v8  ;;  %v662_v8 = vld [vmem:[%s8117_s26 + $0x288] sm:$0xff] }
  0x93   : > { %3511 = vmatpush2.bf16.msra.mxu1 %v7449_v9  ;;  %3319 = vmatprep.subr.bf16.mxu0 %v7454_v10  ;;  %v666_v9 = vld [vmem:[%s8117_s26 + $0x2a8] sm:$0xff]  ;;  %v8673_v10 = vcombine.low %v653_v40, %v657_v41  ;;  %11598 = vst [vmem:[#allocation12_spill] sm:$0xff] %v8677_v12 }
  0x94   : > { %3512 = vmatprep.subr.bf16.mxu1 %v7457_v11  ;;  %v8675_v11 = vcombine.low %v654_v46, %v658_v47  ;;  %v8679_v13 = vcombine.high %v662_v8, %v666_v9  ;;  %v678_v40 = vld [vmem:[%s8117_s26 + $0x308] sm:$0xff]  ;;  %v8705_v46 = vcombine.low %v669_v14, %v673_v15 }
  0x95   : > { %11596 = vst [vmem:[#allocation10_spill] sm:$0xff] %v8673_v10  ;;  %v682_v41 = vld [vmem:[%s8117_s26 + $0x328] sm:$0xff] }
  0x96   : > { %3320 = vmatpush2.bf16.msra.mxu0 %v7452_v20  ;;  %11597 = vst [vmem:[#allocation11_spill] sm:$0xff] %v8675_v11  ;;  %11599 = vst [vmem:[#allocation13_spill] sm:$0xff] %v8679_v13  ;;  %v670_v20 = vld [vmem:[%s8117_s26 + $0x2c8] sm:$0xff] }
  0x97   : > { %3513 = vmatpush2.bf16.msra.mxu1 %v7455_v21  ;;  %3321 = vmatprep.subr.bf16.mxu0 %v7460_v26  ;;  %v674_v21 = vld [vmem:[%s8117_s26 + $0x2e8] sm:$0xff]  ;;  %v8689_v26 = vcombine.low %v661_v62, %v665_v63  ;;  %11604 = vst [vmem:[#allocation18_spill] sm:$0xff] %v8705_v46 }
  0x98   : > { %3514 = vmatprep.subr.bf16.mxu1 %v7463_v27  ;;  %3010 = vmatmul.mubr.bf16.gmra.mxu0 %v8617_v28  ;;  %v8691_v27 = vcombine.low %v662_v8, %v666_v9  ;;  %v8707_v47 = vcombine.low %v670_v20, %v674_v21  ;;  %v686_v62 = vld [vmem:[%s8117_s26 + $0x348] sm:$0xff]  ;;  %v8723_v9 = vcombine.low %v678_v40, %v682_v41 }
  0x99   : > { %3203 = vmatmul.mubr.bf16.gmra.mxu1 %v8619_v29  ;;  %3019 = vmatprep.mubr.bf16.mxu0 %v8627_v36  ;;  %11600 = vst [vmem:[#allocation14_spill] sm:$0xff] %v8689_v26  ;;  %v690_v63 = vld [vmem:[%s8117_s26 + $0x368] sm:$0xff] }
  0x9a   : > { %3212 = vmatprep.mubr.bf16.mxu1 %v8629_v37  ;;  %3322 = vmatpush2.bf16.msra.mxu0 %v7458_v30  ;;  %11601 = vst [vmem:[#allocation15_spill] sm:$0xff] %v8691_v27  ;;  %v8693_v30 = vcombine.high %v669_v14, %v673_v15  ;;  %11605 = vst [vmem:[#allocation19_spill] sm:$0xff] %v8707_v47  ;;  %v8727_v15 = vcombine.high %v686_v62, %v690_v63 }
  0x9b   : > { %3515 = vmatpush2.bf16.msra.mxu1 %v7461_v31  ;;  %3323 = vmatprep.subr.bf16.mxu0 %v7466_v38  ;;  %v8695_v31 = vcombine.high %v670_v20, %v674_v21  ;;  %v677_v38 = vld [vmem:[%s8117_s26 + $0x300] sm:$0xff]  ;;  %11609 = vst [vmem:[#allocation23_spill] sm:$0xff] %v8723_v9 }
  0x9c   : > { %3516 = vmatprep.subr.bf16.mxu1 %v7469_v39  ;;  %11602 = vst [vmem:[#allocation16_spill] sm:$0xff] %v8693_v30  ;;  %v681_v39 = vld [vmem:[%s8117_s26 + $0x320] sm:$0xff]  ;;  %11611 = vst [vmem:[#allocation25_spill] sm:$0xff] %v8727_v15 }
  0x9d   : > { %11603 = vst [vmem:[#allocation17_spill] sm:$0xff] %v8695_v31  ;;  %v8721_v8 = vcombine.low %v677_v38, %v681_v39  ;;  %v693_v20 = vld [vmem:[%s8117_s26 + $0x380] sm:$0xff] }
  0x9e   : > { %3324 = vmatpush2.bf16.msra.mxu0 %v7464_v52  ;;  %v8709_v52 = vcombine.high %v677_v38, %v681_v39  ;;  %v697_v21 = vld [vmem:[%s8117_s26 + $0x3a0] sm:$0xff]  ;;  %v694_v38 = vld [vmem:[%s8117_s26 + $0x388] sm:$0xff] }
  0x9f   : > { %3517 = vmatpush2.bf16.msra.mxu1 %v7467_v53  ;;  %3679 = vmatprep.subr.bf16.mxu0 %v7472_v60  ;;  %v8711_v53 = vcombine.high %v678_v40, %v682_v41  ;;  %v685_v60 = vld [vmem:[%s8117_s26 + $0x340] sm:$0xff]  ;;  %11608 = vst [vmem:[#allocation22_spill] sm:$0xff] %v8721_v8  ;;  %v698_v39 = vld [vmem:[%s8117_s26 + $0x3a8] sm:$0xff]  ;;  %v8739_v41 = vcombine.low %v686_v62, %v690_v63 }
  0xa0   : > { %3020 = vmatmul.mubr.bf16.gmra.mxu0 %v8651_v54  ;;  %3872 = vmatprep.subr.bf16.mxu1 %v7475_v61  ;;  %11606 = vst [vmem:[#allocation20_spill] sm:$0xff] %v8709_v52  ;;  %v689_v61 = vld [vmem:[%s8117_s26 + $0x360] sm:$0xff]  ;;  %v8753_v62 = vcombine.low %v693_v20, %v697_v21  ;;  %v8755_v63 = vcombine.low %v694_v38, %v698_v39 }
  0xa1   : > { %3213 = vmatmul.mubr.bf16.gmra.mxu1 %v8653_v55  ;;  %3029 = vmatprep.mubr.bf16.mxu0 %v8655_v57  ;;  %11607 = vst [vmem:[#allocation21_spill] sm:$0xff] %v8711_v53  ;;  %v8725_v14 = vcombine.high %v685_v60, %v689_v61  ;;  %v8737_v40 = vcombine.low %v685_v60, %v689_v61  ;;  %11613 = vst [vmem:[#allocation27_spill] sm:$0xff] %v8739_v41  ;;  %v702_v60 = vld [vmem:[%s8117_s26 + $0x3c8] sm:$0xff] }
  0xa2   : > { %3222 = vmatprep.mubr.bf16.mxu1 %v8657_v58  ;;  %v706_v61 = vld [vmem:[%s8117_s26 + $0x3e8] sm:$0xff]  ;;  %11616 = vst [vmem:[#allocation30_spill] sm:$0xff] %v8753_v62  ;;  %11617 = vst [vmem:[#allocation31_spill] sm:$0xff] %v8755_v63 }
  0xa3   : > { %11610 = vst [vmem:[#allocation24_spill] sm:$0xff] %v8725_v14  ;;  %11612 = vst [vmem:[#allocation26_spill] sm:$0xff] %v8737_v40 }
  0xa8   : > { %3030 = vmatmul.mubr.bf16.gmra.mxu0 %v8673_v10 }
  0xa9   : > { %3223 = vmatmul.mubr.bf16.gmra.mxu1 %v8675_v11  ;;  %3039 = vmatprep.mubr.bf16.mxu0 %v8677_v12 }
  0xaa   : > { %3232 = vmatprep.mubr.bf16.mxu1 %v8679_v13 }
  0xb0   : > { %3040 = vmatmul.mubr.bf16.gmra.mxu0 %v8689_v26  ;;  %v7491_v26 = vld [vmem:[%s11396_s1 + $0x288] ss:$16 sps:$4 sm:$0xff]  }
  0xb1   : > { %3233 = vmatmul.mubr.bf16.gmra.mxu1 %v8691_v27  ;;  %3049 = vmatprep.mubr.bf16.mxu0 %v8693_v30  ;;  %v7485_v30 = vld [vmem:[%s11396_s1 + $0x2a8] ss:$16 sps:$4 sm:$0xff]  }
  0xb2   : > { %3242 = vmatprep.mubr.bf16.mxu1 %v8695_v31  ;;  %v7488_v27 = vld [vmem:[%s11396_s1 + $0x88] ss:$16 sps:$4 sm:$0xff]  }
  0xb8   : > { %3050 = vmatmul.mubr.bf16.gmra.mxu0 %v8705_v46  ;;  %v7479_v46 = vld [vmem:[%s11396_s1 + $0x2c8] ss:$16 sps:$4 sm:$0xff]  }
  0xb9   : > { %3243 = vmatmul.mubr.bf16.gmra.mxu1 %v8707_v47  ;;  %3059 = vmatprep.mubr.bf16.mxu0 %v8709_v52  ;;  %v7476_v47 = vld [vmem:[%s11396_s1 + $0xc8] ss:$16 sps:$4 sm:$0xff]  }
  0xba   : > { %3252 = vmatprep.mubr.bf16.mxu1 %v8711_v53  ;;  %v8741_v53 = vcombine.high %v693_v20, %v697_v21  ;;  %v584_v20 = vld [vmem:[%s8117_s26 + $0x18] sm:$0xff] }
  0xbb   : > { %v588_v21 = vld [vmem:[%s8117_s26 + $0x38] sm:$0xff] }
  0xbc   : > { %11614 = vst [vmem:[#allocation28_spill] sm:$0xff] %v8741_v53  ;;  %v8775_v52 = vcombine.high %v584_v20, %v588_v21 }
  0xbe   : > { %11623 = vst [vmem:[#allocation37_spill] sm:$0xff] %v8775_v52 }
  0xc0   : > { %3060 = vmatmul.mubr.bf16.gmra.mxu0 %v8721_v8  ;;  %v8743_v8 = vcombine.high %v694_v38, %v698_v39  ;;  %v8771_v39 = vcombine.low %v702_v60, %v706_v61 }
  0xc1   : > { %3253 = vmatmul.mubr.bf16.gmra.mxu1 %v8723_v9  ;;  %3069 = vmatprep.mubr.bf16.mxu0 %v8725_v14  ;;  %v701_v9 = vld [vmem:[%s8117_s26 + $0x3c0] sm:$0xff] }
  0xc2   : > { %3262 = vmatprep.mubr.bf16.mxu1 %v8727_v15  ;;  %11615 = vst [vmem:[#allocation29_spill] sm:$0xff] %v8743_v8  ;;  %v705_v14 = vld [vmem:[%s8117_s26 + $0x3e0] sm:$0xff]  ;;  %11621 = vst [vmem:[#allocation35_spill] sm:$0xff] %v8771_v39 }
  0xc3   : > { %v8757_v15 = vcombine.high %v701_v9, %v705_v14  ;;  %v8769_v38 = vcombine.low %v701_v9, %v705_v14  ;;  %v592_v9 = vld [vmem:[%s8117_s26 + $0x58] sm:$0xff] }
  0xc4   : > { %v596_v14 = vld [vmem:[%s8117_s26 + $0x78] sm:$0xff] }
  0xc5   : > { %11618 = vst [vmem:[#allocation32_spill] sm:$0xff] %v8757_v15  ;;  %11620 = vst [vmem:[#allocation34_spill] sm:$0xff] %v8769_v38 }
  0xc8   : > { %3070 = vmatmul.mubr.bf16.gmra.mxu0 %v8737_v40  ;;  %v8759_v40 = vcombine.high %v702_v60, %v706_v61  ;;  %v8787_v61 = vcombine.low %v584_v20, %v588_v21  ;;  %v603_v20 = vld [vmem:[%s8117_s26 + $0xb0] sm:$0xff]  ;;  %v600_v21 = vld [vmem:[%s8117_s26 + $0x98] sm:$0xff] }
  0xc9   : > { %3263 = vmatmul.mubr.bf16.gmra.mxu1 %v8739_v41  ;;  %3079 = vmatprep.mubr.bf16.mxu0 %v8741_v53  ;;  %v583_v41 = vld [vmem:[%s8117_s26 + $0x10] sm:$0xff] }
  0xca   : > { %3272 = vmatprep.mubr.bf16.mxu1 %v8743_v8  ;;  %11619 = vst [vmem:[#allocation33_spill] sm:$0xff] %v8759_v40  ;;  %v587_v53 = vld [vmem:[%s8117_s26 + $0x30] sm:$0xff]  ;;  %11625 = vst [vmem:[#allocation39_spill] sm:$0xff] %v8787_v61 }
  0xcb   : > { %v8773_v8 = vcombine.high %v583_v41, %v587_v53  ;;  %v8785_v60 = vcombine.low %v583_v41, %v587_v53  ;;  %v7481_v53 = vld [vmem:[%s11396_s1 + $0x2cc] ss:$16 sps:$4 sm:$0xff]   ;;  %v599_v41 = vld [vmem:[%s8117_s26 + $0x90] sm:$0xff] }
  0xcd   : > { %11622 = vst [vmem:[#allocation36_spill] sm:$0xff] %v8773_v8  ;;  %11624 = vst [vmem:[#allocation38_spill] sm:$0xff] %v8785_v60 }
  0xd0   : > { %3080 = vmatmul.mubr.bf16.gmra.mxu0 %v8753_v62  ;;  %v595_v62 = vld [vmem:[%s8117_s26 + $0x70] sm:$0xff] }
  0xd1   : > { %3273 = vmatmul.mubr.bf16.gmra.mxu1 %v8755_v63  ;;  %3089 = vmatprep.mubr.bf16.mxu0 %v8757_v15  ;;  %v591_v63 = vld [vmem:[%s8117_s26 + $0x50] sm:$0xff]  ;;  %v604_v15 = vld [vmem:[%s8117_s26 + $0xb8] sm:$0xff] }
  0xd2   : > { %3282 = vmatprep.mubr.bf16.mxu1 %v8759_v40  ;;  %v8795_v40 = vcombine.high %v591_v63, %v595_v62  ;;  %v8825_v31 = vcombine.low %v591_v63, %v595_v62  ;;  %v7490_v62 = vld [vmem:[%s11396_s1 + $0x8c] ss:$16 sps:$4 sm:$0xff]  }
  0xd3   : > { %v7493_v63 = vld [vmem:[%s11396_s1 + $0x28c] ss:$16 sps:$4 sm:$0xff]  }
  0xd4   : > { %11626 = vst [vmem:[#allocation40_spill] sm:$0xff] %v8795_v40  ;;  %11628 = vst [vmem:[#allocation42_spill] sm:$0xff] %v8825_v31 }
  0xd8   : > { %3090 = vmatmul.mubr.bf16.gmra.mxu0 %v8769_v38  ;;  %v7473_v38 = vld [vmem:[%s11396_s1 + $0x2e8] ss:$16 sps:$4 sm:$0xff]  }
  0xd9   : > { %3283 = vmatmul.mubr.bf16.gmra.mxu1 %v8771_v39  ;;  %3325 = vmatprep.mubr.bf16.mxu0 %v8773_v8  ;;  %v7470_v39 = vld [vmem:[%s11396_s1 + $0xe8] ss:$16 sps:$4 sm:$0xff]   ;;  %v8797_v8 = vcombine.high %v592_v9, %v596_v14 }
  0xda   : > { %3518 = vmatprep.mubr.bf16.mxu1 %v8775_v52  ;;  %v7478_v52 = vld [vmem:[%s11396_s1 + $0xcc] ss:$16 sps:$4 sm:$0xff]  }
  0xdb   : > { %11627 = vst [vmem:[#allocation41_spill] sm:$0xff] %v8797_v8 }
  0xe0   : > { %3326 = vmatmul.mubr.bf16.vlgmr.msra.gmra.mxu0 %v8785_v60  ;;  %v7487_v60 = vld [vmem:[%s11396_s1 + $0x2ac] ss:$16 sps:$4 sm:$0xff]  }
  0xe1   : > { %3519 = vmatmul.mubr.bf16.vlgmr.msra.gmra.mxu1 %v8787_v61  ;;  %3335 = vmatprep.mubr.bf16.mxu0 %v8795_v40  ;;  %v7484_v61 = vld [vmem:[%s11396_s1 + $0xac] ss:$16 sps:$4 sm:$0xff]   ;;  %v8827_v40 = vcombine.low %v592_v9, %v596_v14  ;;  %v611_v9 = vld [vmem:[%s8117_s26 + $0xf0] sm:$0xff] }
  0xe2   : > { %3528 = vmatprep.mubr.bf16.mxu1 %v8797_v8  ;;  %3680 = vmatpush1.bf16.msra.mxu0 %v7470_v39  ;;  %v7482_v8 = vld [vmem:[%s11396_s1 + $0xa8] ss:$16 sps:$4 sm:$0xff]   ;;  %v8835_v39 = vcombine.high %v599_v41, %v603_v20 }
  0xe3   : > { %3873 = vmatpush1.bf16.msra.mxu1 %v7473_v38  ;;  %3681 = vmatprep.subr.bf16.mxu0 %v7478_v52  ;;  %11629 = vst [vmem:[#allocation43_spill] sm:$0xff] %v8827_v40  ;;  %v8837_v52 = vcombine.high %v600_v21, %v604_v15  ;;  %v607_v38 = vld [vmem:[%s8117_s26 + $0xd0] sm:$0xff]  ;;  %v608_v14 = vld [vmem:[%s8117_s26 + $0xd8] sm:$0xff] }
  0xe4   : > { %3874 = vmatprep.subr.bf16.mxu1 %v7481_v53  ;;  %11630 = vst [vmem:[#allocation44_spill] sm:$0xff] %v8835_v39  ;;  %v612_v53 = vld [vmem:[%s8117_s26 + $0xf8] sm:$0xff] }
  0xe5   : > { %11631 = vst [vmem:[#allocation45_spill] sm:$0xff] %v8837_v52 }
  0xe6   : > { %3682 = vmatpush1.bf16.msra.mxu0 %v7476_v47  ;;  %v7499_v47 = vld [vmem:[%s11396_s1 + $0x26c] ss:$16 sps:$4 sm:$0xff]  }
  0xe7   : > { %3875 = vmatpush1.bf16.msra.mxu1 %v7479_v46  ;;  %3683 = vmatprep.subr.bf16.mxu0 %v7484_v61  ;;  %v7496_v46 = vld [vmem:[%s11396_s1 + $0x6c] ss:$16 sps:$4 sm:$0xff]   ;;  %v8867_v61 = vcombine.low %v600_v21, %v604_v15  ;;  %v619_v21 = vld [vmem:[%s8117_s26 + $0x130] sm:$0xff] }
  0xe8   : > { %3876 = vmatprep.subr.bf16.mxu1 %v7487_v60  ;;  %3336 = vmatmul.mubr.bf16.gmra.mxu0 %v8825_v31  ;;  %v8865_v60 = vcombine.low %v599_v41, %v603_v20  ;;  %v7502_v41 = vld [vmem:[%s11396_s1 + $0x4c] ss:$16 sps:$4 sm:$0xff]   ;;  %v615_v20 = vld [vmem:[%s8117_s26 + $0x110] sm:$0xff] }
  0xe9   : > { %3529 = vmatmul.mubr.bf16.gmra.mxu1 %v8827_v40  ;;  %3345 = vmatprep.mubr.bf16.mxu0 %v8835_v39  ;;  %11633 = vst [vmem:[#allocation47_spill] sm:$0xff] %v8867_v61  ;;  %v7497_v39 = vld [vmem:[%s11396_s1 + $0x268] ss:$16 sps:$4 sm:$0xff]   ;;  %v7505_v15 = vld [vmem:[%s11396_s1 + $0x24c] ss:$16 sps:$4 sm:$0xff]  }
  0xea   : > { %3538 = vmatprep.mubr.bf16.mxu1 %v8837_v52  ;;  %3684 = vmatpush1.bf16.msra.mxu0 %v7482_v8  ;;  %11632 = vst [vmem:[#allocation46_spill] sm:$0xff] %v8865_v60  ;;  %v7494_v52 = vld [vmem:[%s11396_s1 + $0x68] ss:$16 sps:$4 sm:$0xff]   ;;  %v8875_v8 = vcombine.high %v607_v38, %v611_v9  ;;  %v7568_v31 = vld [vmem:[%s11396_s1 + $0x6ec] ss:$16 sps:$4 sm:$0xff]  }
  0xeb   : > { %3877 = vmatpush1.bf16.msra.mxu1 %v7485_v30  ;;  %3685 = vmatprep.subr.bf16.mxu0 %v7490_v62  ;;  %v8877_v30 = vcombine.high %v608_v14, %v612_v53  ;;  %v616_v62 = vld [vmem:[%s8117_s26 + $0x118] sm:$0xff] }
  0xec   : > { %3878 = vmatprep.subr.bf16.mxu1 %v7493_v63  ;;  %11634 = vst [vmem:[#allocation48_spill] sm:$0xff] %v8875_v8  ;;  %v620_v63 = vld [vmem:[%s8117_s26 + $0x138] sm:$0xff] }
  0xed   : > { %11635 = vst [vmem:[#allocation49_spill] sm:$0xff] %v8877_v30  ;;  %v7500_v40 = vld [vmem:[%s11396_s1 + $0x48] ss:$16 sps:$4 sm:$0xff]  }
  0xee   : > { %3686 = vmatpush1.bf16.msra.mxu0 %v7488_v27  ;;  %v7508_v27 = vld [vmem:[%s11396_s1 + $0x2c] ss:$16 sps:$4 sm:$0xff]  }
  0xef   : > { %3879 = vmatpush1.bf16.msra.mxu1 %v7491_v26  ;;  %3687 = vmatprep.subr.bf16.mxu0 %v7496_v46  ;;  %v7503_v26 = vld [vmem:[%s11396_s1 + $0x248] ss:$16 sps:$4 sm:$0xff]   ;;  %v7511_v46 = vld [vmem:[%s11396_s1 + $0x22c] ss:$16 sps:$4 sm:$0xff]  }
  0xf0   : > { %3880 = vmatprep.subr.bf16.mxu1 %v7499_v47  ;;  %3346 = vmatmul.mubr.bf16.gmra.mxu0 %v8865_v60  ;;  %v8905_v47 = vcombine.low %v607_v38, %v611_v9  ;;  %v7509_v38 = vld [vmem:[%s11396_s1 + $0x228] ss:$16 sps:$4 sm:$0xff]   ;;  %v7514_v9 = vld [vmem:[%s11396_s1 + $0xc] ss:$16 sps:$4 sm:$0xff]  }
  0xf1   : > { %3539 = vmatmul.mubr.bf16.gmra.mxu1 %v8867_v61  ;;  %3355 = vmatprep.mubr.bf16.mxu0 %v8875_v8  ;;  %v11656_v8 = vlaneseq }
  0xf2   : > { %3548 = vmatprep.mubr.bf16.mxu1 %v8877_v30  ;;  %3688 = vmatpush1.bf16.msra.mxu0 %v7494_v52  ;;  %11636 = vst [vmem:[#allocation50_spill] sm:$0xff] %v8905_v47  ;;  %v8907_v30 = vcombine.low %v608_v14, %v612_v53  ;;  %v8911_v52 = vcombine.high %v616_v62, %v620_v63  ;;  %v7517_v14 = vld [vmem:[%s11396_s1 + $0x20c] ss:$16 sps:$4 sm:$0xff]   ;;  %v627_v53 = vld [vmem:[%s8117_s26 + $0x170] sm:$0xff] }
  0xf3   : > { %3881 = vmatpush1.bf16.msra.mxu1 %v7497_v39  ;;  %3689 = vmatprep.subr.bf16.mxu0 %v7502_v41  ;;  %v8909_v39 = vcombine.high %v615_v20, %v619_v21  ;;  %v7506_v41 = vld [vmem:[%s11396_s1 + $0x28] ss:$16 sps:$4 sm:$0xff]  }
  0xf4   : > { %3882 = vmatprep.subr.bf16.mxu1 %v7505_v15  ;;  %11637 = vst [vmem:[#allocation51_spill] sm:$0xff] %v8907_v30  ;;  %11639 = vst [vmem:[#allocation53_spill] sm:$0xff] %v8911_v52  ;;  %v624_v15 = vld [vmem:[%s8117_s26 + $0x158] sm:$0xff] }
  0xf5   : > { %11638 = vst [vmem:[#allocation52_spill] sm:$0xff] %v8909_v39 }
  0xf6   : > { %3690 = vmatpush1.bf16.msra.mxu0 %v7500_v40  ;;  %v623_v40 = vld [vmem:[%s8117_s26 + $0x150] sm:$0xff] }
  0xf7   : > { %3883 = vmatpush1.bf16.msra.mxu1 %v7503_v26  ;;  %3691 = vmatprep.subr.bf16.mxu0 %v7508_v27  ;;  %v628_v26 = vld [vmem:[%s8117_s26 + $0x178] sm:$0xff] }
  0xf8   : > { %3884 = vmatprep.subr.bf16.mxu1 %v7511_v46  ;;  %3356 = vmatmul.mubr.bf16.gmra.mxu0 %v8905_v47  ;;  %v7512_v27 = vld [vmem:[%s11396_s1 + $0x8] ss:$16 sps:$4 sm:$0xff]   ;;  %v8951_v47 = vcombine.high %v624_v15, %v628_v26 }
  0xf9   : > { %3549 = vmatmul.mubr.bf16.gmra.mxu1 %v8907_v30  ;;  %3365 = vmatprep.mubr.bf16.mxu0 %v8909_v39  ;;  %v7515_v46 = vld [vmem:[%s11396_s1 + $0x208] ss:$16 sps:$4 sm:$0xff]   ;;  %v7523_v39 = vld [vmem:[%s11396_s1 + $0x3ec] ss:$16 sps:$4 sm:$0xff]   ;;  %v8949_v30 = vcombine.high %v623_v40, %v627_v53 }
  0xfa   : > { %3558 = vmatprep.mubr.bf16.mxu1 %v8911_v52  ;;  %3692 = vmatpush1.bf16.msra.mxu0 %v7506_v41  ;;  %v7520_v52 = vld [vmem:[%s11396_s1 + $0x1ec] ss:$16 sps:$4 sm:$0xff]   ;;  %v8945_v41 = vcombine.low %v615_v20, %v619_v21  ;;  %11643 = vst [vmem:[#allocation57_spill] sm:$0xff] %v8951_v47  ;;  %v7521_v20 = vld [vmem:[%s11396_s1 + $0x3e8] ss:$16 sps:$4 sm:$0xff]  }
  0xfb   : > { %3885 = vmatpush1.bf16.msra.mxu1 %v7509_v38  ;;  %3693 = vmatprep.subr.bf16.mxu0 %v7514_v9  ;;  %v8947_v38 = vcombine.low %v616_v62, %v620_v63  ;;  %11642 = vst [vmem:[#allocation56_spill] sm:$0xff] %v8949_v30  ;;  %v7518_v9 = vld [vmem:[%s11396_s1 + $0x1e8] ss:$16 sps:$4 sm:$0xff]   ;;  %v7526_v21 = vld [vmem:[%s11396_s1 + $0x1cc] ss:$16 sps:$4 sm:$0xff]   ;;  %v631_v63 = vld [vmem:[%s8117_s26 + $0x190] sm:$0xff] }
  0xfc   : > { %3886 = vmatprep.subr.bf16.mxu1 %v7517_v14  ;;  %11640 = vst [vmem:[#allocation54_spill] sm:$0xff] %v8945_v41  ;;  %v7529_v62 = vld [vmem:[%s11396_s1 + $0x3cc] ss:$16 sps:$4 sm:$0xff]   ;;  %v635_v14 = vld [vmem:[%s8117_s26 + $0x1b0] sm:$0xff] }
  0xfd   : > { %11641 = vst [vmem:[#allocation55_spill] sm:$0xff] %v8947_v38 }
  0xfe   : > { %3694 = vmatpush1.bf16.msra.mxu0 %v7512_v27  ;;  %v7524_v27 = vld [vmem:[%s11396_s1 + $0x1c8] ss:$16 sps:$4 sm:$0xff]  }
  0xff   : > { %3887 = vmatpush1.bf16.msra.mxu1 %v7515_v46  ;;  %3695 = vmatprep.subr.bf16.mxu0 %v7520_v52  ;;  %v632_v52 = vld [vmem:[%s8117_s26 + $0x198] sm:$0xff] }
 0x100   : > { %3888 = vmatprep.subr.bf16.mxu1 %v7523_v39  ;;  %3366 = vmatmul.mubr.bf16.gmra.mxu0 %v8945_v41  ;;  %v636_v39 = vld [vmem:[%s8117_s26 + $0x1b8] sm:$0xff] }
 0x101   : > { %3559 = vmatmul.mubr.bf16.gmra.mxu1 %v8947_v38  ;;  %3375 = vmatprep.mubr.bf16.mxu0 %v8949_v30  ;;  %v7527_v46 = vld [vmem:[%s11396_s1 + $0x3c8] ss:$16 sps:$4 sm:$0xff]   ;;  %v7535_v30 = vld [vmem:[%s11396_s1 + $0x3ac] ss:$16 sps:$4 sm:$0xff]   ;;  %v8989_v38 = vcombine.high %v631_v63, %v635_v14  ;;  %v8991_v41 = vcombine.high %v632_v52, %v636_v39 }
 0x102   : > { %3568 = vmatprep.mubr.bf16.mxu1 %v8951_v47  ;;  %3696 = vmatpush2.bf16.msra.mxu0 %v7518_v9  ;;  %v7532_v47 = vld [vmem:[%s11396_s1 + $0x1ac] ss:$16 sps:$4 sm:$0xff]   ;;  %v8985_v9 = vcombine.low %v623_v40, %v627_v53  ;;  %v7533_v40 = vld [vmem:[%s11396_s1 + $0x3a8] ss:$16 sps:$4 sm:$0xff]  }
 0x103   : > { %3889 = vmatpush2.bf16.msra.mxu1 %v7521_v20  ;;  %3697 = vmatprep.subr.bf16.mxu0 %v7526_v21  ;;  %v8987_v20 = vcombine.low %v624_v15, %v628_v26  ;;  %11646 = vst [vmem:[#allocation60_spill] sm:$0xff] %v8989_v38  ;;  %11647 = vst [vmem:[#allocation61_spill] sm:$0xff] %v8991_v41  ;;  %v7530_v21 = vld [vmem:[%s11396_s1 + $0x1a8] ss:$16 sps:$4 sm:$0xff]   ;;  %v7538_v53 = vld [vmem:[%s11396_s1 + $0x18c] ss:$16 sps:$4 sm:$0xff]  }
 0x104   : > { %3890 = vmatprep.subr.bf16.mxu1 %v7529_v62  ;;  %11644 = vst [vmem:[#allocation58_spill] sm:$0xff] %v8985_v9  ;;  %v7541_v15 = vld [vmem:[%s11396_s1 + $0x38c] ss:$16 sps:$4 sm:$0xff]   ;;  %v639_v26 = vld [vmem:[%s8117_s26 + $0x1d0] sm:$0xff] }
 0x105   : > { %11645 = vst [vmem:[#allocation59_spill] sm:$0xff] %v8987_v20  ;;  %v643_v62 = vld [vmem:[%s8117_s26 + $0x1f0] sm:$0xff] }
 0x106   : > { %3698 = vmatpush2.bf16.msra.mxu0 %v7524_v27  ;;  %v7536_v27 = vld [vmem:[%s11396_s1 + $0x188] ss:$16 sps:$4 sm:$0xff]  }
 0x107   : > { %3891 = vmatpush2.bf16.msra.mxu1 %v7527_v46  ;;  %3699 = vmatprep.subr.bf16.mxu0 %v7532_v47  ;;  %v640_v47 = vld [vmem:[%s8117_s26 + $0x1d8] sm:$0xff] }
 0x108   : > { %3892 = vmatprep.subr.bf16.mxu1 %v7535_v30  ;;  %3376 = vmatmul.mubr.bf16.gmra.mxu0 %v8985_v9  ;;  %v644_v30 = vld [vmem:[%s8117_s26 + $0x1f8] sm:$0xff] }
 0x109   : > { %3569 = vmatmul.mubr.bf16.gmra.mxu1 %v8987_v20  ;;  %3385 = vmatprep.mubr.bf16.mxu0 %v8989_v38  ;;  %v7539_v46 = vld [vmem:[%s11396_s1 + $0x388] ss:$16 sps:$4 sm:$0xff]   ;;  %v7547_v38 = vld [vmem:[%s11396_s1 + $0x36c] ss:$16 sps:$4 sm:$0xff]   ;;  %v9029_v20 = vcombine.high %v639_v26, %v643_v62  ;;  %v9031_v9 = vcombine.high %v640_v47, %v644_v30 }
 0x10a   : > { %3578 = vmatprep.mubr.bf16.mxu1 %v8991_v41  ;;  %3700 = vmatpush2.bf16.msra.mxu0 %v7530_v21  ;;  %v7544_v41 = vld [vmem:[%s11396_s1 + $0x16c] ss:$16 sps:$4 sm:$0xff]   ;;  %v9025_v21 = vcombine.low %v631_v63, %v635_v14  ;;  %v7545_v63 = vld [vmem:[%s11396_s1 + $0x368] ss:$16 sps:$4 sm:$0xff]  }
 0x10b   : > { %3893 = vmatpush2.bf16.msra.mxu1 %v7533_v40  ;;  %3701 = vmatprep.subr.bf16.mxu0 %v7538_v53  ;;  %v9027_v40 = vcombine.low %v632_v52, %v636_v39  ;;  %11650 = vst [vmem:[#allocation64_spill] sm:$0xff] %v9029_v20  ;;  %11651 = vst [vmem:[#allocation65_spill] sm:$0xff] %v9031_v9  ;;  %v7542_v53 = vld [vmem:[%s11396_s1 + $0x168] ss:$16 sps:$4 sm:$0xff]   ;;  %v7550_v14 = vld [vmem:[%s11396_s1 + $0x14c] ss:$16 sps:$4 sm:$0xff]  }
 0x10c   : > { %3894 = vmatprep.subr.bf16.mxu1 %v7541_v15  ;;  %11648 = vst [vmem:[#allocation62_spill] sm:$0xff] %v9025_v21  ;;  %v7553_v52 = vld [vmem:[%s11396_s1 + $0x34c] ss:$16 sps:$4 sm:$0xff]   ;;  %v647_v39 = vld [vmem:[%s8117_s26 + $0x210] sm:$0xff] }
 0x10d   : > { %11649 = vst [vmem:[#allocation63_spill] sm:$0xff] %v9027_v40  ;;  %v651_v15 = vld [vmem:[%s8117_s26 + $0x230] sm:$0xff] }
 0x10e   : > { %3702 = vmatpush2.bf16.msra.mxu0 %v7536_v27  ;;  %v652_v27 = vld [vmem:[%s8117_s26 + $0x238] sm:$0xff] }
 0x10f   : > { %3895 = vmatpush2.bf16.msra.mxu1 %v7539_v46  ;;  %3703 = vmatprep.subr.bf16.mxu0 %v7544_v41  ;;  %v648_v41 = vld [vmem:[%s8117_s26 + $0x218] sm:$0xff] }
 0x110   : > { %3896 = vmatprep.subr.bf16.mxu1 %v7547_v38  ;;  %3386 = vmatmul.mubr.bf16.gmra.mxu0 %v9025_v21  ;;  %v7548_v46 = vld [vmem:[%s11396_s1 + $0x148] ss:$16 sps:$4 sm:$0xff]   ;;  %v7559_v38 = vld [vmem:[%s11396_s1 + $0x32c] ss:$16 sps:$4 sm:$0xff]   ;;  %v9111_v61 = vcombine.low %v648_v41, %v652_v27 }
 0x111   : > { %3579 = vmatmul.mubr.bf16.gmra.mxu1 %v9027_v40  ;;  %3395 = vmatprep.mubr.bf16.mxu0 %v9029_v20  ;;  %v7551_v21 = vld [vmem:[%s11396_s1 + $0x348] ss:$16 sps:$4 sm:$0xff]   ;;  %v9069_v20 = vcombine.high %v647_v39, %v651_v15  ;;  %v9071_v40 = vcombine.high %v648_v41, %v652_v27 }
 0x112   : > { %3588 = vmatprep.mubr.bf16.mxu1 %v9031_v9  ;;  %3704 = vmatpush2.bf16.msra.mxu0 %v7542_v53  ;;  %v7556_v9 = vld [vmem:[%s11396_s1 + $0x12c] ss:$16 sps:$4 sm:$0xff]   ;;  %v9065_v53 = vcombine.low %v639_v26, %v643_v62  ;;  %v7554_v26 = vld [vmem:[%s11396_s1 + $0x128] ss:$16 sps:$4 sm:$0xff]   ;;  %11660 = vst [vmem:[#allocation73_spill] sm:$0xff] %v9111_v61 }
 0x113   : > { %3897 = vmatpush2.bf16.msra.mxu1 %v7545_v63  ;;  %3705 = vmatprep.subr.bf16.mxu0 %v7550_v14  ;;  %v9067_v63 = vcombine.low %v640_v47, %v644_v30  ;;  %11654 = vst [vmem:[#allocation68_spill] sm:$0xff] %v9069_v20  ;;  %11655 = vst [vmem:[#allocation69_spill] sm:$0xff] %v9071_v40  ;;  %v9074_v14 = vshrl.u32 %v11656_v8, 7  ;;  %v7557_v62 = vld [vmem:[%s11396_s1 + $0x328] ss:$16 sps:$4 sm:$0xff]  }
 0x114   : > { %3898 = vmatprep.subr.bf16.mxu1 %v7553_v52  ;;  %11652 = vst [vmem:[#allocation66_spill] sm:$0xff] %v9065_v53  ;;  %v7562_v47 = vld [vmem:[%s11396_s1 + $0x10c] ss:$16 sps:$4 sm:$0xff]   ;;  %v655_v52 = vld [vmem:[%s8117_s26 + $0x250] sm:$0xff] }
 0x115   : > { %11653 = vst [vmem:[#allocation67_spill] sm:$0xff] %v9067_v63  ;;  %11657 = vst [vmem:[#allocation70_spill] sm:$0xff] %v9074_v14  ;;  %v7565_v30 = vld [vmem:[%s11396_s1 + $0x30c] ss:$16 sps:$4 sm:$0xff]  }
 0x116   : > { %3706 = vmatpush2.bf16.msra.mxu0 %v7548_v46  ;;  %v656_v46 = vld [vmem:[%s8117_s26 + $0x258] sm:$0xff] }
 0x117   : > { %3899 = vmatpush2.bf16.msra.mxu1 %v7551_v21  ;;  %3707 = vmatprep.subr.bf16.mxu0 %v7556_v9  ;;  %v965_v21 = vld [vmem:[%s11397_s2] sm:$0xf]  ;;  %v9096_v9 = vsub.s32 0, %v9074_v14  ;;  %v660_v8 = vld [vmem:[%s8117_s26 + $0x278] sm:$0xff] }
 0x118   : > { %3900 = vmatprep.subr.bf16.mxu1 %v7559_v38  ;;  %3396 = vmatmul.mubr.bf16.gmra.mxu0 %v9065_v53  ;;  %v659_v38 = vld [vmem:[%s8117_s26 + $0x270] sm:$0xff]  ;;  %v7563_v53 = vld [vmem:[%s11396_s1 + $0x308] ss:$16 sps:$4 sm:$0xff]  }
 0x119   : > { %3589 = vmatmul.mubr.bf16.gmra.mxu1 %v9067_v63  ;;  %3405 = vmatprep.mubr.bf16.mxu0 %v9069_v20  ;;  %11658 = vst [vmem:[#allocation71_spill] sm:$0xff] %v9096_v9  ;;  %v7560_v63 = vld [vmem:[%s11396_s1 + $0x108] ss:$16 sps:$4 sm:$0xff]   ;;  %v11468_v20 = vsub.s32 1, %v9074_v14  ;;  %v9114_v60 = vrot.slane %v965_v21, %v9096_v9  ;;  %v667_v9 = vld [vmem:[%s8117_s26 + $0x2b0] sm:$0xff] }
 0x11a   : > { %3598 = vmatprep.mubr.bf16.mxu1 %v9071_v40  ;;  %3708 = vmatpush2.bf16.msra.mxu0 %v7554_v26  ;;  %v9109_v40 = vcombine.low %v647_v39, %v651_v15  ;;  %v9116_v26 = vcombine.high %v655_v52, %v659_v38  ;;  %v7571_v39 = vld [vmem:[%s11396_s1 + $0x4ec] ss:$16 sps:$4 sm:$0xff]  }
 0x11b   : > { %3901 = vmatpush2.bf16.msra.mxu1 %v7557_v62  ;;  %3709 = vmatprep.subr.bf16.mxu0 %v7562_v47  ;;  %v9118_v62 = vcombine.high %v656_v46, %v660_v8  ;;  %v9128_v15 = vrot.slane %v965_v21, %v11468_v20  ;;  %v664_v14 = vld [vmem:[%s8117_s26 + $0x298] sm:$0xff] }
 0x11c   : > { %3902 = vmatprep.subr.bf16.mxu1 %v7565_v30  ;;  %11659 = vst [vmem:[#allocation72_spill] sm:$0xff] %v9109_v40  ;;  %11661 = vst [vmem:[#allocation74_spill] sm:$0xff] %v9116_v26  ;;  %v668_v21 = vld [vmem:[%s8117_s26 + $0x2b8] sm:$0xff] }
 0x11d   : > { %11662 = vst [vmem:[#allocation75_spill] sm:$0xff] %v9118_v62  ;;  %v9151_v11 = vcombine.high %v664_v14, %v668_v21 }
 0x11e   : > { %3710 = vmatpush2.bf16.msra.mxu0 %v7560_v63 }
 0x11f   : > { %3903 = vmatpush2.bf16.msra.mxu1 %v7563_v53  ;;  %v663_v53 = vld [vmem:[%s8117_s26 + $0x290] sm:$0xff]  ;;  %4065 = vmatprep.subr.bf16.mxu0 %v7571_v39  ;;  %11667 = vst [vmem:[#allocation80_spill] sm:$0xff] %v9151_v11 }
 0x120   : > { %4258 = vmatprep.subr.bf16.mxu1 %v7568_v31  ;;  %v2941_v41 = vpop.f32.mrf.mxu0  ;;  %3406 = vmatmul.mubr.bf16.gmra.mxu0 %v9109_v40  ;;  %v9149_v12 = vcombine.high %v663_v53, %v667_v9 }
 0x121   : > { %v3134_v27 = vpop.f32.mrf.mxu1  ;;  %3599 = vmatmul.mubr.bf16.gmra.mxu1 %v9111_v61  ;;  %v2942_v63 = vadd.f32 %v2941_v41, %v9114_v60  ;;  %3415 = vmatprep.mubr.bf16.mxu0 %v9116_v26  ;;  %v9142_v61 = vcombine.low %v655_v52, %v659_v38  ;;  %v9144_v41 = vcombine.low %v656_v46, %v660_v8  ;;  %v671_v46 = vld [vmem:[%s8117_s26 + $0x2d0] sm:$0xff] }
 0x122   : > { %3608 = vmatprep.mubr.bf16.mxu1 %v9118_v62  ;;  %v2943_v47 = vpop.f32.mrf.mxu0  ;;  %11666 = vst [vmem:[#allocation79_spill] sm:$0xff] %v9149_v12 }
 0x123   : > { %v3136_v30 = vpop.f32.mrf.mxu1  ;;  %v9139_v31 = vadd.f32 %v3134_v27, %v2942_v63  ;;  %v2944_v20 = vadd.f32 %v2943_v47, %v9128_v15  ;;  %11663 = vst [vmem:[#allocation76_spill] sm:$0xff] %v9142_v61  ;;  %11664 = vst [vmem:[#allocation77_spill] sm:$0xff] %v9144_v41 }
 0x124   : > { %v2945_v40 = vpop.f32.mrf.mxu0 }
 0x125   : > { %v3138_v13 = vpop.f32.mrf.mxu1  ;;  %v9146_v26 = vadd.f32 %v3136_v30, %v2944_v20  ;;  %v2946_v62 = vadd.f32 %v2945_v40, %v9114_v60  ;;  %v672_v30 = vld [vmem:[%s8117_s26 + $0x2d8] sm:$0xff] }
 0x126   : > { %v2947_v39 = vpop.f32.mrf.mxu0 }
 0x127   : > { %11665 = vst [vmem:[#allocation78_spill] sm:$0xff] %v9146_v26  ;;  %v3140_v27 = vpop.f32.mrf.mxu1  ;;  %v9153_v63 = vadd.f32 %v3138_v13, %v2946_v62  ;;  %v2948_v52 = vadd.f32 %v2947_v39, %v9128_v15  ;;  %v675_v62 = vld [vmem:[%s8117_s26 + $0x2f0] sm:$0xff]  ;;  %v676_v39 = vld [vmem:[%s8117_s26 + $0x2f8] sm:$0xff] }
 0x128   : > { %v2951_v8 = vpop.f32.mrf.mxu0  ;;  %3416 = vmatmul.mubr.bf16.gmra.mxu0 %v9142_v61 }
 0x129   : > { %11668 = vst [vmem:[#allocation81_spill] sm:$0xff] %v9153_v63  ;;  %v3144_v38 = vpop.f32.mrf.mxu1  ;;  %3609 = vmatmul.mubr.bf16.gmra.mxu1 %v9144_v41  ;;  %v9158_v20 = vadd.f32 %v3140_v27, %v2948_v52  ;;  %v2952_v40 = vadd.f32 %v2951_v8, %v9114_v60  ;;  %3425 = vmatprep.mubr.bf16.mxu0 %v9149_v12 }
 0x12a   : > { %3618 = vmatprep.mubr.bf16.mxu1 %v9151_v11  ;;  %v2953_v47 = vpop.f32.mrf.mxu0  ;;  %v9170_v27 = vcombine.low %v663_v53, %v667_v9  ;;  %v9172_v52 = vcombine.low %v664_v14, %v668_v21  ;;  %v9177_v12 = vcombine.high %v671_v46, %v675_v62 }
 0x12b   : > { %11669 = vst [vmem:[#allocation82_spill] sm:$0xff] %v9158_v20  ;;  %v3146_v13 = vpop.f32.mrf.mxu1  ;;  %v9167_v10 = vadd.f32 %v3144_v38, %v2952_v40  ;;  %v2954_v61 = vadd.f32 %v2953_v47, %v9128_v15  ;;  %v9179_v20 = vcombine.high %v672_v30, %v676_v39 }
 0x12c   : > { %v2955_v63 = vpop.f32.mrf.mxu0  ;;  %11671 = vst [vmem:[#allocation84_spill] sm:$0xff] %v9170_v27  ;;  %11672 = vst [vmem:[#allocation85_spill] sm:$0xff] %v9172_v52 }
 0x12d   : > { %11670 = vst [vmem:[#allocation83_spill] sm:$0xff] %v9167_v10  ;;  %v3148_v41 = vpop.f32.mrf.mxu1  ;;  %v9174_v8 = vadd.f32 %v3146_v13, %v2954_v61  ;;  %v2956_v11 = vadd.f32 %v2955_v63, %v9114_v60  ;;  %11674 = vst [vmem:[#allocation87_spill] sm:$0xff] %v9177_v12  ;;  %v679_v63 = vld [vmem:[%s8117_s26 + $0x310] sm:$0xff] }
 0x12e   : > { %11675 = vst [vmem:[#allocation88_spill] sm:$0xff] %v9179_v20  ;;  %v2957_v38 = vpop.f32.mrf.mxu0 }
 0x12f   : > { %11673 = vst [vmem:[#allocation86_spill] sm:$0xff] %v9174_v8  ;;  %v3150_v40 = vpop.f32.mrf.mxu1  ;;  %v9181_v47 = vadd.f32 %v3148_v41, %v2956_v11  ;;  %v2958_v9 = vadd.f32 %v2957_v38, %v9128_v15  ;;  %v683_v41 = vld [vmem:[%s8117_s26 + $0x330] sm:$0xff]  ;;  %v684_v38 = vld [vmem:[%s8117_s26 + $0x338] sm:$0xff] }
 0x130   : > { %v2961_v14 = vpop.f32.mrf.mxu0  ;;  %3426 = vmatmul.mubr.bf16.gmra.mxu0 %v9170_v27 }
 0x131   : > { %11676 = vst [vmem:[#allocation89_spill] sm:$0xff] %v9181_v47  ;;  %v3154_v53 = vpop.f32.mrf.mxu1  ;;  %3619 = vmatmul.mubr.bf16.gmra.mxu1 %v9172_v52  ;;  %v9186_v61 = vadd.f32 %v3150_v40, %v2958_v9  ;;  %v2962_v21 = vadd.f32 %v2961_v14, %v9114_v60  ;;  %3435 = vmatprep.mubr.bf16.mxu0 %v9177_v12  ;;  %v680_v47 = vld [vmem:[%s8117_s26 + $0x318] sm:$0xff] }
 0x132   : > { %3628 = vmatprep.mubr.bf16.mxu1 %v9179_v20  ;;  %v2963_v13 = vpop.f32.mrf.mxu0  ;;  %v9198_v40 = vcombine.low %v671_v46, %v675_v62  ;;  %v9200_v9 = vcombine.low %v672_v30, %v676_v39  ;;  %v9205_v12 = vcombine.high %v679_v63, %v683_v41 }
 0x133   : > { %11677 = vst [vmem:[#allocation90_spill] sm:$0xff] %v9186_v61  ;;  %v3156_v11 = vpop.f32.mrf.mxu1  ;;  %v9195_v8 = vadd.f32 %v3154_v53, %v2962_v21  ;;  %v2964_v27 = vadd.f32 %v2963_v13, %v9128_v15  ;;  %v9207_v61 = vcombine.high %v680_v47, %v684_v38 }
 0x134   : > { %v2965_v10 = vpop.f32.mrf.mxu0  ;;  %11679 = vst [vmem:[#allocation92_spill] sm:$0xff] %v9198_v40  ;;  %11680 = vst [vmem:[#allocation93_spill] sm:$0xff] %v9200_v9 }
 0x135   : > { %11678 = vst [vmem:[#allocation91_spill] sm:$0xff] %v9195_v8  ;;  %v3158_v52 = vpop.f32.mrf.mxu1  ;;  %v9202_v14 = vadd.f32 %v3156_v11, %v2964_v27  ;;  %v2966_v20 = vadd.f32 %v2965_v10, %v9114_v60  ;;  %11682 = vst [vmem:[#allocation95_spill] sm:$0xff] %v9205_v12  ;;  %v687_v27 = vld [vmem:[%s8117_s26 + $0x350] sm:$0xff] }
 0x136   : > { %11683 = vst [vmem:[#allocation96_spill] sm:$0xff] %v9207_v61  ;;  %v2967_v53 = vpop.f32.mrf.mxu0 }
 0x137   : > { %11681 = vst [vmem:[#allocation94_spill] sm:$0xff] %v9202_v14  ;;  %v3160_v21 = vpop.f32.mrf.mxu1  ;;  %v9209_v13 = vadd.f32 %v3158_v52, %v2966_v20  ;;  %v2968_v46 = vadd.f32 %v2967_v53, %v9128_v15  ;;  %v691_v52 = vld [vmem:[%s8117_s26 + $0x370] sm:$0xff]  ;;  %v692_v53 = vld [vmem:[%s8117_s26 + $0x378] sm:$0xff] }
 0x138   : > { %v2971_v62 = vpop.f32.mrf.mxu0  ;;  %3436 = vmatmul.mubr.bf16.gmra.mxu0 %v9198_v40 }
 0x139   : > { %11684 = vst [vmem:[#allocation97_spill] sm:$0xff] %v9209_v13  ;;  %v3164_v30 = vpop.f32.mrf.mxu1  ;;  %3629 = vmatmul.mubr.bf16.gmra.mxu1 %v9200_v9  ;;  %v9214_v10 = vadd.f32 %v3160_v21, %v2968_v46  ;;  %v2972_v39 = vadd.f32 %v2971_v62, %v9114_v60  ;;  %3445 = vmatprep.mubr.bf16.mxu0 %v9205_v12  ;;  %v688_v13 = vld [vmem:[%s8117_s26 + $0x358] sm:$0xff] }
 0x13a   : > { %3638 = vmatprep.mubr.bf16.mxu1 %v9207_v61  ;;  %v2973_v11 = vpop.f32.mrf.mxu0  ;;  %v9226_v21 = vcombine.low %v679_v63, %v683_v41  ;;  %v9228_v46 = vcombine.low %v680_v47, %v684_v38  ;;  %v9233_v12 = vcombine.high %v687_v27, %v691_v52 }
 0x13b   : > { %11685 = vst [vmem:[#allocation98_spill] sm:$0xff] %v9214_v10  ;;  %v3166_v20 = vpop.f32.mrf.mxu1  ;;  %v9223_v14 = vadd.f32 %v3164_v30, %v2972_v39  ;;  %v2974_v40 = vadd.f32 %v2973_v11, %v9128_v15  ;;  %v9235_v10 = vcombine.high %v688_v13, %v692_v53 }
 0x13c   : > { %v2975_v8 = vpop.f32.mrf.mxu0  ;;  %11687 = vst [vmem:[#allocation100_spill] sm:$0xff] %v9226_v21  ;;  %11688 = vst [vmem:[#allocation101_spill] sm:$0xff] %v9228_v46 }
 0x13d   : > { %11686 = vst [vmem:[#allocation99_spill] sm:$0xff] %v9223_v14  ;;  %v3168_v9 = vpop.f32.mrf.mxu1  ;;  %v9230_v62 = vadd.f32 %v3166_v20, %v2974_v40  ;;  %v2976_v61 = vadd.f32 %v2975_v8, %v9114_v60  ;;  %11690 = vst [vmem:[#allocation103_spill] sm:$0xff] %v9233_v12  ;;  %v695_v40 = vld [vmem:[%s8117_s26 + $0x390] sm:$0xff] }
 0x13e   : > { %11691 = vst [vmem:[#allocation104_spill] sm:$0xff] %v9235_v10  ;;  %v2977_v30 = vpop.f32.mrf.mxu0 }
 0x13f   : > { %11689 = vst [vmem:[#allocation102_spill] sm:$0xff] %v9230_v62  ;;  %v3170_v39 = vpop.f32.mrf.mxu1  ;;  %v9237_v11 = vadd.f32 %v3168_v9, %v2976_v61  ;;  %v2978_v63 = vadd.f32 %v2977_v30, %v9128_v15  ;;  %v699_v9 = vld [vmem:[%s8117_s26 + $0x3b0] sm:$0xff]  ;;  %v700_v30 = vld [vmem:[%s8117_s26 + $0x3b8] sm:$0xff] }
 0x140   : > { %v2981_v47 = vpop.f32.mrf.mxu0  ;;  %3446 = vmatmul.mubr.bf16.gmra.mxu0 %v9226_v21 }
 0x141   : > { %11692 = vst [vmem:[#allocation105_spill] sm:$0xff] %v9237_v11  ;;  %v3174_v41 = vpop.f32.mrf.mxu1  ;;  %3639 = vmatmul.mubr.bf16.gmra.mxu1 %v9228_v46  ;;  %v9242_v8 = vadd.f32 %v3170_v39, %v2978_v63  ;;  %v2982_v38 = vadd.f32 %v2981_v47, %v9114_v60  ;;  %3455 = vmatprep.mubr.bf16.mxu0 %v9233_v12  ;;  %v696_v11 = vld [vmem:[%s8117_s26 + $0x398] sm:$0xff] }
 0x142   : > { %3648 = vmatprep.mubr.bf16.mxu1 %v9235_v10  ;;  %v2983_v20 = vpop.f32.mrf.mxu0  ;;  %v9254_v39 = vcombine.low %v687_v27, %v691_v52  ;;  %v9256_v63 = vcombine.low %v688_v13, %v692_v53  ;;  %v9261_v12 = vcombine.high %v695_v40, %v699_v9 }
 0x143   : > { %11693 = vst [vmem:[#allocation106_spill] sm:$0xff] %v9242_v8  ;;  %v3176_v61 = vpop.f32.mrf.mxu1  ;;  %v9251_v62 = vadd.f32 %v3174_v41, %v2982_v38  ;;  %v2984_v21 = vadd.f32 %v2983_v20, %v9128_v15  ;;  %v9263_v8 = vcombine.high %v696_v11, %v700_v30 }
 0x144   : > { %v2985_v14 = vpop.f32.mrf.mxu0  ;;  %11695 = vst [vmem:[#allocation108_spill] sm:$0xff] %v9254_v39  ;;  %11696 = vst [vmem:[#allocation109_spill] sm:$0xff] %v9256_v63 }
 0x145   : > { %11694 = vst [vmem:[#allocation107_spill] sm:$0xff] %v9251_v62  ;;  %v3178_v46 = vpop.f32.mrf.mxu1  ;;  %v9258_v47 = vadd.f32 %v3176_v61, %v2984_v21  ;;  %v2986_v10 = vadd.f32 %v2985_v14, %v9114_v60  ;;  %11698 = vst [vmem:[#allocation111_spill] sm:$0xff] %v9261_v12  ;;  %v703_v21 = vld [vmem:[%s8117_s26 + $0x3d0] sm:$0xff] }
 0x146   : > { %11699 = vst [vmem:[#allocation112_spill] sm:$0xff] %v9263_v8  ;;  %v2987_v41 = vpop.f32.mrf.mxu0 }
 0x147   : > { %11697 = vst [vmem:[#allocation110_spill] sm:$0xff] %v9258_v47  ;;  %v3180_v38 = vpop.f32.mrf.mxu1  ;;  %v9265_v20 = vadd.f32 %v3178_v46, %v2986_v10  ;;  %v2988_v27 = vadd.f32 %v2987_v41, %v9128_v15  ;;  %v707_v46 = vld [vmem:[%s8117_s26 + $0x3f0] sm:$0xff]  ;;  %v708_v41 = vld [vmem:[%s8117_s26 + $0x3f8] sm:$0xff] }
 0x148   : > { %v2991_v13 = vpop.f32.mrf.mxu0  ;;  %3456 = vmatmul.mubr.bf16.gmra.mxu0 %v9254_v39 }
 0x149   : > { %11700 = vst [vmem:[#allocation113_spill] sm:$0xff] %v9265_v20  ;;  %v3184_v52 = vpop.f32.mrf.mxu1  ;;  %3649 = vmatmul.mubr.bf16.gmra.mxu1 %v9256_v63  ;;  %v9270_v14 = vadd.f32 %v3180_v38, %v2988_v27  ;;  %v2992_v53 = vadd.f32 %v2991_v13, %v9114_v60  ;;  %3465 = vmatprep.mubr.bf16.mxu0 %v9261_v12  ;;  %v704_v20 = vld [vmem:[%s8117_s26 + $0x3d8] sm:$0xff] }
 0x14a   : > { %3658 = vmatprep.mubr.bf16.mxu1 %v9263_v8  ;;  %v2993_v61 = vpop.f32.mrf.mxu0  ;;  %v9282_v38 = vcombine.low %v695_v40, %v699_v9  ;;  %v9284_v27 = vcombine.low %v696_v11, %v700_v30  ;;  %v9289_v12 = vcombine.high %v703_v21, %v707_v46 }
 0x14b   : > { %11701 = vst [vmem:[#allocation114_spill] sm:$0xff] %v9270_v14  ;;  %v3186_v10 = vpop.f32.mrf.mxu1  ;;  %v9279_v47 = vadd.f32 %v3184_v52, %v2992_v53  ;;  %v2994_v39 = vadd.f32 %v2993_v61, %v9128_v15  ;;  %v9291_v14 = vcombine.high %v704_v20, %v708_v41 }
 0x14c   : > { %v2995_v62 = vpop.f32.mrf.mxu0  ;;  %11703 = vst [vmem:[#allocation116_spill] sm:$0xff] %v9282_v38  ;;  %11704 = vst [vmem:[#allocation117_spill] sm:$0xff] %v9284_v27 }
 0x14d   : > { %11702 = vst [vmem:[#allocation115_spill] sm:$0xff] %v9279_v47  ;;  %v3188_v63 = vpop.f32.mrf.mxu1  ;;  %v9286_v13 = vadd.f32 %v3186_v10, %v2994_v39  ;;  %v2996_v8 = vadd.f32 %v2995_v62, %v9114_v60  ;;  %11705 = vst [vmem:[#allocation118_spill] sm:$0xff] %v9289_v12  ;;  %v9308_v10 = vcombine.low %v704_v20, %v708_v41 }
 0x14e   : > { %11706 = vst [vmem:[#allocation119_spill] sm:$0xff] %v9291_v14  ;;  %v2997_v26 = vpop.f32.mrf.mxu0 }
 0x14f   : > { %v3190_v58 = vpop.f32.mrf.mxu1  ;;  %v9293_v52 = vadd.f32 %v3188_v63, %v2996_v8  ;;  %v2998_v53 = vadd.f32 %v2997_v26, %v9128_v15  ;;  %v9306_v63 = vcombine.low %v703_v21, %v707_v46  ;;  %11708 = vst [vmem:[#allocation121_spill] sm:$0xff] %v9308_v10 }
 0x150   : > { %v3001_v61 = vpop.f32.mrf.mxu0  ;;  %3466 = vmatmul.mubr.bf16.gmra.mxu0 %v9282_v38  ;;  %v11717_v38 = vld [vmem:[#allocation82_spill] sm:$0xff] }
 0x151   : > { %v3194_v47 = vpop.f32.mrf.mxu1  ;;  %3659 = vmatmul.mubr.bf16.gmra.mxu1 %v9284_v27  ;;  %v9298_v11 = vadd.f32 %v3190_v58, %v2998_v53  ;;  %v3002_v62 = vadd.f32 %v3001_v61, %v9114_v60  ;;  %3475 = vmatprep.mubr.bf16.mxu0 %v9289_v12  ;;  %11707 = vst [vmem:[#allocation120_spill] sm:$0xff] %v9306_v63 }
 0x152   : > { %3668 = vmatprep.mubr.bf16.mxu1 %v9291_v14  ;;  %v3003_v40 = vpop.f32.mrf.mxu0 }
 0x153   : > { %v3196_v9 = vpop.f32.mrf.mxu1  ;;  %v9303_v8 = vadd.f32 %v3194_v47, %v3002_v62  ;;  %v3004_v26 = vadd.f32 %v3003_v40, %v9128_v15 }
 0x154   : > { %v3005_v30 = vpop.f32.mrf.mxu0 }
 0x155   : > { %v3198_v39 = vpop.f32.mrf.mxu1  ;;  %v9310_v58 = vadd.f32 %v3196_v9, %v3004_v26  ;;  %v3006_v53 = vadd.f32 %v3005_v30, %v9114_v60 }
 0x156   : > { %v3007_v61 = vpop.f32.mrf.mxu0 }
 0x157   : > { %v3200_v12 = vpop.f32.mrf.mxu1  ;;  %v9313_v27 = vadd.f32 %v3198_v39, %v3006_v53  ;;  %v3008_v14 = vadd.f32 %v3007_v61, %v9128_v15 }
 0x158   : > { %v3011_v47 = vpop.f32.mrf.mxu0  ;;  %3476 = vmatmul.mubr.bf16.gmra.mxu0 %v9306_v63 }
 0x159   : > { %v3204_v62 = vpop.f32.mrf.mxu1  ;;  %3669 = vmatmul.mubr.bf16.gmra.mxu1 %v9308_v10  ;;  %v9318_v21 = vadd.f32 %v3200_v12, %v3008_v14  ;;  %v3012_v20 = vadd.f32 %v3011_v47, %v9114_v60  ;;  %3711 = vmatprep.mubr.bf16.mxu0 %v8273_v56  ;;  %v7566_v56 = vld [vmem:[%s11396_s1 + $0x6e8] ss:$16 sps:$4 sm:$0xff]  }
 0x15a   : > { %3904 = vmatprep.mubr.bf16.mxu1 %v8281_v59  ;;  %v3013_v46 = vpop.f32.mrf.mxu0  ;;  %v7569_v59 = vld [vmem:[%s11396_s1 + $0x4e8] ss:$16 sps:$4 sm:$0xff]  }
 0x15b   : > { %v3206_v41 = vpop.f32.mrf.mxu1  ;;  %v9323_v40 = vadd.f32 %v3204_v62, %v3012_v20  ;;  %v3014_v9 = vadd.f32 %v3013_v46, %v9128_v15  ;;  %v7574_v62 = vld [vmem:[%s11396_s1 + $0x6cc] ss:$16 sps:$4 sm:$0xff]  }
 0x15c   : > { %v3015_v26 = vpop.f32.mrf.mxu0  ;;  %v7577_v20 = vld [vmem:[%s11396_s1 + $0x4cc] ss:$16 sps:$4 sm:$0xff]  }
 0x15d   : > { %v3208_v30 = vpop.f32.mrf.mxu1  ;;  %v9326_v39 = vadd.f32 %v3206_v41, %v3014_v9  ;;  %v3016_v53 = vadd.f32 %v3015_v26, %v9114_v60 }
 0x15e   : > { %v3017_v12 = vpop.f32.mrf.mxu0 }
 0x15f   : > { %v3210_v14 = vpop.f32.mrf.mxu1  ;;  %v9335_v61 = vadd.f32 %v3208_v30, %v3016_v53  ;;  %v3018_v47 = vadd.f32 %v3017_v12, %v9128_v15  ;;  %v7572_v12 = vld [vmem:[%s11396_s1 + $0x6c8] ss:$16 sps:$4 sm:$0xff]  }
 0x160   : > { %v3021_v46 = vpop.f32.mrf.mxu0  ;;  %3712 = vmatmul.mubr.bf16.vlgmr.msra.gmra.mxu0 %v8337_v16  ;;  %v7575_v16 = vld [vmem:[%s11396_s1 + $0x4c8] ss:$16 sps:$4 sm:$0xff]  }
 0x161   : > { %v3214_v41 = vpop.f32.mrf.mxu1  ;;  %3905 = vmatmul.mubr.bf16.vlgmr.msra.gmra.mxu1 %v8339_v17  ;;  %v9346_v9 = vadd.f32 %v3210_v14, %v3018_v47  ;;  %v3022_v26 = vadd.f32 %v3021_v46, %v9114_v60  ;;  %3721 = vmatprep.mubr.bf16.mxu0 %v8341_v18  ;;  %v7580_v18 = vld [vmem:[%s11396_s1 + $0x6ac] ss:$16 sps:$4 sm:$0xff]  }
 0x162   : > { %3914 = vmatprep.mubr.bf16.mxu1 %v8343_v19  ;;  %v3023_v30 = vpop.f32.mrf.mxu0  ;;  %4259 = vmatpush1.bf16.msra.mxu1 %v7566_v56  ;;  %v7583_v19 = vld [vmem:[%s11396_s1 + $0x4ac] ss:$16 sps:$4 sm:$0xff]  }
 0x163   : > { %v3216_v53 = vpop.f32.mrf.mxu1  ;;  %4066 = vmatpush1.bf16.msra.mxu0 %v7569_v59  ;;  %v9357_v17 = vadd.f32 %v3214_v41, %v3022_v26  ;;  %v3024_v14 = vadd.f32 %v3023_v30, %v9128_v15  ;;  %4260 = vmatprep.subr.bf16.mxu1 %v7574_v62  ;;  %v7578_v62 = vld [vmem:[%s11396_s1 + $0x6a8] ss:$16 sps:$4 sm:$0xff]  }
 0x164   : > { %4067 = vmatprep.subr.bf16.mxu0 %v7577_v20  ;;  %v3025_v56 = vpop.f32.mrf.mxu0  ;;  %v7581_v20 = vld [vmem:[%s11396_s1 + $0x4a8] ss:$16 sps:$4 sm:$0xff]  }
 0x165   : > { %v3218_v59 = vpop.f32.mrf.mxu1  ;;  %v9366_v47 = vadd.f32 %v3216_v53, %v3024_v14  ;;  %v3026_v46 = vadd.f32 %v3025_v56, %v9114_v60  ;;  %v7586_v53 = vld [vmem:[%s11396_s1 + $0x68c] ss:$16 sps:$4 sm:$0xff]  }
 0x166   : > { %v3027_v41 = vpop.f32.mrf.mxu0  ;;  %4261 = vmatpush1.bf16.msra.mxu1 %v7572_v12  ;;  %v7589_v12 = vld [vmem:[%s11396_s1 + $0x48c] ss:$16 sps:$4 sm:$0xff]  }
 0x167   : > { %v3220_v26 = vpop.f32.mrf.mxu1  ;;  %4068 = vmatpush1.bf16.msra.mxu0 %v7575_v16  ;;  %v9375_v30 = vadd.f32 %v3218_v59, %v3026_v46  ;;  %v3028_v10 = vadd.f32 %v3027_v41, %v9128_v15  ;;  %4262 = vmatprep.subr.bf16.mxu1 %v7580_v18  ;;  %v7584_v46 = vld [vmem:[%s11396_s1 + $0x688] ss:$16 sps:$4 sm:$0xff]  }
 0x168   : > { %4069 = vmatprep.subr.bf16.mxu0 %v7583_v19  ;;  %v3031_v16 = vpop.f32.mrf.mxu0  ;;  %3722 = vmatmul.mubr.bf16.gmra.mxu0 %v8377_v32  ;;  %v7587_v32 = vld [vmem:[%s11396_s1 + $0x488] ss:$16 sps:$4 sm:$0xff]  }
 0x169   : > { %v3224_v14 = vpop.f32.mrf.mxu1  ;;  %3915 = vmatmul.mubr.bf16.gmra.mxu1 %v8379_v33  ;;  %v9386_v56 = vadd.f32 %v3220_v26, %v3028_v10  ;;  %v3032_v59 = vadd.f32 %v3031_v16, %v9114_v60  ;;  %3731 = vmatprep.mubr.bf16.mxu0 %v8381_v34  ;;  %v7592_v34 = vld [vmem:[%s11396_s1 + $0x66c] ss:$16 sps:$4 sm:$0xff]  }
 0x16a   : > { %3924 = vmatprep.mubr.bf16.mxu1 %v8383_v35  ;;  %v3033_v18 = vpop.f32.mrf.mxu0  ;;  %4263 = vmatpush1.bf16.msra.mxu1 %v7578_v62  ;;  %v7595_v35 = vld [vmem:[%s11396_s1 + $0x46c] ss:$16 sps:$4 sm:$0xff]  }
 0x16b   : > { %v3226_v19 = vpop.f32.mrf.mxu1  ;;  %4070 = vmatpush1.bf16.msra.mxu0 %v7581_v20  ;;  %v9397_v33 = vadd.f32 %v3224_v14, %v3032_v59  ;;  %v3034_v10 = vadd.f32 %v3033_v18, %v9128_v15  ;;  %4264 = vmatprep.subr.bf16.mxu1 %v7586_v53  ;;  %v7590_v53 = vld [vmem:[%s11396_s1 + $0x668] ss:$16 sps:$4 sm:$0xff]  }
 0x16c   : > { %4071 = vmatprep.subr.bf16.mxu0 %v7589_v12  ;;  %v3035_v41 = vpop.f32.mrf.mxu0  ;;  %v7593_v12 = vld [vmem:[%s11396_s1 + $0x468] ss:$16 sps:$4 sm:$0xff]  }
 0x16d   : > { %v3228_v26 = vpop.f32.mrf.mxu1  ;;  %v9406_v62 = vadd.f32 %v3226_v19, %v3034_v10  ;;  %v3036_v20 = vadd.f32 %v3035_v41, %v9114_v60  ;;  %v7598_v19 = vld [vmem:[%s11396_s1 + $0x64c] ss:$16 sps:$4 sm:$0xff]  }
 0x16e   : > { %v3037_v16 = vpop.f32.mrf.mxu0  ;;  %4265 = vmatpush1.bf16.msra.mxu1 %v7584_v46  ;;  %v7601_v46 = vld [vmem:[%s11396_s1 + $0x44c] ss:$16 sps:$4 sm:$0xff]  }
 0x16f   : > { %v3230_v14 = vpop.f32.mrf.mxu1  ;;  %4072 = vmatpush1.bf16.msra.mxu0 %v7587_v32  ;;  %v9415_v59 = vadd.f32 %v3228_v26, %v3036_v20  ;;  %v3038_v18 = vadd.f32 %v3037_v16, %v9128_v15  ;;  %4266 = vmatprep.subr.bf16.mxu1 %v7592_v34  ;;  %v7596_v20 = vld [vmem:[%s11396_s1 + $0x648] ss:$16 sps:$4 sm:$0xff]  }
 0x170   : > { %4073 = vmatprep.subr.bf16.mxu0 %v7595_v35  ;;  %v3041_v32 = vpop.f32.mrf.mxu0  ;;  %3732 = vmatmul.mubr.bf16.gmra.mxu0 %v8417_v48  ;;  %v7599_v48 = vld [vmem:[%s11396_s1 + $0x448] ss:$16 sps:$4 sm:$0xff]  }
 0x171   : > { %v3234_v10 = vpop.f32.mrf.mxu1  ;;  %3925 = vmatmul.mubr.bf16.gmra.mxu1 %v8419_v49  ;;  %v9426_v41 = vadd.f32 %v3230_v14, %v3038_v18  ;;  %v3042_v26 = vadd.f32 %v3041_v32, %v9114_v60  ;;  %3741 = vmatprep.mubr.bf16.mxu0 %v8421_v50  ;;  %v7604_v50 = vld [vmem:[%s11396_s1 + $0x62c] ss:$16 sps:$4 sm:$0xff]  }
 0x172   : > { %3934 = vmatprep.mubr.bf16.mxu1 %v8423_v51  ;;  %v3043_v34 = vpop.f32.mrf.mxu0  ;;  %4267 = vmatpush1.bf16.msra.mxu1 %v7590_v53  ;;  %v7607_v51 = vld [vmem:[%s11396_s1 + $0x42c] ss:$16 sps:$4 sm:$0xff]  }
 0x173   : > { %v3236_v35 = vpop.f32.mrf.mxu1  ;;  %4074 = vmatpush1.bf16.msra.mxu0 %v7593_v12  ;;  %v9437_v49 = vadd.f32 %v3234_v10, %v3042_v26  ;;  %v3044_v16 = vadd.f32 %v3043_v34, %v9128_v15  ;;  %4268 = vmatprep.subr.bf16.mxu1 %v7598_v19  ;;  %v7602_v19 = vld [vmem:[%s11396_s1 + $0x628] ss:$16 sps:$4 sm:$0xff]  }
 0x174   : > { %4075 = vmatprep.subr.bf16.mxu0 %v7601_v46  ;;  %v3045_v14 = vpop.f32.mrf.mxu0  ;;  %v7605_v46 = vld [vmem:[%s11396_s1 + $0x428] ss:$16 sps:$4 sm:$0xff]  }
 0x175   : > { %v3238_v53 = vpop.f32.mrf.mxu1  ;;  %v9446_v12 = vadd.f32 %v3236_v35, %v3044_v16  ;;  %v3046_v18 = vadd.f32 %v3045_v14, %v9114_v60  ;;  %v7610_v35 = vld [vmem:[%s11396_s1 + $0x60c] ss:$16 sps:$4 sm:$0xff]  }
 0x176   : > { %v3047_v32 = vpop.f32.mrf.mxu0  ;;  %4269 = vmatpush1.bf16.msra.mxu1 %v7596_v20  ;;  %v7613_v20 = vld [vmem:[%s11396_s1 + $0x40c] ss:$16 sps:$4 sm:$0xff]  }
 0x177   : > { %v3240_v10 = vpop.f32.mrf.mxu1  ;;  %4076 = vmatpush1.bf16.msra.mxu0 %v7599_v48  ;;  %v9455_v26 = vadd.f32 %v3238_v53, %v3046_v18  ;;  %v3048_v34 = vadd.f32 %v3047_v32, %v9128_v15  ;;  %4270 = vmatprep.subr.bf16.mxu1 %v7604_v50  ;;  %v7608_v18 = vld [vmem:[%s11396_s1 + $0x608] ss:$16 sps:$4 sm:$0xff]  }
 0x178   : > { %4077 = vmatprep.subr.bf16.mxu0 %v7607_v51  ;;  %v3051_v48 = vpop.f32.mrf.mxu0  ;;  %3742 = vmatmul.mubr.bf16.gmra.mxu0 %v8457_v2  ;;  %v7611_v2 = vld [vmem:[%s11396_s1 + $0x408] ss:$16 sps:$4 sm:$0xff]  }
 0x179   : > { %v3244_v16 = vpop.f32.mrf.mxu1  ;;  %3935 = vmatmul.mubr.bf16.gmra.mxu1 %v8459_v3  ;;  %v9466_v14 = vadd.f32 %v3240_v10, %v3048_v34  ;;  %v3052_v53 = vadd.f32 %v3051_v48, %v9114_v60  ;;  %3751 = vmatprep.mubr.bf16.mxu0 %v8461_v4  ;;  %v7616_v4 = vld [vmem:[%s11396_s1 + $0x7ec] ss:$16 sps:$4 sm:$0xff]  }
 0x17a   : > { %3944 = vmatprep.mubr.bf16.mxu1 %v8463_v5  ;;  %v3053_v50 = vpop.f32.mrf.mxu0  ;;  %4271 = vmatpush1.bf16.msra.mxu1 %v7602_v19  ;;  %v7619_v5 = vld [vmem:[%s11396_s1 + $0x5ec] ss:$16 sps:$4 sm:$0xff]  }
 0x17b   : > { %v3246_v51 = vpop.f32.mrf.mxu1  ;;  %4078 = vmatpush1.bf16.msra.mxu0 %v7605_v46  ;;  %v9477_v3 = vadd.f32 %v3244_v16, %v3052_v53  ;;  %v3054_v32 = vadd.f32 %v3053_v50, %v9128_v15  ;;  %4272 = vmatprep.subr.bf16.mxu1 %v7610_v35  ;;  %v7614_v35 = vld [vmem:[%s11396_s1 + $0x7e8] ss:$16 sps:$4 sm:$0xff]  }
 0x17c   : > { %4079 = vmatprep.subr.bf16.mxu0 %v7613_v20  ;;  %v3055_v10 = vpop.f32.mrf.mxu0  ;;  %v7617_v20 = vld [vmem:[%s11396_s1 + $0x5e8] ss:$16 sps:$4 sm:$0xff]  }
 0x17d   : > { %v3248_v19 = vpop.f32.mrf.mxu1  ;;  %v9486_v46 = vadd.f32 %v3246_v51, %v3054_v32  ;;  %v3056_v34 = vadd.f32 %v3055_v10, %v9114_v60  ;;  %v7622_v51 = vld [vmem:[%s11396_s1 + $0x7cc] ss:$16 sps:$4 sm:$0xff]  }
 0x17e   : > { %v3057_v48 = vpop.f32.mrf.mxu0  ;;  %4273 = vmatpush1.bf16.msra.mxu1 %v7608_v18  ;;  %v7625_v18 = vld [vmem:[%s11396_s1 + $0x5cc] ss:$16 sps:$4 sm:$0xff]  }
 0x17f   : > { %v3250_v16 = vpop.f32.mrf.mxu1  ;;  %4080 = vmatpush1.bf16.msra.mxu0 %v7611_v2  ;;  %v9495_v53 = vadd.f32 %v3248_v19, %v3056_v34  ;;  %v3058_v50 = vadd.f32 %v3057_v48, %v9128_v15  ;;  %4274 = vmatprep.subr.bf16.mxu1 %v7616_v4  ;;  %v7620_v34 = vld [vmem:[%s11396_s1 + $0x7c8] ss:$16 sps:$4 sm:$0xff]  }
 0x180   : > { %4081 = vmatprep.subr.bf16.mxu0 %v7619_v5  ;;  %v3061_v2 = vpop.f32.mrf.mxu0  ;;  %3752 = vmatmul.mubr.bf16.gmra.mxu0 %v8497_v22  ;;  %v7623_v22 = vld [vmem:[%s11396_s1 + $0x5c8] ss:$16 sps:$4 sm:$0xff]  }
 0x181   : > { %v3254_v32 = vpop.f32.mrf.mxu1  ;;  %3945 = vmatmul.mubr.bf16.gmra.mxu1 %v8499_v23  ;;  %v9506_v10 = vadd.f32 %v3250_v16, %v3058_v50  ;;  %v3062_v19 = vadd.f32 %v3061_v2, %v9114_v60  ;;  %3761 = vmatprep.mubr.bf16.mxu0 %v8501_v24  ;;  %v7628_v24 = vld [vmem:[%s11396_s1 + $0x7ac] ss:$16 sps:$4 sm:$0xff]  }
 0x182   : > { %3954 = vmatprep.mubr.bf16.mxu1 %v8503_v25  ;;  %v3063_v4 = vpop.f32.mrf.mxu0  ;;  %4275 = vmatpush2.bf16.msra.mxu1 %v7614_v35  ;;  %v7631_v25 = vld [vmem:[%s11396_s1 + $0x5ac] ss:$16 sps:$4 sm:$0xff]  }
 0x183   : > { %v3256_v5 = vpop.f32.mrf.mxu1  ;;  %4082 = vmatpush2.bf16.msra.mxu0 %v7617_v20  ;;  %v9517_v23 = vadd.f32 %v3254_v32, %v3062_v19  ;;  %v3064_v48 = vadd.f32 %v3063_v4, %v9128_v15  ;;  %4276 = vmatprep.subr.bf16.mxu1 %v7622_v51  ;;  %v7626_v51 = vld [vmem:[%s11396_s1 + $0x7a8] ss:$16 sps:$4 sm:$0xff]  }
 0x184   : > { %4083 = vmatprep.subr.bf16.mxu0 %v7625_v18  ;;  %v3065_v16 = vpop.f32.mrf.mxu0  ;;  %v7629_v18 = vld [vmem:[%s11396_s1 + $0x5a8] ss:$16 sps:$4 sm:$0xff]  }
 0x185   : > { %v3258_v35 = vpop.f32.mrf.mxu1  ;;  %v9526_v20 = vadd.f32 %v3256_v5, %v3064_v48  ;;  %v3066_v50 = vadd.f32 %v3065_v16, %v9114_v60  ;;  %v7634_v5 = vld [vmem:[%s11396_s1 + $0x78c] ss:$16 sps:$4 sm:$0xff]  }
 0x186   : > { %v3067_v2 = vpop.f32.mrf.mxu0  ;;  %4277 = vmatpush2.bf16.msra.mxu1 %v7620_v34  ;;  %v7637_v34 = vld [vmem:[%s11396_s1 + $0x58c] ss:$16 sps:$4 sm:$0xff]  }
 0x187   : > { %v3260_v32 = vpop.f32.mrf.mxu1  ;;  %4084 = vmatpush2.bf16.msra.mxu0 %v7623_v22  ;;  %v9535_v19 = vadd.f32 %v3258_v35, %v3066_v50  ;;  %v3068_v4 = vadd.f32 %v3067_v2, %v9128_v15  ;;  %4278 = vmatprep.subr.bf16.mxu1 %v7628_v24  ;;  %v7632_v50 = vld [vmem:[%s11396_s1 + $0x788] ss:$16 sps:$4 sm:$0xff]  }
 0x188   : > { %4085 = vmatprep.subr.bf16.mxu0 %v7631_v25  ;;  %v3071_v22 = vpop.f32.mrf.mxu0  ;;  %3762 = vmatmul.mubr.bf16.gmra.mxu0 %v8537_v42  ;;  %v7635_v42 = vld [vmem:[%s11396_s1 + $0x588] ss:$16 sps:$4 sm:$0xff]  }
 0x189   : > { %v3264_v48 = vpop.f32.mrf.mxu1  ;;  %3955 = vmatmul.mubr.bf16.gmra.mxu1 %v8539_v43  ;;  %v9546_v16 = vadd.f32 %v3260_v32, %v3068_v4  ;;  %v3072_v35 = vadd.f32 %v3071_v22, %v9114_v60  ;;  %3771 = vmatprep.mubr.bf16.mxu0 %v8541_v44  ;;  %v7640_v44 = vld [vmem:[%s11396_s1 + $0x76c] ss:$16 sps:$4 sm:$0xff]  }
 0x18a   : > { %3964 = vmatprep.mubr.bf16.mxu1 %v8543_v45  ;;  %v3073_v24 = vpop.f32.mrf.mxu0  ;;  %4279 = vmatpush2.bf16.msra.mxu1 %v7626_v51  ;;  %v7643_v45 = vld [vmem:[%s11396_s1 + $0x56c] ss:$16 sps:$4 sm:$0xff]  }
 0x18b   : > { %v3266_v25 = vpop.f32.mrf.mxu1  ;;  %4086 = vmatpush2.bf16.msra.mxu0 %v7629_v18  ;;  %v9557_v43 = vadd.f32 %v3264_v48, %v3072_v35  ;;  %v3074_v2 = vadd.f32 %v3073_v24, %v9128_v15  ;;  %4280 = vmatprep.subr.bf16.mxu1 %v7634_v5  ;;  %v7638_v5 = vld [vmem:[%s11396_s1 + $0x768] ss:$16 sps:$4 sm:$0xff]  }
 0x18c   : > { %4087 = vmatprep.subr.bf16.mxu0 %v7637_v34  ;;  %v3075_v32 = vpop.f32.mrf.mxu0  ;;  %v7641_v34 = vld [vmem:[%s11396_s1 + $0x568] ss:$16 sps:$4 sm:$0xff]  }
 0x18d   : > { %v3268_v51 = vpop.f32.mrf.mxu1  ;;  %v9566_v18 = vadd.f32 %v3266_v25, %v3074_v2  ;;  %v3076_v4 = vadd.f32 %v3075_v32, %v9114_v60  ;;  %v7646_v25 = vld [vmem:[%s11396_s1 + $0x74c] ss:$16 sps:$4 sm:$0xff]  }
 0x18e   : > { %v3077_v22 = vpop.f32.mrf.mxu0  ;;  %4281 = vmatpush2.bf16.msra.mxu1 %v7632_v50  ;;  %v7649_v50 = vld [vmem:[%s11396_s1 + $0x54c] ss:$16 sps:$4 sm:$0xff]  }
 0x18f   : > { %v3270_v48 = vpop.f32.mrf.mxu1  ;;  %4088 = vmatpush2.bf16.msra.mxu0 %v7635_v42  ;;  %v9575_v35 = vadd.f32 %v3268_v51, %v3076_v4  ;;  %v3078_v24 = vadd.f32 %v3077_v22, %v9128_v15  ;;  %4282 = vmatprep.subr.bf16.mxu1 %v7640_v44  ;;  %v7644_v4 = vld [vmem:[%s11396_s1 + $0x748] ss:$16 sps:$4 sm:$0xff]  }
 0x190   : > { %4089 = vmatprep.subr.bf16.mxu0 %v7643_v45  ;;  %v3081_v42 = vpop.f32.mrf.mxu0  ;;  %3772 = vmatmul.mubr.bf16.gmra.mxu0 %v8577_v0  ;;  %v7647_v0 = vld [vmem:[%s11396_s1 + $0x548] ss:$16 sps:$4 sm:$0xff]  }
 0x191   : > { %v3274_v2 = vpop.f32.mrf.mxu1  ;;  %3965 = vmatmul.mubr.bf16.gmra.mxu1 %v8579_v1  ;;  %v9586_v32 = vadd.f32 %v3270_v48, %v3078_v24  ;;  %v3082_v51 = vadd.f32 %v3081_v42, %v9114_v60  ;;  %3781 = vmatprep.mubr.bf16.mxu0 %v8581_v6  ;;  %v7652_v6 = vld [vmem:[%s11396_s1 + $0x72c] ss:$16 sps:$4 sm:$0xff]  }
 0x192   : > { %3974 = vmatprep.mubr.bf16.mxu1 %v8583_v7  ;;  %v3083_v44 = vpop.f32.mrf.mxu0  ;;  %4283 = vmatpush2.bf16.msra.mxu1 %v7638_v5  ;;  %v7655_v7 = vld [vmem:[%s11396_s1 + $0x52c] ss:$16 sps:$4 sm:$0xff]  }
 0x193   : > { %v3276_v45 = vpop.f32.mrf.mxu1  ;;  %4090 = vmatpush2.bf16.msra.mxu0 %v7641_v34  ;;  %v9597_v1 = vadd.f32 %v3274_v2, %v3082_v51  ;;  %v3084_v22 = vadd.f32 %v3083_v44, %v9128_v15  ;;  %4284 = vmatprep.subr.bf16.mxu1 %v7646_v25  ;;  %v7650_v25 = vld [vmem:[%s11396_s1 + $0x728] ss:$16 sps:$4 sm:$0xff]  }
 0x194   : > { %4091 = vmatprep.subr.bf16.mxu0 %v7649_v50  ;;  %v3085_v48 = vpop.f32.mrf.mxu0  ;;  %v7653_v50 = vld [vmem:[%s11396_s1 + $0x528] ss:$16 sps:$4 sm:$0xff]  }
 0x195   : > { %v3278_v5 = vpop.f32.mrf.mxu1  ;;  %v9606_v34 = vadd.f32 %v3276_v45, %v3084_v22  ;;  %v3086_v24 = vadd.f32 %v3085_v48, %v9114_v60  ;;  %v7658_v45 = vld [vmem:[%s11396_s1 + $0x70c] ss:$16 sps:$4 sm:$0xff]  }
 0x196   : > { %v3087_v42 = vpop.f32.mrf.mxu0  ;;  %4285 = vmatpush2.bf16.msra.mxu1 %v7644_v4  ;;  %v7661_v4 = vld [vmem:[%s11396_s1 + $0x50c] ss:$16 sps:$4 sm:$0xff]  }
 0x197   : > { %v3280_v2 = vpop.f32.mrf.mxu1  ;;  %4092 = vmatpush2.bf16.msra.mxu0 %v7647_v0  ;;  %v9615_v51 = vadd.f32 %v3278_v5, %v3086_v24  ;;  %v3088_v44 = vadd.f32 %v3087_v42, %v9128_v15  ;;  %4286 = vmatprep.subr.bf16.mxu1 %v7652_v6  ;;  %v7656_v24 = vld [vmem:[%s11396_s1 + $0x708] ss:$16 sps:$4 sm:$0xff]  }
 0x198   : > { %4093 = vmatprep.subr.bf16.mxu0 %v7655_v7  ;;  %v3091_v0 = vpop.f32.mrf.mxu0  ;;  %3782 = vmatmul.mubr.bf16.gmra.mxu0 %v8617_v28  ;;  %v7659_v28 = vld [vmem:[%s11396_s1 + $0x508] ss:$16 sps:$4 sm:$0xff]  }
 0x199   : > { %v3284_v22 = vpop.f32.mrf.mxu1  ;;  %3975 = vmatmul.mubr.bf16.gmra.mxu1 %v8619_v29  ;;  %v9626_v48 = vadd.f32 %v3280_v2, %v3088_v44  ;;  %v3092_v5 = vadd.f32 %v3091_v0, %v9114_v60  ;;  %3791 = vmatprep.mubr.bf16.mxu0 %v8627_v36  ;;  %v7664_v36 = vld [vmem:[%s11398_s3 + $0x174] ss:$8 sps:$4 sm:$0xff]  }
 0x19a   : > { %3984 = vmatprep.mubr.bf16.mxu1 %v8629_v37  ;;  %v3093_v6 = vpop.f32.mrf.mxu0  ;;  %4287 = vmatpush2.bf16.msra.mxu1 %v7650_v25 }
 0x19b   : > { %11709 = vst [vmem:[#allocation122_spill] sm:$0xff] %v9626_v48  ;;  %v3286_v7 = vpop.f32.mrf.mxu1  ;;  %4094 = vmatpush2.bf16.msra.mxu0 %v7653_v50  ;;  %v9637_v29 = vadd.f32 %v3284_v22, %v3092_v5  ;;  %v3094_v42 = vadd.f32 %v3093_v6, %v9128_v15  ;;  %4288 = vmatprep.subr.bf16.mxu1 %v7658_v45  ;;  %v7712_v45 = vld [vmem:[%s11398_s3 + $0x74] ss:$8 sps:$4 sm:$0xff]  }
 0x19c   : > { %4095 = vmatprep.subr.bf16.mxu0 %v7661_v4  ;;  %v3095_v37 = vpop.f32.mrf.mxu0 }
 0x19d   : > { %11710 = vst [vmem:[#allocation123_spill] sm:$0xff] %v9637_v29  ;;  %v3288_v2 = vpop.f32.mrf.mxu1  ;;  %v9643_v25 = vadd.f32 %v3286_v7, %v3094_v42  ;;  %v3096_v50 = vadd.f32 %v3095_v37, %v9114_v60 }
 0x19e   : > { %v3097_v44 = vpop.f32.mrf.mxu0  ;;  %4289 = vmatpush2.bf16.msra.mxu1 %v7656_v24  ;;  %v11714_v24 = vld [vmem:[#allocation9_spill] sm:$0xff] }
 0x19f   : > { %11711 = vst [vmem:[#allocation124_spill] sm:$0xff] %v9643_v25  ;;  %v3290_v0 = vpop.f32.mrf.mxu1  ;;  %4096 = vmatpush2.bf16.msra.mxu0 %v7659_v28  ;;  %v9646_v22 = vadd.f32 %v3288_v2, %v3096_v50  ;;  %v3098_v5 = vadd.f32 %v3097_v44, %v9128_v15  ;;  %5424 = vmatprep.subr.bf16.mxu1 %v7664_v36  ;;  %v11715_v36 = vld [vmem:[#allocation78_spill] sm:$0xff] }
 0x1a0   : > { %v3327_v4 = vpop.f32.mrf.mxu0  ;;  %3792 = vmatmul.mubr.bf16.gmra.mxu0 %v8651_v54  ;;  %5231 = vmatprep.subr.bf16.mxu0 %v7712_v45  ;;  %v11716_v54 = vld [vmem:[#allocation81_spill] sm:$0xff] }
 0x1a1   : > { %11712 = vst [vmem:[#allocation125_spill] sm:$0xff] %v9646_v22  ;;  %v3520_v6 = vpop.f32.mrf.mxu1  ;;  %3985 = vmatmul.mubr.bf16.gmra.mxu1 %v8653_v55  ;;  %v9654_v60 = vadd.f32 %v3290_v0, %v3098_v5  ;;  %v3328_v7 = vadd.f32 %v3327_v4, %v9139_v31  ;;  %3801 = vmatprep.mubr.bf16.mxu0 %v8655_v57  ;;  %v11721_v22 = vld [vmem:[#allocation12_spill] sm:$0xff] }
 0x1a2   : > { %3994 = vmatprep.mubr.bf16.mxu1 %v11714_v24  ;;  %v3329_v15 = vpop.f32.mrf.mxu0  ;;  %v11719_v24 = vld [vmem:[#allocation11_spill] sm:$0xff] }
 0x1a3   : > { %11713 = vst [vmem:[#allocation126_spill] sm:$0xff] %v9654_v60  ;;  %v3522_v28 = vpop.f32.mrf.mxu1  ;;  %v3521_v42 = vadd.f32 %v3520_v6, %v3328_v7  ;;  %v3330_v37 = vadd.f32 %v3329_v15, %v11715_v36  ;;  %v11718_v60 = vld [vmem:[#allocation10_spill] sm:$0xff]  ;;  %v11720_v15 = vld [vmem:[#allocation83_spill] sm:$0xff] }
 0x1a4   : > { %v3331_v2 = vpop.f32.mrf.mxu0 }
 0x1a5   : > { %v3524_v50 = vpop.f32.mrf.mxu1  ;;  %v3523_v44 = vadd.f32 %v3522_v28, %v3330_v37  ;;  %v3332_v63 = vadd.f32 %v3331_v2, %v11716_v54  ;;  %v4451_v45 = vmax.f32 %v3521_v42, 0.0  ;;  %v11722_v28 = vld [vmem:[#allocation13_spill] sm:$0xff] }
 0x1a6   : > { %v3333_v55 = vpop.f32.mrf.mxu0 }
 0x1a7   : > { %v3526_v0 = vpop.f32.mrf.mxu1  ;;  %v3525_v5 = vadd.f32 %v3524_v50, %v3332_v63  ;;  %v3334_v31 = vadd.f32 %v3333_v55, %v11717_v38  ;;  %v4452_v37 = vmax.f32 %v3523_v44, 0.0  ;;  %v11724_v55 = vld [vmem:[#allocation86_spill] sm:$0xff] }
 0x1a8   : > { %v3337_v4 = vpop.f32.mrf.mxu0  ;;  %3802 = vmatmul.mubr.bf16.gmra.mxu0 %v11718_v60 }
 0x1a9   : > { %v3530_v57 = vpop.f32.mrf.mxu1  ;;  %3995 = vmatmul.mubr.bf16.gmra.mxu1 %v11719_v24  ;;  %v4455_v6 = vmax.f32 %v3525_v5, 0.0  ;;  %v3527_v7 = vadd.f32 %v3526_v0, %v3334_v31  ;;  %v3338_v36 = vadd.f32 %v3337_v4, %v11720_v15  ;;  %3811 = vmatprep.mubr.bf16.mxu0 %v11721_v22  ;;  %v11726_v5 = vld [vmem:[#allocation89_spill] sm:$0xff] }
 0x1aa   : > { %4004 = vmatprep.mubr.bf16.mxu1 %v11722_v28  ;;  %v3339_v2 = vpop.f32.mrf.mxu0  ;;  %v11727_v28 = vld [vmem:[#allocation90_spill] sm:$0xff] }
 0x1ab   : > { %v3532_v63 = vpop.f32.mrf.mxu1  ;;  %v9667_v50 = vpack.c.bf16 %v4455_v6, %v4451_v45  ;;  %v4456_v38 = vmax.f32 %v3527_v7, 0.0  ;;  %v3531_v54 = vadd.f32 %v3530_v57, %v3338_v36  ;;  %v3340_v60 = vadd.f32 %v3339_v2, %v11724_v55  ;;  %v11728_v45 = vld [vmem:[#allocation14_spill] sm:$0xff]  ;;  %v11729_v6 = vld [vmem:[#allocation15_spill] sm:$0xff] }
 0x1ac   : > { %v3341_v25 = vpop.f32.mrf.mxu0  ;;  %v11730_v2 = vld [vmem:[#allocation91_spill] sm:$0xff] }
 0x1ad   : > { %11723 = vst [vmem:[#allocation9_spill] sm:$0xff] %v9667_v50  ;;  %v3534_v24 = vpop.f32.mrf.mxu1  ;;  %v9670_v42 = vpack.c.bf16 %v4456_v38, %v4452_v37  ;;  %v3533_v0 = vadd.f32 %v3532_v63, %v3340_v60  ;;  %v3342_v31 = vadd.f32 %v3341_v25, %v11726_v5  ;;  %v4459_v57 = vmax.f32 %v3531_v54, 0.0  ;;  %v11731_v38 = vld [vmem:[#allocation16_spill] sm:$0xff]  ;;  %v11732_v63 = vld [vmem:[#allocation17_spill] sm:$0xff] }
 0x1ae   : > { %v3343_v4 = vpop.f32.mrf.mxu0 }
 0x1af   : > { %11725 = vst [vmem:[#allocation78_spill] sm:$0xff] %v9670_v42  ;;  %v3536_v22 = vpop.f32.mrf.mxu1  ;;  %v3535_v15 = vadd.f32 %v3534_v24, %v3342_v31  ;;  %v3344_v44 = vadd.f32 %v3343_v4, %v11727_v28  ;;  %v4460_v25 = vmax.f32 %v3533_v0, 0.0  ;;  %v11734_v4 = vld [vmem:[#allocation94_spill] sm:$0xff] }
 0x1b0   : > { %v3347_v29 = vpop.f32.mrf.mxu0  ;;  %3812 = vmatmul.mubr.bf16.gmra.mxu0 %v11728_v45 }
 0x1b1   : > { %v3540_v48 = vpop.f32.mrf.mxu1  ;;  %4005 = vmatmul.mubr.bf16.gmra.mxu1 %v11729_v6  ;;  %v4463_v7 = vmax.f32 %v3535_v15, 0.0  ;;  %v3537_v36 = vadd.f32 %v3536_v22, %v3344_v44  ;;  %v3348_v37 = vadd.f32 %v3347_v29, %v11730_v2  ;;  %3821 = vmatprep.mubr.bf16.mxu0 %v11731_v38  ;;  %v11736_v15 = vld [vmem:[#allocation97_spill] sm:$0xff] }
 0x1b2   : > { %4014 = vmatprep.mubr.bf16.mxu1 %v11732_v63  ;;  %v3349_v55 = vpop.f32.mrf.mxu0  ;;  %v11737_v63 = vld [vmem:[#allocation98_spill] sm:$0xff] }
 0x1b3   : > { %v3542_v60 = vpop.f32.mrf.mxu1  ;;  %v9679_v24 = vpack.c.bf16 %v4463_v7, %v4459_v57  ;;  %v4464_v5 = vmax.f32 %v3537_v36, 0.0  ;;  %v3541_v31 = vadd.f32 %v3540_v48, %v3348_v37  ;;  %v3350_v28 = vadd.f32 %v3349_v55, %v11734_v4  ;;  %v11738_v57 = vld [vmem:[#allocation18_spill] sm:$0xff]  ;;  %v11739_v7 = vld [vmem:[#allocation19_spill] sm:$0xff] }
 0x1b4   : > { %v3351_v45 = vpop.f32.mrf.mxu0  ;;  %v11740_v55 = vld [vmem:[#allocation99_spill] sm:$0xff] }
 0x1b5   : > { %11733 = vst [vmem:[#allocation81_spill] sm:$0xff] %v9679_v24  ;;  %v3544_v6 = vpop.f32.mrf.mxu1  ;;  %v9682_v54 = vpack.c.bf16 %v4464_v5, %v4460_v25  ;;  %v3543_v22 = vadd.f32 %v3542_v60, %v3350_v28  ;;  %v3352_v29 = vadd.f32 %v3351_v45, %v11736_v15  ;;  %v4467_v48 = vmax.f32 %v3541_v31, 0.0  ;;  %v11741_v5 = vld [vmem:[#allocation20_spill] sm:$0xff]  ;;  %v11742_v60 = vld [vmem:[#allocation21_spill] sm:$0xff] }
 0x1b6   : > { %v3353_v44 = vpop.f32.mrf.mxu0 }
 0x1b7   : > { %11735 = vst [vmem:[#allocation82_spill] sm:$0xff] %v9682_v54  ;;  %v3546_v2 = vpop.f32.mrf.mxu1  ;;  %v3545_v38 = vadd.f32 %v3544_v6, %v3352_v29  ;;  %v3354_v0 = vadd.f32 %v3353_v44, %v11737_v63  ;;  %v4468_v4 = vmax.f32 %v3543_v22, 0.0  ;;  %v11744_v44 = vld [vmem:[#allocation102_spill] sm:$0xff] }
 0x1b8   : > { %v3357_v50 = vpop.f32.mrf.mxu0  ;;  %3822 = vmatmul.mubr.bf16.gmra.mxu0 %v11738_v57 }
 0x1b9   : > { %v3550_v42 = vpop.f32.mrf.mxu1  ;;  %4015 = vmatmul.mubr.bf16.gmra.mxu1 %v11739_v7  ;;  %v4471_v36 = vmax.f32 %v3545_v38, 0.0  ;;  %v3547_v37 = vadd.f32 %v3546_v2, %v3354_v0  ;;  %v3358_v25 = vadd.f32 %v3357_v50, %v11740_v55  ;;  %3831 = vmatprep.mubr.bf16.mxu0 %v11741_v5  ;;  %v11746_v38 = vld [vmem:[#allocation105_spill] sm:$0xff] }
 0x1ba   : > { %4024 = vmatprep.mubr.bf16.mxu1 %v11742_v60  ;;  %v3359_v28 = vpop.f32.mrf.mxu0  ;;  %v11747_v60 = vld [vmem:[#allocation106_spill] sm:$0xff] }
 0x1bb   : > { %v3552_v45 = vpop.f32.mrf.mxu1  ;;  %v9691_v6 = vpack.c.bf16 %v4471_v36, %v4467_v48  ;;  %v4472_v15 = vmax.f32 %v3547_v37, 0.0  ;;  %v3551_v29 = vadd.f32 %v3550_v42, %v3358_v25  ;;  %v3360_v63 = vadd.f32 %v3359_v28, %v11744_v44  ;;  %v11748_v48 = vld [vmem:[#allocation22_spill] sm:$0xff]  ;;  %v11749_v36 = vld [vmem:[#allocation23_spill] sm:$0xff] }
 0x1bc   : > { %v3361_v57 = vpop.f32.mrf.mxu0  ;;  %v11750_v28 = vld [vmem:[#allocation107_spill] sm:$0xff] }
 0x1bd   : > { %11743 = vst [vmem:[#allocation10_spill] sm:$0xff] %v9691_v6  ;;  %v3554_v7 = vpop.f32.mrf.mxu1  ;;  %v9694_v31 = vpack.c.bf16 %v4472_v15, %v4468_v4  ;;  %v3553_v2 = vadd.f32 %v3552_v45, %v3360_v63  ;;  %v3362_v50 = vadd.f32 %v3361_v57, %v11746_v38  ;;  %v4475_v42 = vmax.f32 %v3551_v29, 0.0  ;;  %v11751_v15 = vld [vmem:[#allocation24_spill] sm:$0xff]  ;;  %v11752_v45 = vld [vmem:[#allocation25_spill] sm:$0xff] }
 0x1be   : > { %v3363_v0 = vpop.f32.mrf.mxu0 }
 0x1bf   : > { %11745 = vst [vmem:[#allocation11_spill] sm:$0xff] %v9694_v31  ;;  %v3556_v55 = vpop.f32.mrf.mxu1  ;;  %v3555_v5 = vadd.f32 %v3554_v7, %v3362_v50  ;;  %v3364_v22 = vadd.f32 %v3363_v0, %v11747_v60  ;;  %v4476_v44 = vmax.f32 %v3553_v2, 0.0  ;;  %v11754_v0 = vld [vmem:[#allocation110_spill] sm:$0xff] }
 0x1c0   : > { %v3367_v24 = vpop.f32.mrf.mxu0  ;;  %3832 = vmatmul.mubr.bf16.gmra.mxu0 %v11748_v48 }
 0x1c1   : > { %v3560_v54 = vpop.f32.mrf.mxu1  ;;  %4025 = vmatmul.mubr.bf16.gmra.mxu1 %v11749_v36  ;;  %v4479_v37 = vmax.f32 %v3555_v5, 0.0  ;;  %v3557_v25 = vadd.f32 %v3556_v55, %v3364_v22  ;;  %v3368_v4 = vadd.f32 %v3367_v24, %v11750_v28  ;;  %3841 = vmatprep.mubr.bf16.mxu0 %v11751_v15  ;;  %v11755_v5 = vld [vmem:[#allocation113_spill] sm:$0xff] }
 0x1c2   : > { %4034 = vmatprep.mubr.bf16.mxu1 %v11752_v45  ;;  %v3369_v63 = vpop.f32.mrf.mxu0  ;;  %v11756_v45 = vld [vmem:[#allocation114_spill] sm:$0xff] }
 0x1c3   : > { %v3562_v57 = vpop.f32.mrf.mxu1  ;;  %v9703_v7 = vpack.c.bf16 %v4479_v37, %v4475_v42  ;;  %v4480_v38 = vmax.f32 %v3557_v25, 0.0  ;;  %v3561_v50 = vadd.f32 %v3560_v54, %v3368_v4  ;;  %v3370_v60 = vadd.f32 %v3369_v63, %v11754_v0  ;;  %v11757_v42 = vld [vmem:[#allocation26_spill] sm:$0xff]  ;;  %v11758_v37 = vld [vmem:[#allocation27_spill] sm:$0xff] }
 0x1c4   : > { %v3371_v48 = vpop.f32.mrf.mxu0  ;;  %v11759_v63 = vld [vmem:[#allocation115_spill] sm:$0xff] }
 0x1c5   : > { %11753 = vst [vmem:[#allocation83_spill] sm:$0xff] %v9703_v7  ;;  %v3564_v36 = vpop.f32.mrf.mxu1  ;;  %v9706_v29 = vpack.c.bf16 %v4480_v38, %v4476_v44  ;;  %v3563_v55 = vadd.f32 %v3562_v57, %v3370_v60  ;;  %v3372_v24 = vadd.f32 %v3371_v48, %v11755_v5  ;;  %v4483_v54 = vmax.f32 %v3561_v50, 0.0  ;;  %v11760_v38 = vld [vmem:[#allocation28_spill] sm:$0xff]  ;;  %v11761_v57 = vld [vmem:[#allocation29_spill] sm:$0xff] }
 0x1c6   : > { %v3373_v22 = vpop.f32.mrf.mxu0 }
 0x1c7   : > { %v3566_v28 = vpop.f32.mrf.mxu1  ;;  %v3565_v15 = vadd.f32 %v3564_v36, %v3372_v24  ;;  %v3374_v2 = vadd.f32 %v3373_v22, %v11756_v45  ;;  %v4484_v0 = vmax.f32 %v3563_v55, 0.0 }
 0x1c8   : > { %v3377_v6 = vpop.f32.mrf.mxu0  ;;  %3842 = vmatmul.mubr.bf16.gmra.mxu0 %v11757_v42 }
 0x1c9   : > { %v3570_v31 = vpop.f32.mrf.mxu1  ;;  %4035 = vmatmul.mubr.bf16.gmra.mxu1 %v11758_v37  ;;  %v4487_v25 = vmax.f32 %v3565_v15, 0.0  ;;  %v3567_v4 = vadd.f32 %v3566_v28, %v3374_v2  ;;  %v3378_v44 = vadd.f32 %v3377_v6, %v11759_v63  ;;  %3851 = vmatprep.mubr.bf16.mxu0 %v11760_v38 }
 0x1ca   : > { %4044 = vmatprep.mubr.bf16.mxu1 %v11761_v57  ;;  %v3379_v60 = vpop.f32.mrf.mxu0  ;;  %v11764_v57 = vld [vmem:[#allocation32_spill] sm:$0xff] }
 0x1cb   : > { %v3572_v48 = vpop.f32.mrf.mxu1  ;;  %v9715_v36 = vpack.c.bf16 %v4487_v25, %v4483_v54  ;;  %v4488_v5 = vmax.f32 %v3567_v4, 0.0  ;;  %v3571_v24 = vadd.f32 %v3570_v31, %v3378_v44  ;;  %v3380_v22 = vadd.f32 %v3379_v60, %v9286_v13  ;;  %v11762_v54 = vld [vmem:[#allocation30_spill] sm:$0xff]  ;;  %v11763_v25 = vld [vmem:[#allocation31_spill] sm:$0xff] }
 0x1cc   : > { %v3381_v45 = vpop.f32.mrf.mxu0 }
 0x1cd   : > { %v3574_v42 = vpop.f32.mrf.mxu1  ;;  %v9718_v50 = vpack.c.bf16 %v4488_v5, %v4484_v0  ;;  %v3573_v28 = vadd.f32 %v3572_v48, %v3380_v22  ;;  %v3382_v6 = vadd.f32 %v3381_v45, %v9293_v52  ;;  %v4491_v31 = vmax.f32 %v3571_v24, 0.0  ;;  %v11765_v0 = vld [vmem:[#allocation33_spill] sm:$0xff] }
 0x1ce   : > { %v3383_v15 = vpop.f32.mrf.mxu0 }
 0x1cf   : > { %v3576_v2 = vpop.f32.mrf.mxu1  ;;  %v3575_v37 = vadd.f32 %v3574_v42, %v3382_v6  ;;  %v3384_v55 = vadd.f32 %v3383_v15, %v9298_v11  ;;  %v4492_v52 = vmax.f32 %v3573_v28, 0.0 }
 0x1d0   : > { %v3387_v63 = vpop.f32.mrf.mxu0  ;;  %3852 = vmatmul.mubr.bf16.gmra.mxu0 %v11762_v54 }
 0x1d1   : > { %v3580_v38 = vpop.f32.mrf.mxu1  ;;  %4045 = vmatmul.mubr.bf16.gmra.mxu1 %v11763_v25  ;;  %v4495_v13 = vmax.f32 %v3575_v37, 0.0  ;;  %v3577_v4 = vadd.f32 %v3576_v2, %v3384_v55  ;;  %v3388_v44 = vadd.f32 %v3387_v63, %v9303_v8  ;;  %3861 = vmatprep.mubr.bf16.mxu0 %v11764_v57  ;;  %v11766_v25 = vld [vmem:[#allocation34_spill] sm:$0xff]  ;;  %v11769_v57 = vld [vmem:[#allocation37_spill] sm:$0xff] }
 0x1d2   : > { %4054 = vmatprep.mubr.bf16.mxu1 %v11765_v0  ;;  %v3389_v60 = vpop.f32.mrf.mxu0 }
 0x1d3   : > { %v3582_v48 = vpop.f32.mrf.mxu1  ;;  %v9727_v5 = vpack.c.bf16 %v4495_v13, %v4491_v31  ;;  %v4496_v11 = vmax.f32 %v3577_v4, 0.0  ;;  %v3581_v22 = vadd.f32 %v3580_v38, %v3388_v44  ;;  %v3390_v45 = vadd.f32 %v3389_v60, %v9310_v58  ;;  %v11767_v31 = vld [vmem:[#allocation35_spill] sm:$0xff]  ;;  %v11768_v44 = vld [vmem:[#allocation36_spill] sm:$0xff] }
 0x1d4   : > { %v3391_v42 = vpop.f32.mrf.mxu0 }
 0x1d5   : > { %v3584_v6 = vpop.f32.mrf.mxu1  ;;  %v9730_v24 = vpack.c.bf16 %v4496_v11, %v4492_v52  ;;  %v3583_v15 = vadd.f32 %v3582_v48, %v3390_v45  ;;  %v3392_v8 = vadd.f32 %v3391_v42, %v9313_v27  ;;  %v4499_v38 = vmax.f32 %v3581_v22, 0.0 }
 0x1d6   : > { %v3393_v2 = vpop.f32.mrf.mxu0 }
 0x1d7   : > { %v3586_v37 = vpop.f32.mrf.mxu1  ;;  %v3585_v55 = vadd.f32 %v3584_v6, %v3392_v8  ;;  %v3394_v28 = vadd.f32 %v3393_v2, %v9318_v21  ;;  %v4500_v27 = vmax.f32 %v3583_v15, 0.0 }
 0x1d8   : > { %v3397_v63 = vpop.f32.mrf.mxu0  ;;  %3862 = vmatmul.mubr.bf16.gmra.mxu0 %v11766_v25  ;;  %v11771_v25 = vld [vmem:[#allocation39_spill] sm:$0xff] }
 0x1d9   : > { %v3590_v54 = vpop.f32.mrf.mxu1  ;;  %4055 = vmatmul.mubr.bf16.gmra.mxu1 %v11767_v31  ;;  %v4503_v58 = vmax.f32 %v3585_v55, 0.0  ;;  %v3587_v13 = vadd.f32 %v3586_v37, %v3394_v28  ;;  %v3398_v4 = vadd.f32 %v3397_v63, %v9323_v40  ;;  %4097 = vmatprep.mubr.bf16.mxu0 %v11768_v44  ;;  %v7662_v40 = vld [vmem:[%s11398_s3 + $0x170] ss:$8 sps:$4 sm:$0xff]   ;;  %v7667_v37 = vld [vmem:[%s11398_s3 + $0x164] ss:$8 sps:$4 sm:$0xff]  }
 0x1da   : > { %4290 = vmatprep.mubr.bf16.mxu1 %v11769_v57  ;;  %v3399_v0 = vpop.f32.mrf.mxu0  ;;  %v7710_v28 = vld [vmem:[%s11398_s3 + $0x70] ss:$8 sps:$4 sm:$0xff]   ;;  %v7715_v31 = vld [vmem:[%s11398_s3 + $0x64] ss:$8 sps:$4 sm:$0xff]  }
 0x1db   : > { %v3592_v52 = vpop.f32.mrf.mxu1  ;;  %v9739_v60 = vpack.c.bf16 %v4503_v58, %v4499_v38  ;;  %v4504_v21 = vmax.f32 %v3587_v13, 0.0  ;;  %v3591_v48 = vadd.f32 %v3590_v54, %v3398_v4  ;;  %v3400_v11 = vadd.f32 %v3399_v0, %v9326_v39  ;;  %v11770_v54 = vld [vmem:[#allocation38_spill] sm:$0xff]  ;;  %v11772_v44 = vld [vmem:[#allocation40_spill] sm:$0xff] }
 0x1dc   : > { %v3401_v45 = vpop.f32.mrf.mxu0 }
 0x1dd   : > { %v3594_v42 = vpop.f32.mrf.mxu1  ;;  %v9742_v22 = vpack.c.bf16 %v4504_v21, %v4500_v27  ;;  %v3402_v6 = vadd.f32 %v3401_v45, %v9335_v61  ;;  %v3593_v8 = vadd.f32 %v3592_v52, %v3400_v11  ;;  %v4507_v38 = vmax.f32 %v3591_v48, 0.0  ;;  %v11773_v52 = vld [vmem:[#allocation41_spill] sm:$0xff]  ;;  %v7670_v21 = vld [vmem:[%s11398_s3 + $0x154] ss:$8 sps:$4 sm:$0xff]  }
 0x1de   : > { %v3403_v15 = vpop.f32.mrf.mxu0 }
 0x1df   : > { %v3596_v2 = vpop.f32.mrf.mxu1  ;;  %v3595_v55 = vadd.f32 %v3594_v42, %v3402_v6  ;;  %v3404_v39 = vadd.f32 %v3403_v15, %v9346_v9  ;;  %v7665_v9 = vld [vmem:[%s11398_s3 + $0x160] ss:$8 sps:$4 sm:$0xff]   ;;  %v4508_v57 = vmax.f32 %v3593_v8, 0.0 }
 0x1e0   : > { %v3407_v63 = vpop.f32.mrf.mxu0  ;;  %4098 = vmatmul.mubr.bf16.vlgmr.msra.gmra.mxu0 %v11770_v54  ;;  %v7713_v42 = vld [vmem:[%s11398_s3 + $0x60] ss:$8 sps:$4 sm:$0xff]  }
 0x1e1   : > { %v3600_v61 = vpop.f32.mrf.mxu1  ;;  %4291 = vmatmul.mubr.bf16.vlgmr.msra.gmra.mxu1 %v11771_v25  ;;  %v4511_v58 = vmax.f32 %v3595_v55, 0.0  ;;  %v3597_v13 = vadd.f32 %v3596_v2, %v3404_v39  ;;  %v3408_v4 = vadd.f32 %v3407_v63, %v9357_v17  ;;  %4107 = vmatprep.mubr.bf16.mxu0 %v11772_v44  ;;  %v7673_v39 = vld [vmem:[%s11398_s3 + $0x144] ss:$8 sps:$4 sm:$0xff]  }
 0x1e2   : > { %5425 = vmatpush1.bf16.msra.mxu1 %v7662_v40  ;;  %v3409_v27 = vpop.f32.mrf.mxu0  ;;  %4300 = vmatprep.mubr.bf16.mxu1 %v11773_v52  ;;  %v11774_v25 = vld [vmem:[#allocation42_spill] sm:$0xff]  ;;  %v11776_v44 = vld [vmem:[#allocation44_spill] sm:$0xff] }
 0x1e3   : > { %v3602_v0 = vpop.f32.mrf.mxu1  ;;  %5426 = vmatprep.subr.bf16.mxu1 %v7667_v37  ;;  %v9769_v48 = vpack.c.bf16 %v4511_v58, %v4507_v38  ;;  %v4512_v17 = vmax.f32 %v3597_v13, 0.0  ;;  %v3601_v11 = vadd.f32 %v3600_v61, %v3408_v4  ;;  %v3410_v45 = vadd.f32 %v3409_v27, %v9366_v47  ;;  %5232 = vmatpush1.bf16.msra.mxu0 %v7710_v28  ;;  %v7668_v37 = vld [vmem:[%s11398_s3 + $0x150] ss:$8 sps:$4 sm:$0xff]  }
 0x1e4   : > { %v3411_v6 = vpop.f32.mrf.mxu0  ;;  %5233 = vmatprep.subr.bf16.mxu0 %v7715_v31  ;;  %v11775_v31 = vld [vmem:[#allocation43_spill] sm:$0xff] }
 0x1e5   : > { %v3604_v40 = vpop.f32.mrf.mxu1  ;;  %v9775_v8 = vpack.c.bf16 %v4512_v17, %v4508_v57  ;;  %v3603_v15 = vadd.f32 %v3602_v0, %v3410_v45  ;;  %v3412_v2 = vadd.f32 %v3411_v6, %v9375_v30  ;;  %v7718_v30 = vld [vmem:[%s11398_s3 + $0x54] ss:$8 sps:$4 sm:$0xff]   ;;  %v7716_v38 = vld [vmem:[%s11398_s3 + $0x50] ss:$8 sps:$4 sm:$0xff]   ;;  %v4515_v58 = vmax.f32 %v3601_v11, 0.0 }
 0x1e6   : > { %5427 = vmatpush1.bf16.msra.mxu1 %v7665_v9  ;;  %v3413_v55 = vpop.f32.mrf.mxu0  ;;  %v7671_v9 = vld [vmem:[%s11398_s3 + $0x140] ss:$8 sps:$4 sm:$0xff]   ;;  %v7721_v57 = vld [vmem:[%s11398_s3 + $0x44] ss:$8 sps:$4 sm:$0xff]  }
 0x1e7   : > { %v3606_v47 = vpop.f32.mrf.mxu1  ;;  %5428 = vmatprep.subr.bf16.mxu1 %v7670_v21  ;;  %v3605_v28 = vadd.f32 %v3604_v40, %v3412_v2  ;;  %v3414_v63 = vadd.f32 %v3413_v55, %v9386_v56  ;;  %5234 = vmatpush1.bf16.msra.mxu0 %v7713_v42  ;;  %v4516_v27 = vmax.f32 %v3603_v15, 0.0  ;;  %v11777_v21 = vld [vmem:[#allocation45_spill] sm:$0xff]  ;;  %v7674_v55 = vld [vmem:[%s11398_s3 + $0x130] ss:$8 sps:$4 sm:$0xff]  }
 0x1e8   : > { %v3417_v61 = vpop.f32.mrf.mxu0  ;;  %4108 = vmatmul.mubr.bf16.gmra.mxu0 %v11774_v25  ;;  %5235 = vmatprep.subr.bf16.mxu0 %v7718_v30  ;;  %v11781_v25 = vld [vmem:[#allocation47_spill] sm:$0xff] }
 0x1e9   : > { %v3610_v54 = vpop.f32.mrf.mxu1  ;;  %4301 = vmatmul.mubr.bf16.gmra.mxu1 %v11775_v31  ;;  %v4519_v13 = vmax.f32 %v3605_v28, 0.0  ;;  %v3607_v4 = vadd.f32 %v3606_v47, %v3414_v63  ;;  %v3418_v56 = vadd.f32 %v3417_v61, %v9397_v33  ;;  %4117 = vmatprep.mubr.bf16.mxu0 %v11776_v44  ;;  %v7676_v33 = vld [vmem:[%s11398_s3 + $0x134] ss:$8 sps:$4 sm:$0xff]  }
 0x1ea   : > { %5429 = vmatpush1.bf16.msra.mxu1 %v7668_v37  ;;  %v3419_v0 = vpop.f32.mrf.mxu0  ;;  %4310 = vmatprep.mubr.bf16.mxu1 %v11777_v21  ;;  %v7724_v31 = vld [vmem:[%s11398_s3 + $0x34] ss:$8 sps:$4 sm:$0xff]  }
 0x1eb   : > { %v3612_v52 = vpop.f32.mrf.mxu1  ;;  %5430 = vmatprep.subr.bf16.mxu1 %v7673_v39  ;;  %v9805_v17 = vpack.c.bf16 %v4519_v13, %v4515_v58  ;;  %v4520_v11 = vmax.f32 %v3607_v4, 0.0  ;;  %v3611_v45 = vadd.f32 %v3610_v54, %v3418_v56  ;;  %v3420_v42 = vadd.f32 %v3419_v0, %v9406_v62  ;;  %5236 = vmatpush1.bf16.msra.mxu0 %v7716_v38  ;;  %v7679_v62 = vld [vmem:[%s11398_s3 + $0x124] ss:$8 sps:$4 sm:$0xff]   ;;  %v7682_v0 = vld [vmem:[%s11398_s3 + $0x114] ss:$8 sps:$4 sm:$0xff]  }
 0x1ec   : > { %v3421_v6 = vpop.f32.mrf.mxu0  ;;  %5237 = vmatprep.subr.bf16.mxu0 %v7721_v57  ;;  %v11780_v54 = vld [vmem:[#allocation46_spill] sm:$0xff]  ;;  %v11782_v56 = vld [vmem:[#allocation48_spill] sm:$0xff] }
 0x1ed   : > { %11778 = vst [vmem:[#allocation12_spill] sm:$0xff] %v9805_v17  ;;  %v3614_v40 = vpop.f32.mrf.mxu1  ;;  %v9808_v15 = vpack.c.bf16 %v4520_v11, %v4516_v27  ;;  %v3613_v2 = vadd.f32 %v3612_v52, %v3420_v42  ;;  %v3422_v37 = vadd.f32 %v3421_v6, %v9415_v59  ;;  %v7719_v59 = vld [vmem:[%s11398_s3 + $0x40] ss:$8 sps:$4 sm:$0xff]   ;;  %v4523_v38 = vmax.f32 %v3611_v45, 0.0  ;;  %v7722_v11 = vld [vmem:[%s11398_s3 + $0x30] ss:$8 sps:$4 sm:$0xff]  }
 0x1ee   : > { %5431 = vmatpush1.bf16.msra.mxu1 %v7671_v9  ;;  %v3423_v47 = vpop.f32.mrf.mxu0  ;;  %v11783_v27 = vld [vmem:[#allocation49_spill] sm:$0xff] }
 0x1ef   : > { %11779 = vst [vmem:[#allocation13_spill] sm:$0xff] %v9808_v15  ;;  %v3616_v39 = vpop.f32.mrf.mxu1  ;;  %5432 = vmatprep.subr.bf16.mxu1 %v7676_v33  ;;  %v3615_v28 = vadd.f32 %v3614_v40, %v3422_v37  ;;  %v3424_v63 = vadd.f32 %v3423_v47, %v9426_v41  ;;  %v7677_v41 = vld [vmem:[%s11398_s3 + $0x120] ss:$8 sps:$4 sm:$0xff]   ;;  %v4524_v9 = vmax.f32 %v3613_v2, 0.0  ;;  %5238 = vmatpush1.bf16.msra.mxu0 %v7719_v59  ;;  %v7680_v37 = vld [vmem:[%s11398_s3 + $0x110] ss:$8 sps:$4 sm:$0xff]  }
 0x1f0   : > { %v3427_v30 = vpop.f32.mrf.mxu0  ;;  %4118 = vmatmul.mubr.bf16.gmra.mxu0 %v11780_v54  ;;  %5239 = vmatprep.subr.bf16.mxu0 %v7724_v31  ;;  %v7685_v47 = vld [vmem:[%s11398_s3 + $0x104] ss:$8 sps:$4 sm:$0xff]  }
 0x1f1   : > { %v3620_v61 = vpop.f32.mrf.mxu1  ;;  %4311 = vmatmul.mubr.bf16.gmra.mxu1 %v11781_v25  ;;  %v4527_v58 = vmax.f32 %v3615_v28, 0.0  ;;  %v3617_v13 = vadd.f32 %v3616_v39, %v3424_v63  ;;  %v3428_v4 = vadd.f32 %v3427_v30, %v9437_v49  ;;  %4127 = vmatprep.mubr.bf16.mxu0 %v11782_v56  ;;  %v11784_v59 = vld [vmem:[#allocation50_spill] sm:$0xff]  ;;  %v11785_v30 = vld [vmem:[#allocation51_spill] sm:$0xff] }
 0x1f2   : > { %5433 = vmatpush1.bf16.msra.mxu1 %v7674_v55  ;;  %v3429_v44 = vpop.f32.mrf.mxu0  ;;  %4320 = vmatprep.mubr.bf16.mxu1 %v11783_v27 }
 0x1f3   : > { %v3622_v57 = vpop.f32.mrf.mxu1  ;;  %5434 = vmatprep.subr.bf16.mxu1 %v7679_v62  ;;  %v9835_v52 = vpack.c.bf16 %v4527_v58, %v4523_v38  ;;  %v4528_v49 = vmax.f32 %v3617_v13, 0.0  ;;  %v3621_v21 = vadd.f32 %v3620_v61, %v3428_v4  ;;  %v3430_v33 = vadd.f32 %v3429_v44, %v9446_v12  ;;  %5240 = vmatpush1.bf16.msra.mxu0 %v7722_v11  ;;  %v7725_v61 = vld [vmem:[%s11398_s3 + $0x20] ss:$8 sps:$4 sm:$0xff]   ;;  %v7730_v13 = vld [vmem:[%s11398_s3 + $0x14] ss:$8 sps:$4 sm:$0xff]  }
 0x1f4   : > { %v3431_v45 = vpop.f32.mrf.mxu0  ;;  %v7683_v38 = vld [vmem:[%s11398_s3 + $0x100] ss:$8 sps:$4 sm:$0xff]  }
 0x1f5   : > { %v3624_v42 = vpop.f32.mrf.mxu1  ;;  %v9841_v6 = vpack.c.bf16 %v4528_v49, %v4524_v9  ;;  %v3623_v40 = vadd.f32 %v3622_v57, %v3430_v33  ;;  %v3432_v2 = vadd.f32 %v3431_v45, %v9455_v26  ;;  %v7727_v26 = vld [vmem:[%s11398_s3 + $0x24] ss:$8 sps:$4 sm:$0xff]   ;;  %v4531_v54 = vmax.f32 %v3621_v21, 0.0 }
 0x1f6   : > { %5435 = vmatpush1.bf16.msra.mxu1 %v7677_v41  ;;  %v3433_v55 = vpop.f32.mrf.mxu0  ;;  %v11786_v58 = vld [vmem:[#allocation52_spill] sm:$0xff]  ;;  %v11787_v9 = vld [vmem:[#allocation53_spill] sm:$0xff]  ;;  %5241 = vmatprep.subr.bf16.mxu0 %v7727_v26 }
 0x1f7   : > { %v3626_v12 = vpop.f32.mrf.mxu1  ;;  %5436 = vmatprep.subr.bf16.mxu1 %v7682_v0  ;;  %v3625_v39 = vadd.f32 %v3624_v42, %v3432_v2  ;;  %v3434_v62 = vadd.f32 %v3433_v55, %v9466_v14  ;;  %v4532_v4 = vmax.f32 %v3623_v40, 0.0  ;;  %5242 = vmatpush1.bf16.msra.mxu0 %v7725_v61  ;;  %v7686_v42 = vld [vmem:[%s11398_s3 + $0x1f0] ss:$8 sps:$4 sm:$0xff]   ;;  %v7733_v26 = vld [vmem:[%s11398_s3 + $0x4] ss:$8 sps:$4 sm:$0xff]  }
 0x1f8   : > { %v3437_v28 = vpop.f32.mrf.mxu0  ;;  %4128 = vmatmul.mubr.bf16.gmra.mxu0 %v11784_v59  ;;  %5243 = vmatprep.subr.bf16.mxu0 %v7730_v13  ;;  %v11790_v61 = vld [vmem:[#allocation56_spill] sm:$0xff] }
 0x1f9   : > { %v3630_v63 = vpop.f32.mrf.mxu1  ;;  %4321 = vmatmul.mubr.bf16.gmra.mxu1 %v11785_v30  ;;  %v4535_v25 = vmax.f32 %v3625_v39, 0.0  ;;  %v3627_v31 = vadd.f32 %v3626_v12, %v3434_v62  ;;  %v3438_v14 = vadd.f32 %v3437_v28, %v9477_v3  ;;  %4137 = vmatprep.mubr.bf16.mxu0 %v11786_v58  ;;  %v7688_v3 = vld [vmem:[%s11398_s3 + $0x1f4] ss:$8 sps:$4 sm:$0xff]  }
 0x1fa   : > { %5437 = vmatpush1.bf16.msra.mxu1 %v7680_v37  ;;  %v3439_v41 = vpop.f32.mrf.mxu0  ;;  %4330 = vmatprep.mubr.bf16.mxu1 %v11787_v9  ;;  %v11788_v39 = vld [vmem:[#allocation54_spill] sm:$0xff]  ;;  %v11789_v62 = vld [vmem:[#allocation55_spill] sm:$0xff] }
 0x1fb   : > { %v3632_v56 = vpop.f32.mrf.mxu1  ;;  %5438 = vmatprep.subr.bf16.mxu1 %v7685_v47  ;;  %v9871_v44 = vpack.c.bf16 %v4535_v25, %v4531_v54  ;;  %v4536_v57 = vmax.f32 %v3627_v31, 0.0  ;;  %v3631_v27 = vadd.f32 %v3630_v63, %v3438_v14  ;;  %v3440_v0 = vadd.f32 %v3439_v41, %v9486_v46  ;;  %v7691_v46 = vld [vmem:[%s11398_s3 + $0x1e4] ss:$8 sps:$4 sm:$0xff]   ;;  %v7731_v41 = vld [vmem:[%s11398_s3] ss:$8 sps:$4 sm:$0xff]  }
 0x1fc   : > { %v3441_v49 = vpop.f32.mrf.mxu0  ;;  %v11791_v14 = vld [vmem:[#allocation57_spill] sm:$0xff] }
 0x1fd   : > { %v3634_v21 = vpop.f32.mrf.mxu1  ;;  %v9874_v33 = vpack.c.bf16 %v4536_v57, %v4532_v4  ;;  %v3633_v11 = vadd.f32 %v3632_v56, %v3440_v0  ;;  %v3442_v45 = vadd.f32 %v3441_v49, %v9495_v53  ;;  %v7728_v53 = vld [vmem:[%s11398_s3 + $0x10] ss:$8 sps:$4 sm:$0xff]   ;;  %v4539_v28 = vmax.f32 %v3631_v27, 0.0 }
 0x1fe   : > { %5439 = vmatpush1.bf16.msra.mxu1 %v7683_v38  ;;  %v3443_v40 = vpop.f32.mrf.mxu0  ;;  %v7694_v38 = vld [vmem:[%s11398_s3 + $0x1d4] ss:$8 sps:$4 sm:$0xff]   ;;  %5244 = vmatpush1.bf16.msra.mxu0 %v7728_v53  ;;  %v7692_v0 = vld [vmem:[%s11398_s3 + $0x1d0] ss:$8 sps:$4 sm:$0xff]  }
 0x1ff   : > { %v3636_v2 = vpop.f32.mrf.mxu1  ;;  %5440 = vmatprep.subr.bf16.mxu1 %v7688_v3  ;;  %v3635_v37 = vadd.f32 %v3634_v21, %v3442_v45  ;;  %v3444_v55 = vadd.f32 %v3443_v40, %v9506_v10  ;;  %v7689_v10 = vld [vmem:[%s11398_s3 + $0x1e0] ss:$8 sps:$4 sm:$0xff]   ;;  %v4540_v54 = vmax.f32 %v3633_v11, 0.0  ;;  %5245 = vmatprep.subr.bf16.mxu0 %v7733_v26  ;;  %v7697_v21 = vld [vmem:[%s11398_s3 + $0x1c4] ss:$8 sps:$4 sm:$0xff]  }
 0x200   : > { %v3447_v12 = vpop.f32.mrf.mxu0  ;;  %4138 = vmatmul.mubr.bf16.gmra.mxu0 %v11788_v39  ;;  %v11794_v39 = vld [vmem:[#allocation60_spill] sm:$0xff] }
 0x201   : > { %v3640_v47 = vpop.f32.mrf.mxu1  ;;  %4331 = vmatmul.mubr.bf16.gmra.mxu1 %v11789_v62  ;;  %v4543_v63 = vmax.f32 %v3635_v37, 0.0  ;;  %v3637_v59 = vadd.f32 %v3636_v2, %v3444_v55  ;;  %v3448_v30 = vadd.f32 %v3447_v12, %v9517_v23  ;;  %4147 = vmatprep.mubr.bf16.mxu0 %v11790_v61  ;;  %v11792_v2 = vld [vmem:[#allocation58_spill] sm:$0xff] }
 0x202   : > { %5441 = vmatpush2.bf16.msra.mxu1 %v7686_v42  ;;  %v3449_v25 = vpop.f32.mrf.mxu0  ;;  %4340 = vmatprep.mubr.bf16.mxu1 %v11791_v14  ;;  %v7734_v37 = vld [vmem:[%s11398_s3 + $0xf0] ss:$8 sps:$4 sm:$0xff]   ;;  %v7739_v62 = vld [vmem:[%s11398_s3 + $0xe4] ss:$8 sps:$4 sm:$0xff]  }
 0x203   : > { %v3642_v31 = vpop.f32.mrf.mxu1  ;;  %5442 = vmatprep.subr.bf16.mxu1 %v7691_v46  ;;  %v9901_v58 = vpack.c.bf16 %v4543_v63, %v4539_v28  ;;  %v4544_v23 = vmax.f32 %v3637_v59, 0.0  ;;  %v3641_v13 = vadd.f32 %v3640_v47, %v3448_v30  ;;  %v3450_v4 = vadd.f32 %v3449_v25, %v9526_v20  ;;  %5246 = vmatpush1.bf16.msra.mxu0 %v7731_v41  ;;  %v11793_v46 = vld [vmem:[#allocation59_spill] sm:$0xff]  ;;  %v7695_v47 = vld [vmem:[%s11398_s3 + $0x1c0] ss:$8 sps:$4 sm:$0xff]  }
 0x204   : > { %v3451_v56 = vpop.f32.mrf.mxu0  ;;  %v11795_v59 = vld [vmem:[#allocation61_spill] sm:$0xff] }
 0x205   : > { %v3644_v9 = vpop.f32.mrf.mxu1  ;;  %v9907_v3 = vpack.c.bf16 %v4544_v23, %v4540_v54  ;;  %v3643_v57 = vadd.f32 %v3642_v31, %v3450_v4  ;;  %v3452_v27 = vadd.f32 %v3451_v56, %v9535_v19  ;;  %v7736_v19 = vld [vmem:[%s11398_s3 + $0xf4] ss:$8 sps:$4 sm:$0xff]   ;;  %v4547_v55 = vmax.f32 %v3641_v13, 0.0  ;;  %v7698_v13 = vld [vmem:[%s11398_s3 + $0x1b0] ss:$8 sps:$4 sm:$0xff]  }
 0x206   : > { %5443 = vmatpush2.bf16.msra.mxu1 %v7689_v10  ;;  %v3453_v49 = vpop.f32.mrf.mxu0  ;;  %5247 = vmatprep.subr.bf16.mxu0 %v7736_v19 }
 0x207   : > { %v3646_v20 = vpop.f32.mrf.mxu1  ;;  %5444 = vmatprep.subr.bf16.mxu1 %v7694_v38  ;;  %v3645_v11 = vadd.f32 %v3644_v9, %v3452_v27  ;;  %v3454_v45 = vadd.f32 %v3453_v49, %v9546_v16  ;;  %v4548_v26 = vmax.f32 %v3643_v57, 0.0  ;;  %5248 = vmatpush2.bf16.msra.mxu0 %v7734_v37  ;;  %v11797_v49 = vld [vmem:[#allocation63_spill] sm:$0xff]  ;;  %v11800_v37 = vld [vmem:[#allocation64_spill] sm:$0xff] }
 0x208   : > { %v3457_v42 = vpop.f32.mrf.mxu0  ;;  %4148 = vmatmul.mubr.bf16.gmra.mxu0 %v11792_v2  ;;  %5249 = vmatprep.subr.bf16.mxu0 %v7739_v62 }
 0x209   : > { %v3650_v40 = vpop.f32.mrf.mxu1  ;;  %4341 = vmatmul.mubr.bf16.gmra.mxu1 %v11793_v46  ;;  %v4551_v53 = vmax.f32 %v3645_v11, 0.0  ;;  %v3647_v12 = vadd.f32 %v3646_v20, %v3454_v45  ;;  %v3458_v16 = vadd.f32 %v3457_v42, %v9557_v43  ;;  %4157 = vmatprep.mubr.bf16.mxu0 %v11794_v39  ;;  %v7700_v43 = vld [vmem:[%s11398_s3 + $0x1b4] ss:$8 sps:$4 sm:$0xff]   ;;  %v9958_v45 = vstv %s6329_s28  ;;  %v7701_v46 = vld [vmem:[%s11398_s3 + $0x1a0] ss:$8 sps:$4 sm:$0xff]  }
 0x20a   : > { %5445 = vmatpush2.bf16.msra.mxu1 %v7692_v0  ;;  %v3459_v28 = vpop.f32.mrf.mxu0  ;;  %4350 = vmatprep.mubr.bf16.mxu1 %v11795_v59  ;;  %v11796_v0 = vld [vmem:[#allocation62_spill] sm:$0xff]  ;;  %11799 = vst [vmem:[#allocation86_spill] sm:$0xff] %v9958_v45 }
 0x20b   : > { %v3652_v63 = vpop.f32.mrf.mxu1  ;;  %5446 = vmatprep.subr.bf16.mxu1 %v7697_v21  ;;  %v9937_v30 = vpack.c.bf16 %v4551_v53, %v4547_v55  ;;  %v4552_v10 = vmax.f32 %v3647_v12, 0.0  ;;  %v3651_v61 = vadd.f32 %v3650_v40, %v3458_v16  ;;  %v3460_v54 = vadd.f32 %v3459_v28, %v9566_v18  ;;  %v7703_v18 = vld [vmem:[%s11398_s3 + $0x1a4] ss:$8 sps:$4 sm:$0xff]   ;;  %v7740_v28 = vld [vmem:[%s11398_s3 + $0xd0] ss:$8 sps:$4 sm:$0xff]  }
 0x20c   : > { %v3461_v25 = vpop.f32.mrf.mxu0  ;;  %v11798_v20 = vld [vmem:[#allocation70_spill] sm:$0xff]  ;;  %v11801_v16 = vld [vmem:[#allocation65_spill] sm:$0xff] }
 0x20d   : > { %v3654_v31 = vpop.f32.mrf.mxu1  ;;  %v9940_v14 = vpack.c.bf16 %v4552_v10, %v4548_v26  ;;  %v3653_v38 = vadd.f32 %v3652_v63, %v3460_v54  ;;  %v3462_v23 = vadd.f32 %v3461_v25, %v9575_v35  ;;  %v7737_v35 = vld [vmem:[%s11398_s3 + $0xe0] ss:$8 sps:$4 sm:$0xff]   ;;  %v498_v21 = vadd.s32 112, %v11798_v20 }
 0x20e   : > { %5447 = vmatpush2.bf16.msra.mxu1 %v7695_v47  ;;  %v3463_v4 = vpop.f32.mrf.mxu0  ;;  %v499_v11 = vadd.s32 120, %v11798_v20  ;;  %v4555_v19 = vmax.f32 %v3651_v61, 0.0  ;;  %v7706_v47 = vld [vmem:[%s11398_s3 + $0x194] ss:$8 sps:$4 sm:$0xff]   ;;  %5250 = vmatpush2.bf16.msra.mxu0 %v7737_v35 }
 0x20f   : > { %v3656_v41 = vpop.f32.mrf.mxu1  ;;  %5448 = vmatprep.subr.bf16.mxu1 %v7700_v43  ;;  %v3655_v56 = vadd.f32 %v3654_v31, %v3462_v23  ;;  %v3464_v9 = vadd.f32 %v3463_v4, %v9586_v32  ;;  %v7742_v32 = vld [vmem:[%s11398_s3 + $0xd4] ss:$8 sps:$4 sm:$0xff]   ;;  %v4556_v55 = vmax.f32 %v3653_v38, 0.0  ;;  %v531_v43 = vadd.s32 %v9958_v45, %v498_v21  ;;  %v7709_v23 = vld [vmem:[%s11398_s3 + $0x184] ss:$8 sps:$4 sm:$0xff]  }
 0x210   : > { %v3467_v57 = vpop.f32.mrf.mxu0  ;;  %4158 = vmatmul.mubr.bf16.gmra.mxu0 %v11796_v0  ;;  %v532_v10 = vadd.s32 %v9958_v45, %v499_v11  ;;  %5251 = vmatprep.subr.bf16.mxu0 %v7742_v32  ;;  %v11804_v4 = vld [vmem:[#allocation122_spill] sm:$0xff]  ;;  %v11806_v35 = vld [vmem:[#allocation67_spill] sm:$0xff] }
 0x211   : > { %v3660_v27 = vpop.f32.mrf.mxu1  ;;  %4351 = vmatmul.mubr.bf16.gmra.mxu1 %v11797_v49  ;;  %v4559_v42 = vmax.f32 %v3655_v56, 0.0  ;;  %v3657_v40 = vadd.f32 %v3656_v41, %v3464_v9  ;;  %v3468_v2 = vadd.f32 %v3467_v57, %v9597_v1  ;;  %4167 = vmatprep.mubr.bf16.mxu0 %v11800_v37  ;;  %v11805_v9 = vld [vmem:[#allocation66_spill] sm:$0xff]  ;;  %vm563_vm2 = vcmp.lt.s32.totalorder %v531_v43, 700  ;;  %v11807_v11 = vld [vmem:[#allocation123_spill] sm:$0xff] }
 0x212   : > { %5449 = vmatpush2.bf16.msra.mxu1 %v7698_v13  ;;  %v3469_v53 = vpop.f32.mrf.mxu0  ;;  %4360 = vmatprep.mubr.bf16.mxu1 %v11801_v16  ;;  %vm564_vm3 = vcmp.lt.s32.totalorder %v532_v10, 700  ;;  %v977_v57 = vsub.s32 2, %v11798_v20 }
 0x213   : > { %v3662_v12 = vpop.f32.mrf.mxu1  ;;  %5450 = vmatprep.subr.bf16.mxu1 %v7703_v18  ;;  %v9972_v39 = vpack.c.bf16 %v4559_v42, %v4555_v19  ;;  %v4560_v1 = vmax.f32 %v3657_v40, 0.0  ;;  %v3661_v62 = vadd.f32 %v3660_v27, %v3468_v2  ;;  %v3470_v26 = vadd.f32 %v3469_v53, %v9606_v34  ;;  %v7704_v34 = vld [vmem:[%s11398_s3 + $0x190] ss:$8 sps:$4 sm:$0xff]   ;;  %5252 = vmatpush2.bf16.msra.mxu0 %v7740_v28  ;;  %v7743_v27 = vld [vmem:[%s11398_s3 + $0xc0] ss:$8 sps:$4 sm:$0xff]   ;;  %vm10014_vm4 = vmpackc.low %vm564_vm3, %vm563_vm2 }
 0x214   : > { %v3471_v63 = vpop.f32.mrf.mxu0  ;;  %v7707_v19 = vld [vmem:[%s11398_s3 + $0x180] ss:$8 sps:$4 sm:$0xff]   ;;  %v7748_v40 = vld [vmem:[%s11398_s3 + $0xb4] ss:$8 sps:$4 sm:$0xff]   ;;  %v981_v53 = vsub.s32 3, %v11798_v20 }
 0x215   : > { %11802 = vst [vmem:[#allocation89_spill] sm:$0xff] %v9972_v39  ;;  %v3664_v59 = vpop.f32.mrf.mxu1  ;;  %v9980_v61 = vpack.c.bf16 %v4560_v1, %v4556_v55  ;;  %v3663_v54 = vadd.f32 %v3662_v12, %v3470_v26  ;;  %v3472_v25 = vadd.f32 %v3471_v63, %v9615_v51  ;;  %v7745_v51 = vld [vmem:[%s11398_s3 + $0xc4] ss:$8 sps:$4 sm:$0xff]   ;;  %v4563_v0 = vmax.f32 %v3661_v62, 0.0 }
 0x216   : > { %5451 = vmatpush2.bf16.msra.mxu1 %v7701_v46  ;;  %v3473_v31 = vpop.f32.mrf.mxu0  ;;  %v11808_v42 = vld [vmem:[#allocation68_spill] sm:$0xff]  ;;  %v11809_v55 = vld [vmem:[#allocation69_spill] sm:$0xff]  ;;  %v11812_v26 = vmov 0  ;;  %5253 = vmatprep.subr.bf16.mxu0 %v7745_v51 }
 0x217   : > { %11803 = vst [vmem:[#allocation90_spill] sm:$0xff] %v9980_v61  ;;  %v3666_v38 = vpop.f32.mrf.mxu1  ;;  %5452 = vmatprep.subr.bf16.mxu1 %v7706_v47  ;;  %v3665_v13 = vadd.f32 %v3664_v59, %v3472_v25  ;;  %v3474_v41 = vadd.f32 %v3473_v31, %v11804_v4  ;;  %v4564_v2 = vmax.f32 %v3663_v54, 0.0  ;;  %v11811_v1 = vld [vmem:[#allocation124_spill] sm:$0xff]  ;;  %v11813_v26 = vsel %vm10014_vm4, 4294967295, %v11812_v26  ;;  %5254 = vmatpush2.bf16.msra.mxu0 %v7743_v27  ;;  %v11816_v31 = vld [vmem:[#allocation125_spill] sm:$0xff]  ;;  %v11817_v4 = vld [vmem:[#allocation126_spill] sm:$0xff] }
 0x218   : > { %v3477_v18 = vpop.f32.mrf.mxu0  ;;  %4168 = vmatmul.mubr.bf16.gmra.mxu0 %v11805_v9  ;;  %11814 = vst [vmem:[#allocation15_spill] sm:$0xff] %v11813_v26  ;;  %v7956_v59 = vld [vmem:[%s11397_s2] sm:$0xf]  ;;  %5255 = vmatprep.subr.bf16.mxu0 %v7748_v40  ;;  %v11901_v61 = vmov 0 }
 0x219   : > { %v3670_v56 = vpop.f32.mrf.mxu1  ;;  %4361 = vmatmul.mubr.bf16.gmra.mxu1 %v11806_v35  ;;  %v4567_v49 = vmax.f32 %v3665_v13, 0.0  ;;  %v3667_v21 = vadd.f32 %v3666_v38, %v3474_v41  ;;  %v3478_v32 = vadd.f32 %v3477_v18, %v11807_v11  ;;  %4177 = vmatprep.mubr.bf16.mxu0 %v11808_v42  ;;  %v10021_v54 = vrot.slane %v7956_v59, %v977_v57  ;;  %v7751_v18 = vld [vmem:[%s11398_s3 + $0xa4] ss:$8 sps:$4 sm:$0xff]  }
 0x21a   : > { %5453 = vmatpush2.bf16.msra.mxu1 %v7704_v34  ;;  %v3479_v46 = vpop.f32.mrf.mxu0  ;;  %4370 = vmatprep.mubr.bf16.mxu1 %v11809_v55  ;;  %v10033_v51 = vrot.slane %v7956_v59, %v981_v53  ;;  %v11818_v35 = vld [vmem:[#allocation72_spill] sm:$0xff]  ;;  %v11819_v57 = vld [vmem:[#allocation73_spill] sm:$0xff]  ;;  %v11820_v11 = vld [vmem:[#allocation74_spill] sm:$0xff] }
 0x21b   : > { %v3672_v37 = vpop.f32.mrf.mxu1  ;;  %5454 = vmatprep.subr.bf16.mxu1 %v7709_v23  ;;  %v10009_v12 = vpack.c.bf16 %v4567_v49, %v4563_v0  ;;  %v4568_v16 = vmax.f32 %v3667_v21, 0.0  ;;  %v3671_v47 = vadd.f32 %v3670_v56, %v3478_v32  ;;  %v3480_v62 = vadd.f32 %v3479_v46, %v11811_v1  ;;  %v7746_v23 = vld [vmem:[%s11398_s3 + $0xb0] ss:$8 sps:$4 sm:$0xff]  }
 0x21c   : > { %v3481_v28 = vpop.f32.mrf.mxu0  ;;  %v11821_v32 = vld [vmem:[#allocation75_spill] sm:$0xff]  ;;  %5256 = vmatpush2.bf16.msra.mxu0 %v7746_v23 }
 0x21d   : > { %11810 = vst [vmem:[#allocation14_spill] sm:$0xff] %v10009_v12  ;;  %v3674_v63 = vpop.f32.mrf.mxu1  ;;  %v10023_v25 = vpack.c.bf16 %v4568_v16, %v4564_v2  ;;  %v3673_v34 = vadd.f32 %v3672_v37, %v3480_v62  ;;  %v3482_v43 = vadd.f32 %v3481_v28, %v11816_v31  ;;  %v4571_v27 = vmax.f32 %v3671_v47, 0.0  ;;  %v7749_v2 = vld [vmem:[%s11398_s3 + $0xa0] ss:$8 sps:$4 sm:$0xff]   ;;  %5257 = vmatprep.subr.bf16.mxu0 %v7751_v18  ;;  %v7754_v16 = vld [vmem:[%s11398_s3 + $0x94] ss:$8 sps:$4 sm:$0xff]  }
 0x21e   : > { %5455 = vmatpush2.bf16.msra.mxu1 %v7707_v19  ;;  %v3483_v10 = vpop.f32.mrf.mxu0  ;;  %v7752_v31 = vld [vmem:[%s11398_s3 + $0x90] ss:$8 sps:$4 sm:$0xff]  }
 0x21f   : > { %11815 = vst [vmem:[#allocation91_spill] sm:$0xff] %v10023_v25  ;;  %7004 = vmatprep.subr.msk.bf16.mxu1 %vm10014_vm4, %v9775_v8  ;;  %v3676_v38 = vpop.f32.mrf.mxu1  ;;  %v3675_v13 = vadd.f32 %v3674_v63, %v3482_v43  ;;  %v3484_v41 = vadd.f32 %v3483_v10, %v11817_v4  ;;  %v4572_v19 = vmax.f32 %v3673_v34, 0.0  ;;  %v11824_v4 = vld [vmem:[#allocation76_spill] sm:$0xff] }
 0x220   : > { %v3713_v56 = vpop.f32.mrf.mxu0  ;;  %4178 = vmatmul.mubr.bf16.gmra.mxu0 %v11818_v35  ;;  %v11827_v35 = vld [vmem:[#allocation80_spill] sm:$0xff] }
 0x221   : > { %v3906_v9 = vpop.f32.mrf.mxu1  ;;  %4371 = vmatmul.mubr.bf16.gmra.mxu1 %v11819_v57  ;;  %v4575_v0 = vmax.f32 %v3675_v13, 0.0  ;;  %v3677_v49 = vadd.f32 %v3676_v38, %v3484_v41  ;;  %v3714_v21 = vadd.f32 %v3713_v56, %v10021_v54  ;;  %4187 = vmatprep.mubr.bf16.mxu0 %v11820_v11  ;;  %v7757_v38 = vld [vmem:[%s11398_s3 + $0x84] ss:$8 sps:$4 sm:$0xff]  }
 0x222   : > { %4380 = vmatprep.mubr.bf16.mxu1 %v11821_v32  ;;  %v3715_v42 = vpop.f32.mrf.mxu0  ;;  %5258 = vmatpush2.bf16.msra.mxu0 %v7749_v2  ;;  %v11825_v41 = vld [vmem:[#allocation77_spill] sm:$0xff]  ;;  %v11853_v25 = vld [vmem:[#allocation116_spill] sm:$0xff] }
 0x223   : > { %v3908_v40 = vpop.f32.mrf.mxu1  ;;  %v10046_v46 = vpack.c.bf16 %v4575_v0, %v4571_v27  ;;  %v4576_v37 = vmax.f32 %v3677_v49, 0.0  ;;  %v10048_v55 = vadd.f32 %v3906_v9, %v3714_v21  ;;  %v3716_v53 = vadd.f32 %v3715_v42, %v10033_v51  ;;  %5259 = vmatprep.subr.bf16.mxu0 %v7754_v16  ;;  %v11826_v9 = vld [vmem:[#allocation79_spill] sm:$0xff]  ;;  %v7755_v0 = vld [vmem:[%s11398_s3 + $0x80] ss:$8 sps:$4 sm:$0xff]  }
 0x224   : > { %v3717_v47 = vpop.f32.mrf.mxu0 }
 0x225   : > { %11822 = vst [vmem:[#allocation16_spill] sm:$0xff] %v10046_v46  ;;  %v3910_v1 = vpop.f32.mrf.mxu1  ;;  %v10054_v62 = vpack.c.bf16 %v4576_v37, %v4572_v19  ;;  %v10056_v28 = vadd.f32 %v3908_v40, %v3716_v53  ;;  %v3718_v63 = vadd.f32 %v3717_v47, %v10021_v54 }
 0x226   : > { %v3719_v59 = vpop.f32.mrf.mxu0  ;;  %5260 = vmatpush2.bf16.msra.mxu0 %v7752_v31  ;;  %v11830_v31 = vld [vmem:[#allocation87_spill] sm:$0xff] }
 0x227   : > { %11823 = vst [vmem:[#allocation17_spill] sm:$0xff] %v10054_v62  ;;  %v3912_v34 = vpop.f32.mrf.mxu1  ;;  %v10062_v43 = vadd.f32 %v3910_v1, %v3718_v63  ;;  %v3720_v10 = vadd.f32 %v3719_v59, %v10033_v51  ;;  %5261 = vmatprep.subr.bf16.mxu0 %v7757_v38  ;;  %v11828_v1 = vld [vmem:[#allocation84_spill] sm:$0xff]  ;;  %v11829_v63 = vld [vmem:[#allocation85_spill] sm:$0xff] }
 0x228   : > { %v3723_v23 = vpop.f32.mrf.mxu0  ;;  %4188 = vmatmul.mubr.bf16.gmra.mxu0 %v11824_v4 }
 0x229   : > { %v3916_v13 = vpop.f32.mrf.mxu1  ;;  %4381 = vmatmul.mubr.bf16.gmra.mxu1 %v11825_v41  ;;  %v10070_v18 = vadd.f32 %v3912_v34, %v3720_v10  ;;  %v3724_v56 = vadd.f32 %v3723_v23, %v10021_v54  ;;  %4197 = vmatprep.mubr.bf16.mxu0 %v11826_v9  ;;  %v11831_v10 = vld [vmem:[#allocation88_spill] sm:$0xff] }
 0x22a   : > { %4390 = vmatprep.mubr.bf16.mxu1 %v11827_v35  ;;  %v3725_v57 = vpop.f32.mrf.mxu0  ;;  %5262 = vmatpush2.bf16.msra.mxu0 %v7755_v0 }
 0x22b   : > { %v3918_v27 = vpop.f32.mrf.mxu1  ;;  %v10078_v49 = vadd.f32 %v3916_v13, %v3724_v56  ;;  %v3726_v21 = vadd.f32 %v3725_v57, %v10033_v51 }
 0x22c   : > { %v3727_v11 = vpop.f32.mrf.mxu0 }
 0x22d   : > { %v3920_v32 = vpop.f32.mrf.mxu1  ;;  %v10081_v19 = vadd.f32 %v3918_v27, %v3726_v21  ;;  %v3728_v42 = vadd.f32 %v3727_v11, %v10021_v54 }
 0x22e   : > { %v3729_v40 = vpop.f32.mrf.mxu0 }
 0x22f   : > { %v3922_v2 = vpop.f32.mrf.mxu1  ;;  %v10084_v37 = vadd.f32 %v3920_v32, %v3728_v42  ;;  %v3730_v53 = vadd.f32 %v3729_v40, %v10033_v51  ;;  %v11832_v42 = vld [vmem:[#allocation92_spill] sm:$0xff]  ;;  %v11833_v40 = vld [vmem:[#allocation93_spill] sm:$0xff] }
 0x230   : > { %v3733_v16 = vpop.f32.mrf.mxu0  ;;  %4198 = vmatmul.mubr.bf16.gmra.mxu0 %v11828_v1 }
 0x231   : > { %v3926_v47 = vpop.f32.mrf.mxu1  ;;  %4391 = vmatmul.mubr.bf16.gmra.mxu1 %v11829_v63  ;;  %v10089_v59 = vadd.f32 %v3922_v2, %v3730_v53  ;;  %v3734_v34 = vadd.f32 %v3733_v16, %v10021_v54  ;;  %4207 = vmatprep.mubr.bf16.mxu0 %v11830_v31  ;;  %v11834_v16 = vld [vmem:[#allocation95_spill] sm:$0xff] }
 0x232   : > { %4400 = vmatprep.mubr.bf16.mxu1 %v11831_v10  ;;  %v3735_v38 = vpop.f32.mrf.mxu0 }
 0x233   : > { %v3928_v23 = vpop.f32.mrf.mxu1  ;;  %v10094_v13 = vadd.f32 %v3926_v47, %v3734_v34  ;;  %v3736_v4 = vadd.f32 %v3735_v38, %v10033_v51  ;;  %v11835_v47 = vld [vmem:[#allocation96_spill] sm:$0xff] }
 0x234   : > { %v3737_v41 = vpop.f32.mrf.mxu0 }
 0x235   : > { %v3930_v56 = vpop.f32.mrf.mxu1  ;;  %v10097_v9 = vadd.f32 %v3928_v23, %v3736_v4  ;;  %v3738_v35 = vadd.f32 %v3737_v41, %v10021_v54 }
 0x236   : > { %v3739_v57 = vpop.f32.mrf.mxu0 }
 0x237   : > { %v3932_v27 = vpop.f32.mrf.mxu1  ;;  %v10100_v0 = vadd.f32 %v3930_v56, %v3738_v35  ;;  %v3740_v21 = vadd.f32 %v3739_v57, %v10033_v51 }
 0x238   : > { %v3743_v11 = vpop.f32.mrf.mxu0  ;;  %4208 = vmatmul.mubr.bf16.gmra.mxu0 %v11832_v42 }
 0x239   : > { %v3936_v32 = vpop.f32.mrf.mxu1  ;;  %4401 = vmatmul.mubr.bf16.gmra.mxu1 %v11833_v40  ;;  %v10105_v2 = vadd.f32 %v3932_v27, %v3740_v21  ;;  %v3744_v53 = vadd.f32 %v3743_v11, %v10021_v54  ;;  %4217 = vmatprep.mubr.bf16.mxu0 %v11834_v16  ;;  %v11836_v11 = vld [vmem:[#allocation100_spill] sm:$0xff] }
 0x23a   : > { %4410 = vmatprep.mubr.bf16.mxu1 %v11835_v47  ;;  %v3745_v1 = vpop.f32.mrf.mxu0  ;;  %v11839_v16 = vld [vmem:[#allocation104_spill] sm:$0xff] }
 0x23b   : > { %v3938_v63 = vpop.f32.mrf.mxu1  ;;  %v10110_v34 = vadd.f32 %v3936_v32, %v3744_v53  ;;  %v3746_v31 = vadd.f32 %v3745_v1, %v10033_v51  ;;  %v11837_v32 = vld [vmem:[#allocation101_spill] sm:$0xff]  ;;  %v11838_v53 = vld [vmem:[#allocation103_spill] sm:$0xff] }
 0x23c   : > { %v3747_v10 = vpop.f32.mrf.mxu0 }
 0x23d   : > { %v3940_v38 = vpop.f32.mrf.mxu1  ;;  %v10113_v23 = vadd.f32 %v3938_v63, %v3746_v31  ;;  %v3748_v4 = vadd.f32 %v3747_v10, %v10021_v54 }
 0x23e   : > { %v3749_v41 = vpop.f32.mrf.mxu0 }
 0x23f   : > { %v3942_v56 = vpop.f32.mrf.mxu1  ;;  %v10116_v35 = vadd.f32 %v3940_v38, %v3748_v4  ;;  %v3750_v57 = vadd.f32 %v3749_v41, %v10033_v51 }
 0x240   : > { %v3753_v27 = vpop.f32.mrf.mxu0  ;;  %4218 = vmatmul.mubr.bf16.gmra.mxu0 %v11836_v11 }
 0x241   : > { %v3946_v21 = vpop.f32.mrf.mxu1  ;;  %4411 = vmatmul.mubr.bf16.gmra.mxu1 %v11837_v32  ;;  %v10121_v42 = vadd.f32 %v3942_v56, %v3750_v57  ;;  %v3754_v40 = vadd.f32 %v3753_v27, %v10021_v54  ;;  %4227 = vmatprep.mubr.bf16.mxu0 %v11838_v53  ;;  %v11844_v53 = vld [vmem:[#allocation108_spill] sm:$0xff] }
 0x242   : > { %4420 = vmatprep.mubr.bf16.mxu1 %v11839_v16  ;;  %v3755_v47 = vpop.f32.mrf.mxu0  ;;  %v11846_v16 = vld [vmem:[#allocation111_spill] sm:$0xff] }
 0x243   : > { %v3948_v1 = vpop.f32.mrf.mxu1  ;;  %v10126_v63 = vadd.f32 %v3946_v21, %v3754_v40  ;;  %v3756_v31 = vadd.f32 %v3755_v47, %v10033_v51  ;;  %v11845_v21 = vld [vmem:[#allocation109_spill] sm:$0xff]  ;;  %v11847_v47 = vld [vmem:[#allocation112_spill] sm:$0xff] }
 0x244   : > { %v3757_v10 = vpop.f32.mrf.mxu0 }
 0x245   : > { %11840 = vst [vmem:[#allocation94_spill] sm:$0xff] %v10126_v63  ;;  %v3950_v38 = vpop.f32.mrf.mxu1  ;;  %v10129_v4 = vadd.f32 %v3948_v1, %v3756_v31  ;;  %v3758_v41 = vadd.f32 %v3757_v10, %v10021_v54  ;;  %v11930_v63 = vmov 0 }
 0x246   : > { %v10132_v56 = vpop.f32.mrf.mxu0 }
 0x247   : > { %11841 = vst [vmem:[#allocation97_spill] sm:$0xff] %v10129_v4  ;;  %v10134_v57 = vpop.f32.mrf.mxu1  ;;  %v10136_v27 = vadd.f32 %v3950_v38, %v3758_v41  ;;  %v485_v38 = vadd.s32 8, %v11798_v20 }
 0x248   : > { %11842 = vst [vmem:[#allocation98_spill] sm:$0xff] %v10134_v57  ;;  %v3763_v11 = vpop.f32.mrf.mxu0  ;;  %4228 = vmatmul.mubr.bf16.gmra.mxu0 %v11844_v53  ;;  %v11882_v57 = vmov 0 }
 0x249   : > { %11843 = vst [vmem:[#allocation18_spill] sm:$0xff] %v10136_v27  ;;  %v3956_v32 = vpop.f32.mrf.mxu1  ;;  %4421 = vmatmul.mubr.bf16.gmra.mxu1 %v11845_v21  ;;  %v3764_v40 = vadd.f32 %v3763_v11, %v10021_v54  ;;  %4237 = vmatprep.mubr.bf16.mxu0 %v11846_v16 }
 0x24a   : > { %4430 = vmatprep.mubr.bf16.mxu1 %v11847_v47  ;;  %v3765_v1 = vpop.f32.mrf.mxu0 }
 0x24b   : > { %v3958_v31 = vpop.f32.mrf.mxu1  ;;  %v10143_v10 = vadd.f32 %v3956_v32, %v3764_v40  ;;  %v3766_v46 = vadd.f32 %v3765_v1, %v10033_v51  ;;  %v517_v32 = vadd.s32 %v9958_v45, %v11798_v20  ;;  %v518_v40 = vadd.s32 %v9958_v45, %v485_v38 }
 0x24c   : > { %v3767_v41 = vpop.f32.mrf.mxu0 }
 0x24d   : > { %11848 = vst [vmem:[#allocation19_spill] sm:$0xff] %v10143_v10  ;;  %v3960_v12 = vpop.f32.mrf.mxu1  ;;  %v10147_v62 = vadd.f32 %v3958_v31, %v3766_v46  ;;  %v3768_v53 = vadd.f32 %v3767_v41, %v10021_v54  ;;  %v11854_v10 = vld [vmem:[#allocation117_spill] sm:$0xff]  ;;  %v11855_v31 = vld [vmem:[#allocation118_spill] sm:$0xff]  ;;  %v11856_v41 = vld [vmem:[#allocation119_spill] sm:$0xff]  ;;  %vm549_vm5 = vcmp.lt.s32.totalorder %v517_v32, 700  ;;  %vm550_vm6 = vcmp.lt.s32.totalorder %v518_v40, 700 }
 0x24e   : > { %v10150_v21 = vpop.f32.mrf.mxu0  ;;  %vm10176_vm7 = vmpackc.low %vm550_vm6, %vm549_vm5 }
 0x24f   : > { %11849 = vst [vmem:[#allocation99_spill] sm:$0xff] %v10147_v62  ;;  %11850 = vst [vmem:[#allocation20_spill] sm:$0xff] %v10150_v21  ;;  %v10152_v11 = vpop.f32.mrf.mxu1  ;;  %v10154_v16 = vadd.f32 %v3960_v12, %v3768_v53  ;;  %v486_v53 = vadd.s32 16, %v11798_v20  ;;  %v11861_v21 = vmov 0 }
 0x250   : > { %11851 = vst [vmem:[#allocation21_spill] sm:$0xff] %v10152_v11  ;;  %v3773_v47 = vpop.f32.mrf.mxu0  ;;  %4238 = vmatmul.mubr.bf16.gmra.mxu0 %v11853_v25  ;;  %v11862_v21 = vsel %vm10176_vm7, 4294967295, %v11861_v21 }
 0x251   : > { %11852 = vst [vmem:[#allocation102_spill] sm:$0xff] %v10154_v16  ;;  %v3966_v1 = vpop.f32.mrf.mxu1  ;;  %4431 = vmatmul.mubr.bf16.gmra.mxu1 %v11854_v10  ;;  %v3774_v46 = vadd.f32 %v3773_v47, %v10021_v54  ;;  %4247 = vmatprep.mubr.bf16.mxu0 %v11855_v31  ;;  %v487_v16 = vadd.s32 24, %v11798_v20  ;;  %11863 = vst [vmem:[#allocation107_spill] sm:$0xff] %v11862_v21 }
 0x252   : > { %4440 = vmatprep.mubr.bf16.mxu1 %v11856_v41  ;;  %v3775_v11 = vpop.f32.mrf.mxu0 }
 0x253   : > { %v3968_v12 = vpop.f32.mrf.mxu1  ;;  %v10166_v62 = vadd.f32 %v3966_v1, %v3774_v46  ;;  %v3776_v38 = vadd.f32 %v3775_v11, %v10033_v51  ;;  %v519_v1 = vadd.s32 %v9958_v45, %v486_v53  ;;  %v520_v11 = vadd.s32 %v9958_v45, %v487_v16 }
 0x254   : > { %v3777_v25 = vpop.f32.mrf.mxu0 }
 0x255   : > { %11857 = vst [vmem:[#allocation105_spill] sm:$0xff] %v10166_v62  ;;  %v3970_v10 = vpop.f32.mrf.mxu1  ;;  %v10169_v39 = vadd.f32 %v3968_v12, %v3776_v38  ;;  %v3778_v47 = vadd.f32 %v3777_v25, %v10021_v54  ;;  %v11865_v12 = vld [vmem:[#allocation120_spill] sm:$0xff]  ;;  %v11866_v38 = vld [vmem:[#allocation121_spill] sm:$0xff]  ;;  %vm551_vm8 = vcmp.lt.s32.totalorder %v519_v1, 700  ;;  %vm552_vm9 = vcmp.lt.s32.totalorder %v520_v11, 700 }
 0x256   : > { %v10172_v31 = vpop.f32.mrf.mxu0  ;;  %vm10202_vm10 = vmpackc.low %vm552_vm9, %vm551_vm8  ;;  %v11872_v1 = vmov 0 }
 0x257   : > { %11858 = vst [vmem:[#allocation106_spill] sm:$0xff] %v10169_v39  ;;  %11859 = vst [vmem:[#allocation22_spill] sm:$0xff] %v10172_v31  ;;  %v10174_v41 = vpop.f32.mrf.mxu1  ;;  %v10182_v32 = vadd.f32 %v3970_v10, %v3778_v47  ;;  %v11867_v39 = vld [vmem:[#allocation78_spill] sm:$0xff]  ;;  %v488_v10 = vadd.s32 32, %v11798_v20  ;;  %v489_v47 = vadd.s32 40, %v11798_v20  ;;  %v11873_v1 = vsel %vm10202_vm10, 4294967295, %v11872_v1 }
 0x258   : > { %11860 = vst [vmem:[#allocation23_spill] sm:$0xff] %v10174_v41  ;;  %v3783_v40 = vpop.f32.mrf.mxu0  ;;  %4248 = vmatmul.mubr.bf16.gmra.mxu0 %v11865_v12  ;;  %11874 = vst [vmem:[#allocation26_spill] sm:$0xff] %v11873_v1 }
 0x259   : > { %11864 = vst [vmem:[#allocation24_spill] sm:$0xff] %v10182_v32  ;;  %v3976_v46 = vpop.f32.mrf.mxu1  ;;  %4441 = vmatmul.mubr.bf16.gmra.mxu1 %v11866_v38  ;;  %v3784_v25 = vadd.f32 %v3783_v40, %v10021_v54  ;;  %6780 = vmatprep.mubr.msk.bf16.mxu0 %vm10176_vm7, %v11867_v39 }
 0x25a   : > { %v3785_v41 = vpop.f32.mrf.mxu0 }
 0x25b   : > { %v3978_v62 = vpop.f32.mrf.mxu1  ;;  %v10190_v53 = vadd.f32 %v3976_v46, %v3784_v25  ;;  %v3786_v16 = vadd.f32 %v3785_v41, %v10033_v51  ;;  %v521_v41 = vadd.s32 %v9958_v45, %v488_v10  ;;  %v522_v46 = vadd.s32 %v9958_v45, %v489_v47 }
 0x25c   : > { %v3787_v12 = vpop.f32.mrf.mxu0  ;;  %v491_v10 = vadd.s32 56, %v11798_v20 }
 0x25d   : > { %11868 = vst [vmem:[#allocation25_spill] sm:$0xff] %v10190_v53  ;;  %v3980_v38 = vpop.f32.mrf.mxu1  ;;  %v10195_v32 = vadd.f32 %v3978_v62, %v3786_v16  ;;  %v3788_v40 = vadd.f32 %v3787_v12, %v10021_v54  ;;  %v11876_v62 = vld [vmem:[#allocation9_spill] sm:$0xff]  ;;  %v11877_v12 = vld [vmem:[#allocation82_spill] sm:$0xff]  ;;  %vm553_vm11 = vcmp.lt.s32.totalorder %v521_v41, 700  ;;  %vm554_vm12 = vcmp.lt.s32.totalorder %v522_v46, 700 }
 0x25e   : > { %v10198_v31 = vpop.f32.mrf.mxu0  ;;  %vm10229_vm13 = vmpackc.low %vm554_vm12, %vm553_vm11 }
 0x25f   : > { %11869 = vst [vmem:[#allocation110_spill] sm:$0xff] %v10195_v32  ;;  %11870 = vst [vmem:[#allocation113_spill] sm:$0xff] %v10198_v31  ;;  %v10200_v39 = vpop.f32.mrf.mxu1  ;;  %v10206_v11 = vadd.f32 %v3980_v38, %v3788_v40  ;;  %v490_v38 = vadd.s32 48, %v11798_v20  ;;  %v11883_v57 = vsel %vm10229_vm13, 4294967295, %v11882_v57 }
 0x260   : > { %11871 = vst [vmem:[#allocation114_spill] sm:$0xff] %v10200_v39  ;;  %v3793_v25 = vpop.f32.mrf.mxu0  ;;  %6783 = vmatmul.mubr.msk.bf16.vlgmr.msra.gmra.mxu0 %vm10176_vm7, %v11876_v62  ;;  %11884 = vst [vmem:[#allocation31_spill] sm:$0xff] %v11883_v57 }
 0x261   : > { %11875 = vst [vmem:[#allocation27_spill] sm:$0xff] %v10206_v11  ;;  %v3986_v53 = vpop.f32.mrf.mxu1  ;;  %v3794_v16 = vadd.f32 %v3793_v25, %v10021_v54  ;;  %6786 = vmatprep.mubr.msk.bf16.mxu0 %vm10202_vm10, %v11877_v12 }
 0x262   : > { %v3795_v39 = vpop.f32.mrf.mxu0 }
 0x263   : > { %v3988_v32 = vpop.f32.mrf.mxu1  ;;  %v10219_v40 = vadd.f32 %v3986_v53, %v3794_v16  ;;  %v3796_v47 = vadd.f32 %v3795_v39, %v10033_v51  ;;  %v523_v53 = vadd.s32 %v9958_v45, %v490_v38  ;;  %v524_v39 = vadd.s32 %v9958_v45, %v491_v10 }
 0x264   : > { %v3797_v11 = vpop.f32.mrf.mxu0  ;;  %v492_v10 = vadd.s32 64, %v11798_v20 }
 0x265   : > { %11878 = vst [vmem:[#allocation115_spill] sm:$0xff] %v10219_v40  ;;  %v3990_v31 = vpop.f32.mrf.mxu1  ;;  %v10222_v62 = vadd.f32 %v3988_v32, %v3796_v47  ;;  %v3798_v25 = vadd.f32 %v3797_v11, %v10021_v54  ;;  %v11886_v32 = vld [vmem:[#allocation81_spill] sm:$0xff]  ;;  %v11887_v47 = vld [vmem:[#allocation11_spill] sm:$0xff]  ;;  %vm555_vm14 = vcmp.lt.s32.totalorder %v523_v53, 700  ;;  %vm556_vm15 = vcmp.lt.s32.totalorder %v524_v39, 700 }
 0x266   : > { %v10225_v27 = vpop.f32.mrf.mxu0  ;;  %vm10256_vm0 = vmpackc.low %vm556_vm15, %vm555_vm14  ;;  %v11892_v53 = vmov 0 }
 0x267   : > { %11879 = vst [vmem:[#allocation28_spill] sm:$0xff] %v10222_v62  ;;  %11880 = vst [vmem:[#allocation29_spill] sm:$0xff] %v10225_v27  ;;  %v10227_v12 = vpop.f32.mrf.mxu1  ;;  %v10235_v41 = vadd.f32 %v3990_v31, %v3798_v25  ;;  %v493_v25 = vadd.s32 72, %v11798_v20  ;;  %v11893_v53 = vsel %vm10256_vm0, 4294967295, %v11892_v53 }
 0x268   : > { %11881 = vst [vmem:[#allocation30_spill] sm:$0xff] %v10227_v12  ;;  %v3803_v46 = vpop.f32.mrf.mxu0  ;;  %6789 = vmatmul.mubr.msk.bf16.gmra.mxu0 %vm10202_vm10, %v11886_v32  ;;  %11894 = vst [vmem:[#allocation37_spill] sm:$0xff] %v11893_v53 }
 0x269   : > { %11885 = vst [vmem:[#allocation32_spill] sm:$0xff] %v10235_v41  ;;  %v3996_v16 = vpop.f32.mrf.mxu1  ;;  %v3804_v11 = vadd.f32 %v3803_v46, %v10021_v54  ;;  %6792 = vmatprep.mubr.msk.bf16.mxu0 %vm10229_vm13, %v11887_v47 }
 0x26a   : > { %v3805_v12 = vpop.f32.mrf.mxu0 }
 0x26b   : > { %v3998_v62 = vpop.f32.mrf.mxu1  ;;  %v10244_v38 = vadd.f32 %v3996_v16, %v3804_v11  ;;  %v3806_v31 = vadd.f32 %v3805_v12, %v10033_v51  ;;  %v525_v12 = vadd.s32 %v9958_v45, %v492_v10  ;;  %v526_v16 = vadd.s32 %v9958_v45, %v493_v25 }
 0x26c   : > { %v3807_v41 = vpop.f32.mrf.mxu0  ;;  %v495_v10 = vadd.s32 88, %v11798_v20 }
 0x26d   : > { %11888 = vst [vmem:[#allocation33_spill] sm:$0xff] %v10244_v38  ;;  %v4000_v40 = vpop.f32.mrf.mxu1  ;;  %v10249_v27 = vadd.f32 %v3998_v62, %v3806_v31  ;;  %v3808_v46 = vadd.f32 %v3807_v41, %v10021_v54  ;;  %v11896_v62 = vld [vmem:[#allocation10_spill] sm:$0xff]  ;;  %vm557_vm1 = vcmp.lt.s32.totalorder %v525_v12, 700  ;;  %vm558_vm2 = vcmp.lt.s32.totalorder %v526_v16, 700 }
 0x26e   : > { %v10252_v32 = vpop.f32.mrf.mxu0  ;;  %vm10283_vm3 = vmpackc.low %vm558_vm2, %vm557_vm1 }
 0x26f   : > { %11889 = vst [vmem:[#allocation34_spill] sm:$0xff] %v10249_v27  ;;  %11890 = vst [vmem:[#allocation35_spill] sm:$0xff] %v10252_v32  ;;  %v10254_v4 = vpop.f32.mrf.mxu1  ;;  %v10260_v39 = vadd.f32 %v4000_v40, %v3808_v46  ;;  %v494_v40 = vadd.s32 80, %v11798_v20  ;;  %v11902_v61 = vsel %vm10283_vm3, 4294967295, %v11901_v61 }
 0x270   : > { %11891 = vst [vmem:[#allocation36_spill] sm:$0xff] %v10254_v4  ;;  %v3813_v11 = vpop.f32.mrf.mxu0  ;;  %6795 = vmatmul.mubr.msk.bf16.gmra.mxu0 %vm10229_vm13, %v11896_v62  ;;  %11903 = vst [vmem:[#allocation43_spill] sm:$0xff] %v11902_v61 }
 0x271   : > { %11895 = vst [vmem:[#allocation38_spill] sm:$0xff] %v10260_v39  ;;  %v4006_v38 = vpop.f32.mrf.mxu1  ;;  %v3814_v41 = vadd.f32 %v3813_v11, %v10021_v54  ;;  %6798 = vmatprep.mubr.msk.bf16.mxu0 %vm10256_vm0, %v9706_v29 }
 0x272   : > { %v3815_v31 = vpop.f32.mrf.mxu0 }
 0x273   : > { %v4008_v4 = vpop.f32.mrf.mxu1  ;;  %v10273_v46 = vadd.f32 %v4006_v38, %v3814_v41  ;;  %v3816_v25 = vadd.f32 %v3815_v31, %v10033_v51  ;;  %v527_v38 = vadd.s32 %v9958_v45, %v494_v40  ;;  %v528_v41 = vadd.s32 %v9958_v45, %v495_v10 }
 0x274   : > { %v3817_v39 = vpop.f32.mrf.mxu0  ;;  %v496_v10 = vadd.s32 96, %v11798_v20 }
 0x275   : > { %11897 = vst [vmem:[#allocation39_spill] sm:$0xff] %v10273_v46  ;;  %v4010_v27 = vpop.f32.mrf.mxu1  ;;  %v10276_v32 = vadd.f32 %v4008_v4, %v3816_v25  ;;  %v3818_v11 = vadd.f32 %v3817_v39, %v10021_v54  ;;  %vm559_vm5 = vcmp.lt.s32.totalorder %v527_v38, 700  ;;  %vm560_vm6 = vcmp.lt.s32.totalorder %v528_v41, 700 }
 0x276   : > { %v10279_v62 = vpop.f32.mrf.mxu0  ;;  %vm10310_vm8 = vmpackc.low %vm560_vm6, %vm559_vm5  ;;  %v11909_v38 = vmov 0 }
 0x277   : > { %11898 = vst [vmem:[#allocation40_spill] sm:$0xff] %v10276_v32  ;;  %11899 = vst [vmem:[#allocation41_spill] sm:$0xff] %v10279_v62  ;;  %v10281_v47 = vpop.f32.mrf.mxu1  ;;  %v10289_v12 = vadd.f32 %v4010_v27, %v3818_v11  ;;  %v497_v11 = vadd.s32 104, %v11798_v20  ;;  %v11910_v38 = vsel %vm10310_vm8, 4294967295, %v11909_v38 }
 0x278   : > { %11900 = vst [vmem:[#allocation42_spill] sm:$0xff] %v10281_v47  ;;  %v3823_v16 = vpop.f32.mrf.mxu0  ;;  %6801 = vmatmul.mubr.msk.bf16.gmra.mxu0 %vm10256_vm0, %v9703_v7  ;;  %11911 = vst [vmem:[#allocation49_spill] sm:$0xff] %v11910_v38 }
 0x279   : > { %11904 = vst [vmem:[#allocation44_spill] sm:$0xff] %v10289_v12  ;;  %v4016_v31 = vpop.f32.mrf.mxu1  ;;  %v3824_v4 = vadd.f32 %v3823_v16, %v10021_v54  ;;  %6804 = vmatprep.mubr.msk.bf16.mxu0 %vm10283_vm3, %v9718_v50 }
 0x27a   : > { %v3825_v39 = vpop.f32.mrf.mxu0 }
 0x27b   : > { %v4018_v25 = vpop.f32.mrf.mxu1  ;;  %v10298_v40 = vadd.f32 %v4016_v31, %v3824_v4  ;;  %v3826_v27 = vadd.f32 %v3825_v39, %v10033_v51  ;;  %v529_v31 = vadd.s32 %v9958_v45, %v496_v10  ;;  %v530_v4 = vadd.s32 %v9958_v45, %v497_v11 }
 0x27c   : > { %v3827_v12 = vpop.f32.mrf.mxu0 }
 0x27d   : > { %11905 = vst [vmem:[#allocation45_spill] sm:$0xff] %v10298_v40  ;;  %v4020_v47 = vpop.f32.mrf.mxu1  ;;  %v10303_v32 = vadd.f32 %v4018_v25, %v3826_v27  ;;  %v3828_v16 = vadd.f32 %v3827_v12, %v10021_v54  ;;  %vm561_vm9 = vcmp.lt.s32.totalorder %v529_v31, 700  ;;  %vm562_vm11 = vcmp.lt.s32.totalorder %v530_v4, 700 }
 0x27e   : > { %v10306_v46 = vpop.f32.mrf.mxu0  ;;  %vm10335_vm12 = vmpackc.low %vm562_vm11, %vm561_vm9 }
 0x27f   : > { %11906 = vst [vmem:[#allocation46_spill] sm:$0xff] %v10303_v32  ;;  %11907 = vst [vmem:[#allocation47_spill] sm:$0xff] %v10306_v46  ;;  %v10308_v62 = vpop.f32.mrf.mxu1  ;;  %v10314_v41 = vadd.f32 %v4020_v47, %v3828_v16  ;;  %v11917_v46 = vmov 0 }
 0x280   : > { %11908 = vst [vmem:[#allocation48_spill] sm:$0xff] %v10308_v62  ;;  %v3833_v39 = vpop.f32.mrf.mxu0  ;;  %6807 = vmatmul.mubr.msk.bf16.gmra.mxu0 %vm10283_vm3, %v9715_v36  ;;  %v11918_v46 = vsel %vm10335_vm12, 4294967295, %v11917_v46 }
 0x281   : > { %11912 = vst [vmem:[#allocation50_spill] sm:$0xff] %v10314_v41  ;;  %v4026_v40 = vpop.f32.mrf.mxu1  ;;  %v3834_v12 = vadd.f32 %v3833_v39, %v10021_v54  ;;  %6810 = vmatprep.mubr.msk.bf16.mxu0 %vm10310_vm8, %v9730_v24  ;;  %11919 = vst [vmem:[#allocation55_spill] sm:$0xff] %v11918_v46 }
 0x282   : > { %v3835_v25 = vpop.f32.mrf.mxu0 }
 0x283   : > { %v4028_v27 = vpop.f32.mrf.mxu1  ;;  %v10325_v47 = vadd.f32 %v4026_v40, %v3834_v12  ;;  %v3836_v10 = vadd.f32 %v3835_v25, %v10033_v51 }
 0x284   : > { %v3837_v11 = vpop.f32.mrf.mxu0 }
 0x285   : > { %11913 = vst [vmem:[#allocation51_spill] sm:$0xff] %v10325_v47  ;;  %v4030_v16 = vpop.f32.mrf.mxu1  ;;  %v10328_v41 = vadd.f32 %v4028_v27, %v3836_v10  ;;  %v3838_v62 = vadd.f32 %v3837_v11, %v10021_v54 }
 0x286   : > { %v10331_v32 = vpop.f32.mrf.mxu0 }
 0x287   : > { %11914 = vst [vmem:[#allocation52_spill] sm:$0xff] %v10328_v41  ;;  %11915 = vst [vmem:[#allocation53_spill] sm:$0xff] %v10331_v32  ;;  %v10333_v39 = vpop.f32.mrf.mxu1  ;;  %v10339_v40 = vadd.f32 %v4030_v16, %v3838_v62  ;;  %v500_v62 = vadd.s32 128, %v11798_v20  ;;  %v501_v16 = vadd.s32 136, %v11798_v20 }
 0x288   : > { %11916 = vst [vmem:[#allocation54_spill] sm:$0xff] %v10333_v39  ;;  %v3843_v12 = vpop.f32.mrf.mxu0  ;;  %6813 = vmatmul.mubr.msk.bf16.gmra.mxu0 %vm10310_vm8, %v9727_v5 }
 0x289   : > { %11920 = vst [vmem:[#allocation56_spill] sm:$0xff] %v10339_v40  ;;  %v4036_v25 = vpop.f32.mrf.mxu1  ;;  %v3844_v31 = vadd.f32 %v3843_v12, %v10021_v54  ;;  %6816 = vmatprep.mubr.msk.bf16.mxu0 %vm10335_vm12, %v9742_v22 }
 0x28a   : > { %v3845_v4 = vpop.f32.mrf.mxu0 }
 0x28b   : > { %v4038_v27 = vpop.f32.mrf.mxu1  ;;  %v10348_v10 = vadd.f32 %v4036_v25, %v3844_v31  ;;  %v3846_v11 = vadd.f32 %v3845_v4, %v10033_v51  ;;  %v533_v25 = vadd.s32 %v9958_v45, %v500_v62  ;;  %v534_v31 = vadd.s32 %v9958_v45, %v501_v16 }
 0x28c   : > { %v3847_v40 = vpop.f32.mrf.mxu0  ;;  %v503_v62 = vadd.s32 152, %v11798_v20 }
 0x28d   : > { %11921 = vst [vmem:[#allocation57_spill] sm:$0xff] %v10348_v10  ;;  %v4040_v39 = vpop.f32.mrf.mxu1  ;;  %v10353_v41 = vadd.f32 %v4038_v27, %v3846_v11  ;;  %v3848_v12 = vadd.f32 %v3847_v40, %v10021_v54  ;;  %vm565_vm14 = vcmp.lt.s32.totalorder %v533_v25, 700  ;;  %vm566_vm15 = vcmp.lt.s32.totalorder %v534_v31, 700 }
 0x28e   : > { %v10356_v47 = vpop.f32.mrf.mxu0  ;;  %vm10383_vm1 = vmpackc.low %vm566_vm15, %vm565_vm14 }
 0x28f   : > { %11922 = vst [vmem:[#allocation58_spill] sm:$0xff] %v10353_v41  ;;  %11923 = vst [vmem:[#allocation59_spill] sm:$0xff] %v10356_v47  ;;  %v10358_v32 = vpop.f32.mrf.mxu1  ;;  %v10360_v7 = vadd.f32 %v4040_v39, %v3848_v12  ;;  %v502_v39 = vadd.s32 144, %v11798_v20  ;;  %v11931_v63 = vsel %vm10383_vm1, 4294967295, %v11930_v63 }
 0x290   : > { %11924 = vst [vmem:[#allocation60_spill] sm:$0xff] %v10358_v32  ;;  %v3853_v4 = vpop.f32.mrf.mxu0  ;;  %6819 = vmatmul.mubr.msk.bf16.gmra.mxu0 %vm10335_vm12, %v9739_v60  ;;  %11932 = vst [vmem:[#allocation122_spill] sm:$0xff] %v11931_v63 }
 0x291   : > { %11925 = vst [vmem:[#allocation61_spill] sm:$0xff] %v10360_v7  ;;  %v4046_v10 = vpop.f32.mrf.mxu1  ;;  %v3854_v27 = vadd.f32 %v3853_v4, %v10021_v54  ;;  %6822 = vmatprep.mubr.msk.bf16.mxu0 %vm10014_vm4, %v9775_v8 }
 0x292   : > { %v3855_v40 = vpop.f32.mrf.mxu0 }
 0x293   : > { %v4048_v11 = vpop.f32.mrf.mxu1  ;;  %v10373_v12 = vadd.f32 %v4046_v10, %v3854_v27  ;;  %v3856_v16 = vadd.f32 %v3855_v40, %v10033_v51  ;;  %v535_v10 = vadd.s32 %v9958_v45, %v502_v39  ;;  %v536_v27 = vadd.s32 %v9958_v45, %v503_v62 }
 0x294   : > { %v3857_v7 = vpop.f32.mrf.mxu0  ;;  %v504_v62 = vadd.s32 160, %v11798_v20 }
 0x295   : > { %11926 = vst [vmem:[#allocation62_spill] sm:$0xff] %v10373_v12  ;;  %v4050_v32 = vpop.f32.mrf.mxu1  ;;  %v10376_v41 = vadd.f32 %v4048_v11, %v3856_v16  ;;  %v3858_v4 = vadd.f32 %v3857_v7, %v10021_v54  ;;  %vm567_vm2 = vcmp.lt.s32.totalorder %v535_v10, 700  ;;  %vm568_vm5 = vcmp.lt.s32.totalorder %v536_v27, 700 }
 0x296   : > { %v10379_v47 = vpop.f32.mrf.mxu0  ;;  %vm10410_vm6 = vmpackc.low %vm568_vm5, %vm567_vm2  ;;  %v11938_v10 = vmov 0 }
 0x297   : > { %11927 = vst [vmem:[#allocation63_spill] sm:$0xff] %v10376_v41  ;;  %11928 = vst [vmem:[#allocation64_spill] sm:$0xff] %v10379_v47  ;;  %v10381_v8 = vpop.f32.mrf.mxu1  ;;  %v10389_v25 = vadd.f32 %v4050_v32, %v3858_v4  ;;  %v505_v4 = vadd.s32 168, %v11798_v20  ;;  %v11939_v10 = vsel %vm10410_vm6, 4294967295, %v11938_v10 }
 0x298   : > { %11929 = vst [vmem:[#allocation65_spill] sm:$0xff] %v10381_v8  ;;  %v3863_v31 = vpop.f32.mrf.mxu0  ;;  %6825 = vmatmul.mubr.msk.bf16.gmra.mxu0 %vm10014_vm4, %v9769_v48  ;;  %11940 = vst [vmem:[#allocation124_spill] sm:$0xff] %v11939_v10 }
 0x299   : > { %11933 = vst [vmem:[#allocation66_spill] sm:$0xff] %v10389_v25  ;;  %v4056_v40 = vpop.f32.mrf.mxu1  ;;  %v3864_v7 = vadd.f32 %v3863_v31, %v10021_v54  ;;  %6828 = vmatprep.mubr.msk.bf16.mxu0 %vm10383_vm1, %v9808_v15 }
 0x29a   : > { %v3865_v11 = vpop.f32.mrf.mxu0 }
 0x29b   : > { %v4058_v16 = vpop.f32.mrf.mxu1  ;;  %v10398_v39 = vadd.f32 %v4056_v40, %v3864_v7  ;;  %v3866_v32 = vadd.f32 %v3865_v11, %v10033_v51  ;;  %v537_v40 = vadd.s32 %v9958_v45, %v504_v62  ;;  %v538_v7 = vadd.s32 %v9958_v45, %v505_v4 }
 0x29c   : > { %v3867_v25 = vpop.f32.mrf.mxu0 }
 0x29d   : > { %11934 = vst [vmem:[#allocation67_spill] sm:$0xff] %v10398_v39  ;;  %v4060_v8 = vpop.f32.mrf.mxu1  ;;  %v10403_v41 = vadd.f32 %v4058_v16, %v3866_v32  ;;  %v3868_v31 = vadd.f32 %v3867_v25, %v10021_v54  ;;  %v507_v32 = vadd.s32 184, %v11798_v20  ;;  %vm569_vm9 = vcmp.lt.s32.totalorder %v537_v40, 700 }
 0x29e   : > { %v10406_v12 = vpop.f32.mrf.mxu0  ;;  %vm570_vm11 = vcmp.lt.s32.totalorder %v538_v7, 700 }
 0x29f   : > { %11935 = vst [vmem:[#allocation123_spill] sm:$0xff] %v10403_v41  ;;  %11936 = vst [vmem:[#allocation68_spill] sm:$0xff] %v10406_v12  ;;  %v10408_v47 = vpop.f32.mrf.mxu1  ;;  %v10414_v27 = vadd.f32 %v4060_v8, %v3868_v31  ;;  %v506_v8 = vadd.s32 176, %v11798_v20  ;;  %v11942_v41 = vmov 0 }
 0x2a0   : > { %11937 = vst [vmem:[#allocation69_spill] sm:$0xff] %v10408_v47  ;;  %v4099_v11 = vpop.f32.mrf.mxu0  ;;  %6831 = vmatmul.mubr.msk.bf16.gmra.mxu0 %vm10383_vm1, %v9805_v17  ;;  %vm10429_vm14 = vmpackc.low %vm570_vm11, %vm569_vm9  ;;  %v540_v17 = vadd.s32 %v9958_v45, %v507_v32 }
 0x2a1   : > { %11941 = vst [vmem:[#allocation125_spill] sm:$0xff] %v10414_v27  ;;  %v4292_v39 = vpop.f32.mrf.mxu1  ;;  %v4100_v54 = vadd.f32 %v4099_v11, %v10048_v55  ;;  %6834 = vmatprep.mubr.msk.bf16.mxu0 %vm10410_vm6, %v9841_v6  ;;  %v11943_v41 = vsel %vm10429_vm14, 4294967295, %v11942_v41  ;;  %v539_v12 = vadd.s32 %v9958_v45, %v506_v8 }
 0x2a2   : > { %v4101_v25 = vpop.f32.mrf.mxu0  ;;  %11944 = vst [vmem:[#allocation126_spill] sm:$0xff] %v11943_v41  ;;  %vm572_vm2 = vcmp.lt.s32.totalorder %v540_v17, 700  ;;  %v11947_v17 = vmov 0 }
 0x2a3   : > { %v4294_v16 = vpop.f32.mrf.mxu1  ;;  %v4102_v62 = vadd.f32 %v4101_v25, %v10056_v28  ;;  %v4293_v27 = vadd.f32 %v4292_v39, %v4100_v54  ;;  %vm571_vm15 = vcmp.lt.s32.totalorder %v539_v12, 700 }
 0x2a4   : > { %v4103_v4 = vpop.f32.mrf.mxu0  ;;  %vm10452_vm5 = vmpackc.low %vm572_vm2, %vm571_vm15 }
 0x2a5   : > { %v4296_v31 = vpop.f32.mrf.mxu1  ;;  %v4104_v47 = vadd.f32 %v4103_v4, %v10062_v43  ;;  %v4295_v63 = vadd.f32 %v4294_v16, %v4102_v62  ;;  %v4453_v43 = vmax.f32 %v4293_v27, 0.0  ;;  %v11948_v17 = vsel %vm10452_vm5, 4294967295, %v11947_v17 }
 0x2a6   : > { %v4105_v55 = vpop.f32.mrf.mxu0  ;;  %11949 = vst [vmem:[#allocation74_spill] sm:$0xff] %v11948_v17 }
 0x2a7   : > { %v4298_v11 = vpop.f32.mrf.mxu1  ;;  %v4297_v15 = vadd.f32 %v4296_v31, %v4104_v47  ;;  %v4106_v28 = vadd.f32 %v4105_v55, %v10070_v18  ;;  %v508_v18 = vadd.s32 192, %v11798_v20  ;;  %v509_v47 = vadd.s32 200, %v11798_v20 }
 0x2a8   : > { %v4109_v40 = vpop.f32.mrf.mxu0  ;;  %6837 = vmatmul.mubr.msk.bf16.gmra.mxu0 %vm10410_vm6, %v9835_v52  ;;  %v4454_v32 = vmax.f32 %v4295_v63, 0.0 }
 0x2a9   : > { %v4302_v7 = vpop.f32.mrf.mxu1  ;;  %v4457_v39 = vmax.f32 %v4297_v15, 0.0  ;;  %v4299_v54 = vadd.f32 %v4298_v11, %v4106_v28  ;;  %v4110_v25 = vadd.f32 %v4109_v40, %v10078_v49  ;;  %6840 = vmatprep.mubr.msk.bf16.mxu0 %vm10429_vm14, %v9874_v33  ;;  %v541_v63 = vadd.s32 %v9958_v45, %v508_v18 }
 0x2aa   : > { %v4111_v8 = vpop.f32.mrf.mxu0 }
 0x2ab   : > { %v4304_v16 = vpop.f32.mrf.mxu1  ;;  %v10445_v62 = vpack.c.bf16 %v4457_v39, %v4453_v43  ;;  %v4458_v27 = vmax.f32 %v4299_v54, 0.0  ;;  %v4112_v15 = vadd.f32 %v4111_v8, %v10081_v19  ;;  %v4303_v55 = vadd.f32 %v4302_v7, %v4110_v25 }
 0x2ac   : > { %v4113_v4 = vpop.f32.mrf.mxu0  ;;  %v542_v43 = vadd.s32 %v9958_v45, %v509_v47  ;;  %vm573_vm9 = vcmp.lt.s32.totalorder %v541_v63, 700  ;;  %v510_v47 = vadd.s32 208, %v11798_v20 }
 0x2ad   : > { %11945 = vst [vmem:[#allocation72_spill] sm:$0xff] %v10445_v62  ;;  %v4306_v49 = vpop.f32.mrf.mxu1  ;;  %v10448_v31 = vpack.c.bf16 %v4458_v27, %v4454_v32  ;;  %v4114_v11 = vadd.f32 %v4113_v4, %v10084_v37  ;;  %v4305_v39 = vadd.f32 %v4304_v16, %v4112_v15  ;;  %v4461_v12 = vmax.f32 %v4303_v55, 0.0 }
 0x2ae   : > { %v4115_v28 = vpop.f32.mrf.mxu0  ;;  %vm574_vm11 = vcmp.lt.s32.totalorder %v542_v43, 700 }
 0x2af   : > { %11946 = vst [vmem:[#allocation73_spill] sm:$0xff] %v10448_v31  ;;  %v4308_v40 = vpop.f32.mrf.mxu1  ;;  %v4307_v19 = vadd.f32 %v4306_v49, %v4114_v11  ;;  %v4116_v54 = vadd.f32 %v4115_v28, %v10089_v59  ;;  %6876 = vmatprep.mubr.msk.bf16.mxu1 %vm10176_vm7, %v10448_v31  ;;  %v4462_v32 = vmax.f32 %v4305_v39, 0.0  ;;  %vm10494_vm15 = vmpackc.low %vm574_vm11, %vm573_vm9  ;;  %v543_v39 = vadd.s32 %v9958_v45, %v510_v47 }
 0x2b0   : > { %v4119_v37 = vpop.f32.mrf.mxu0  ;;  %6843 = vmatmul.mubr.msk.bf16.gmra.mxu0 %vm10429_vm14, %v9871_v44  ;;  %6879 = vmatmul.mubr.msk.bf16.vlgmr.msra.gmra.mxu1 %vm10176_vm7, %v10445_v62 }
 0x2b1   : > { %v4312_v7 = vpop.f32.mrf.mxu1  ;;  %v4465_v25 = vmax.f32 %v4307_v19, 0.0  ;;  %v4309_v8 = vadd.f32 %v4308_v40, %v4116_v54  ;;  %v4120_v16 = vadd.f32 %v4119_v37, %v10094_v13  ;;  %7007 = vmatpush1.bf16.msk.msra.mxu1 %vm10014_vm4, %v9769_v48  ;;  %6846 = vmatprep.mubr.msk.bf16.mxu0 %vm10452_vm5, %v9907_v3  ;;  %v511_v13 = vadd.s32 216, %v11798_v20 }
 0x2b2   : > { %7010 = vmatprep.subr.msk.bf16.mxu1 %vm10335_vm12, %v9742_v22  ;;  %v4121_v59 = vpop.f32.mrf.mxu0  ;;  %vm575_vm2 = vcmp.lt.s32.totalorder %v543_v39, 700  ;;  %v514_v39 = vadd.s32 240, %v11798_v20 }
 0x2b3   : > { %v4314_v18 = vpop.f32.mrf.mxu1  ;;  %v10480_v27 = vpack.c.bf16 %v4465_v25, %v4461_v12  ;;  %v4466_v48 = vmax.f32 %v4309_v8, 0.0  ;;  %v4122_v15 = vadd.f32 %v4121_v59, %v10097_v9  ;;  %v4313_v11 = vadd.f32 %v4312_v7, %v4120_v16 }
 0x2b4   : > { %v4123_v4 = vpop.f32.mrf.mxu0  ;;  %v11952_v9 = vmov 0  ;;  %v512_v8 = vadd.s32 224, %v11798_v20 }
 0x2b5   : > { %11950 = vst [vmem:[#allocation75_spill] sm:$0xff] %v10480_v27  ;;  %v4316_v49 = vpop.f32.mrf.mxu1  ;;  %v10483_v55 = vpack.c.bf16 %v4466_v48, %v4462_v32  ;;  %v4124_v22 = vadd.f32 %v4123_v4, %v10100_v0  ;;  %7013 = vmatpush1.bf16.msk.msra.mxu1 %vm10335_vm12, %v9739_v60  ;;  %v11953_v9 = vsel %vm10494_vm15, 4294967295, %v11952_v9  ;;  %v544_v0 = vadd.s32 %v9958_v45, %v511_v13 }
 0x2b6   : > { %7016 = vmatprep.subr.msk.bf16.mxu1 %vm10310_vm8, %v9730_v24  ;;  %v4125_v28 = vpop.f32.mrf.mxu0  ;;  %11954 = vst [vmem:[#allocation77_spill] sm:$0xff] %v11953_v9  ;;  %v4315_v19 = vadd.f32 %v4314_v18, %v4122_v15  ;;  %v4469_v63 = vmax.f32 %v4313_v11, 0.0 }
 0x2b7   : > { %11951 = vst [vmem:[#allocation76_spill] sm:$0xff] %v10483_v55  ;;  %v4318_v40 = vpop.f32.mrf.mxu1  ;;  %v4317_v54 = vadd.f32 %v4316_v49, %v4124_v22  ;;  %v4126_v60 = vadd.f32 %v4125_v28, %v10105_v2  ;;  %6882 = vmatprep.mubr.msk.bf16.mxu1 %vm10202_vm10, %v10483_v55  ;;  %vm576_vm9 = vcmp.lt.s32.totalorder %v544_v0, 700  ;;  %v545_v49 = vadd.s32 %v9958_v45, %v512_v8  ;;  %v11965_v8 = vld [vmem:[#allocation97_spill] sm:$0xff] }
 0x2b8   : > { %v4129_v24 = vpop.f32.mrf.mxu0  ;;  %6849 = vmatmul.mubr.msk.bf16.gmra.mxu0 %vm10452_vm5, %v9901_v58  ;;  %6885 = vmatmul.mubr.msk.bf16.gmra.mxu1 %vm10202_vm10, %v10480_v27  ;;  %v4470_v16 = vmax.f32 %v4315_v19, 0.0  ;;  %vm10536_vm11 = vmpackc.low %vm576_vm9, %vm575_vm2 }
 0x2b9   : > { %v4322_v37 = vpop.f32.mrf.mxu1  ;;  %v4473_v43 = vmax.f32 %v4317_v54, 0.0  ;;  %v4319_v7 = vadd.f32 %v4318_v40, %v4126_v60  ;;  %v4130_v12 = vadd.f32 %v4129_v24, %v10110_v34  ;;  %7019 = vmatpush1.bf16.msk.msra.mxu1 %vm10310_vm8, %v9727_v5  ;;  %6852 = vmatprep.mubr.msk.bf16.mxu0 %vm10494_vm15, %v9940_v14  ;;  %v513_v34 = vadd.s32 232, %v11798_v20  ;;  %v11960_v60 = vld [vmem:[#allocation94_spill] sm:$0xff] }
 0x2ba   : > { %7022 = vmatprep.subr.msk.bf16.mxu1 %vm10283_vm3, %v9718_v50  ;;  %v4131_v2 = vpop.f32.mrf.mxu0  ;;  %vm577_vm2 = vcmp.lt.s32.totalorder %v545_v49, 700 }
 0x2bb   : > { %v4324_v25 = vpop.f32.mrf.mxu1  ;;  %v10522_v59 = vpack.c.bf16 %v4473_v43, %v4469_v63  ;;  %v4474_v5 = vmax.f32 %v4319_v7, 0.0  ;;  %v4132_v18 = vadd.f32 %v4131_v2, %v10113_v23  ;;  %v4323_v48 = vadd.f32 %v4322_v37, %v4130_v12  ;;  %v11962_v37 = vld [vmem:[#allocation90_spill] sm:$0xff]  ;;  %v11963_v63 = vld [vmem:[#allocation11_spill] sm:$0xff] }
 0x2bc   : > { %v4133_v47 = vpop.f32.mrf.mxu0  ;;  %v11957_v23 = vmov 0 }
 0x2bd   : > { %11955 = vst [vmem:[#allocation79_spill] sm:$0xff] %v10522_v59  ;;  %v4326_v13 = vpop.f32.mrf.mxu1  ;;  %v10525_v32 = vpack.c.bf16 %v4474_v5, %v4470_v16  ;;  %v4134_v50 = vadd.f32 %v4133_v47, %v10116_v35  ;;  %7025 = vmatpush1.bf16.msk.msra.mxu1 %vm10283_vm3, %v9715_v36  ;;  %v11958_v23 = vsel %vm10536_vm11, 4294967295, %v11957_v23  ;;  %v546_v35 = vadd.s32 %v9958_v45, %v513_v34 }
 0x2be   : > { %7028 = vmatprep.subr.msk.bf16.mxu1 %vm10256_vm0, %v9706_v29  ;;  %v4135_v15 = vpop.f32.mrf.mxu0  ;;  %11959 = vst [vmem:[#allocation84_spill] sm:$0xff] %v11958_v23  ;;  %v4325_v11 = vadd.f32 %v4324_v25, %v4132_v18  ;;  %v3760_v29 = vadd.f32 %v10132_v56, %v10033_v51  ;;  %v4477_v0 = vmax.f32 %v4323_v48, 0.0  ;;  %v11961_v56 = vld [vmem:[#allocation83_spill] sm:$0xff]  ;;  %v547_v18 = vadd.s32 %v9958_v45, %v514_v39  ;;  %v4899_v23 = vld [vmem:[%s11399_s4] sm:$0x3] }
 0x2bf   : > { %11956 = vst [vmem:[#allocation80_spill] sm:$0xff] %v10525_v32  ;;  %v4328_v4 = vpop.f32.mrf.mxu1  ;;  %v4327_v22 = vadd.f32 %v4326_v13, %v4134_v50  ;;  %v4136_v36 = vadd.f32 %v4135_v15, %v10121_v42  ;;  %6888 = vmatprep.mubr.msk.bf16.mxu1 %vm10229_vm13, %v10525_v32  ;;  %v515_v42 = vadd.s32 248, %v11798_v20  ;;  %vm578_vm9 = vcmp.lt.s32.totalorder %v546_v35, 700  ;;  %v11966_v13 = vld [vmem:[#allocation98_spill] sm:$0xff] }
 0x2c0   : > { %v4139_v28 = vpop.f32.mrf.mxu0  ;;  %6855 = vmatmul.mubr.msk.bf16.gmra.mxu0 %vm10494_vm15, %v9937_v30  ;;  %6891 = vmatmul.mubr.msk.bf16.gmra.mxu1 %vm10229_vm13, %v10522_v59  ;;  %v4478_v12 = vmax.f32 %v4325_v11, 0.0  ;;  %v3953_v48 = vadd.f32 %v11966_v13, %v3760_v29  ;;  %v11970_v11 = vld [vmem:[#allocation82_spill] sm:$0xff]  ;;  %vm10583_vm1 = vmpackc.low %vm578_vm9, %vm577_vm2  ;;  %v11971_v39 = vmov 0  ;;  %vm579_vm2 = vcmp.lt.s32.totalorder %v547_v18, 700 }
 0x2c1   : > { %v4332_v40 = vpop.f32.mrf.mxu1  ;;  %v4481_v19 = vmax.f32 %v4327_v22, 0.0  ;;  %v4329_v54 = vadd.f32 %v4328_v4, %v4136_v36  ;;  %v4140_v24 = vadd.f32 %v4139_v28, %v11960_v60  ;;  %7031 = vmatpush1.bf16.msk.msra.mxu1 %vm10256_vm0, %v11961_v56  ;;  %6858 = vmatprep.mubr.msk.bf16.mxu0 %vm10536_vm11, %v11962_v37  ;;  %v548_v47 = vadd.s32 %v9958_v45, %v515_v42  ;;  %v11968_v4 = vld [vmem:[#allocation18_spill] sm:$0xff]  ;;  %v11975_v56 = vld [vmem:[#allocation89_spill] sm:$0xff] }
 0x2c2   : > { %7034 = vmatprep.subr.msk.bf16.mxu1 %vm10229_vm13, %v11963_v63  ;;  %v4141_v43 = vpop.f32.mrf.mxu0  ;;  %v11969_v36 = vld [vmem:[#allocation10_spill] sm:$0xff]  ;;  %v11972_v39 = vsel %vm10583_vm1, 4294967295, %v11971_v39 }
 0x2c3   : > { %v4334_v7 = vpop.f32.mrf.mxu1  ;;  %v10566_v2 = vpack.c.bf16 %v4481_v19, %v4477_v0  ;;  %v4482_v25 = vmax.f32 %v4329_v54, 0.0  ;;  %v4142_v34 = vadd.f32 %v4141_v43, %v11965_v8  ;;  %v4333_v15 = vadd.f32 %v4332_v40, %v4140_v24  ;;  %11973 = vst [vmem:[#allocation88_spill] sm:$0xff] %v11972_v39  ;;  %v11974_v19 = vld [vmem:[#allocation20_spill] sm:$0xff]  ;;  %v11976_v43 = vld [vmem:[#allocation19_spill] sm:$0xff]  ;;  %v11979_v8 = vld [vmem:[#allocation78_spill] sm:$0xff] }
 0x2c4   : > { %v4143_v16 = vpop.f32.mrf.mxu0  ;;  %v3770_v54 = vadd.f32 %v11974_v19, %v10033_v51  ;;  %vm580_vm9 = vcmp.lt.s32.totalorder %v548_v47, 700 }
 0x2c5   : > { %11964 = vst [vmem:[#allocation85_spill] sm:$0xff] %v10566_v2  ;;  %v4336_v5 = vpop.f32.mrf.mxu1  ;;  %v10572_v50 = vpack.c.bf16 %v4482_v25, %v4478_v12  ;;  %v4144_v22 = vadd.f32 %v4143_v16, %v11968_v4  ;;  %7037 = vmatpush1.bf16.msk.msra.mxu1 %vm10229_vm13, %v11969_v36  ;;  %v4335_v29 = vadd.f32 %v4334_v7, %v4142_v34  ;;  %v4485_v49 = vmax.f32 %v4333_v15, 0.0  ;;  %v11977_v12 = vld [vmem:[#allocation81_spill] sm:$0xff]  ;;  %v11978_v25 = vld [vmem:[#allocation91_spill] sm:$0xff]  ;;  %vm10612_vm13 = vmpackc.low %vm580_vm9, %vm579_vm2 }
 0x2c6   : > { %7040 = vmatprep.subr.msk.bf16.mxu1 %vm10202_vm10, %v11970_v11  ;;  %v4145_v28 = vpop.f32.mrf.mxu0  ;;  %v11982_v4 = vmov 0  ;;  %v11985_v11 = vld [vmem:[#allocation21_spill] sm:$0xff] }
 0x2c7   : > { %11967 = vst [vmem:[#allocation87_spill] sm:$0xff] %v10572_v50  ;;  %v4338_v0 = vpop.f32.mrf.mxu1  ;;  %v4337_v40 = vadd.f32 %v4336_v5, %v4144_v22  ;;  %v4146_v42 = vadd.f32 %v4145_v28, %v3953_v48  ;;  %6894 = vmatprep.mubr.msk.bf16.mxu1 %vm10256_vm0, %v10572_v50  ;;  %v4486_v5 = vmax.f32 %v4335_v29, 0.0  ;;  %v11981_v48 = vld [vmem:[#allocation99_spill] sm:$0xff]  ;;  %v11983_v4 = vsel %vm10612_vm13, 4294967295, %v11982_v4  ;;  %v11988_v29 = vld [vmem:[#allocation9_spill] sm:$0xff] }
 0x2c8   : > { %v4149_v60 = vpop.f32.mrf.mxu0  ;;  %6861 = vmatmul.mubr.msk.bf16.gmra.mxu0 %vm10536_vm11, %v11975_v56  ;;  %6897 = vmatmul.mubr.msk.bf16.gmra.mxu1 %vm10256_vm0, %v10566_v2  ;;  %11984 = vst [vmem:[#allocation93_spill] sm:$0xff] %v11983_v4  ;;  %v3963_v28 = vadd.f32 %v11985_v11, %v3770_v54  ;;  %v11990_v54 = vld [vmem:[#allocation22_spill] sm:$0xff] }
 0x2c9   : > { %v4342_v24 = vpop.f32.mrf.mxu1  ;;  %v4489_v35 = vmax.f32 %v4337_v40, 0.0  ;;  %v4339_v63 = vadd.f32 %v4338_v0, %v4146_v42  ;;  %v4150_v7 = vadd.f32 %v4149_v60, %v11976_v43  ;;  %7043 = vmatpush1.bf16.msk.msra.mxu1 %vm10202_vm10, %v11977_v12  ;;  %6864 = vmatprep.mubr.msk.bf16.mxu0 %vm10583_vm1, %v11978_v25  ;;  %v11987_v42 = vld [vmem:[#allocation102_spill] sm:$0xff]  ;;  %v11989_v60 = vld [vmem:[#allocation17_spill] sm:$0xff] }
 0x2ca   : > { %7046 = vmatprep.subr.msk.bf16.mxu1 %vm10176_vm7, %v11979_v8  ;;  %v4151_v34 = vpop.f32.mrf.mxu0  ;;  %v11991_v8 = vld [vmem:[#allocation14_spill] sm:$0xff] }
 0x2cb   : > { %v4344_v16 = vpop.f32.mrf.mxu1  ;;  %v10608_v47 = vpack.c.bf16 %v4489_v35, %v4485_v49  ;;  %v4490_v13 = vmax.f32 %v4339_v63, 0.0  ;;  %v4152_v15 = vadd.f32 %v4151_v34, %v11981_v48  ;;  %v4343_v40 = vadd.f32 %v4342_v24, %v4150_v7 }
 0x2cc   : > { %v4153_v22 = vpop.f32.mrf.mxu0  ;;  %v3780_v24 = vadd.f32 %v11990_v54, %v10033_v51 }
 0x2cd   : > { %11980 = vst [vmem:[#allocation92_spill] sm:$0xff] %v10608_v47  ;;  %v4346_v36 = vpop.f32.mrf.mxu1  ;;  %v10617_v0 = vpack.c.bf16 %v4490_v13, %v4486_v5  ;;  %v4154_v19 = vadd.f32 %v4153_v22, %v11987_v42  ;;  %7049 = vmatpush1.bf16.msk.msra.mxu1 %vm10176_vm7, %v11988_v29  ;;  %v4345_v35 = vadd.f32 %v4344_v16, %v4152_v15  ;;  %v4493_v34 = vmax.f32 %v4343_v40, 0.0  ;;  %v11992_v13 = vld [vmem:[#allocation105_spill] sm:$0xff]  ;;  %v11993_v15 = vld [vmem:[#allocation16_spill] sm:$0xff]  ;;  %v11995_v42 = vld [vmem:[#allocation106_spill] sm:$0xff] }
 0x2ce   : > { %7052 = vmatprep.subr.msk.bf16.mxu1 %vm10612_vm13, %v11989_v60  ;;  %v4155_v18 = vpop.f32.mrf.mxu0 }
 0x2cf   : > { %11986 = vst [vmem:[#allocation95_spill] sm:$0xff] %v10617_v0  ;;  %v4348_v49 = vpop.f32.mrf.mxu1  ;;  %v4347_v63 = vadd.f32 %v4346_v36, %v4154_v19  ;;  %v4156_v43 = vadd.f32 %v4155_v18, %v3963_v28  ;;  %6900 = vmatprep.mubr.msk.bf16.mxu1 %vm10283_vm3, %v10617_v0  ;;  %v4494_v11 = vmax.f32 %v4345_v35, 0.0 }
 0x2d0   : > { %v4159_v7 = vpop.f32.mrf.mxu0  ;;  %6867 = vmatmul.mubr.msk.bf16.gmra.mxu0 %vm10583_vm1, %v11991_v8  ;;  %6903 = vmatmul.mubr.msk.bf16.gmra.mxu1 %vm10283_vm3, %v10608_v47 }
 0x2d1   : > { %v4352_v12 = vpop.f32.mrf.mxu1  ;;  %v4497_v16 = vmax.f32 %v4347_v63, 0.0  ;;  %v4349_v5 = vadd.f32 %v4348_v49, %v4156_v43  ;;  %v4160_v48 = vadd.f32 %v4159_v7, %v11992_v13  ;;  %7055 = vmatpush2.bf16.msk.msra.mxu1 %vm10612_vm13, %v11993_v15  ;;  %6870 = vmatprep.mubr.msk.bf16.mxu0 %vm10612_vm13, %v11989_v60  ;;  %v11996_v49 = vld [vmem:[#allocation23_spill] sm:$0xff]  ;;  %v11998_v60 = vld [vmem:[#allocation24_spill] sm:$0xff] }
 0x2d2   : > { %7058 = vmatprep.subr.msk.bf16.mxu1 %vm10583_vm1, %v11978_v25  ;;  %v4161_v22 = vpop.f32.mrf.mxu0  ;;  %v3973_v63 = vadd.f32 %v11996_v49, %v3780_v24  ;;  %v11999_v24 = vld [vmem:[#allocation113_spill] sm:$0xff] }
 0x2d3   : > { %v4354_v36 = vpop.f32.mrf.mxu1  ;;  %v10647_v28 = vpack.c.bf16 %v4497_v16, %v4493_v34  ;;  %v4498_v40 = vmax.f32 %v4349_v5, 0.0  ;;  %v4162_v19 = vadd.f32 %v4161_v22, %v11995_v42  ;;  %v4353_v54 = vadd.f32 %v4352_v12, %v4160_v48 }
 0x2d4   : > { %v4163_v29 = vpop.f32.mrf.mxu0  ;;  %v3790_v12 = vadd.f32 %v11999_v24, %v10033_v51 }
 0x2d5   : > { %11994 = vst [vmem:[#allocation96_spill] sm:$0xff] %v10647_v28  ;;  %v4356_v18 = vpop.f32.mrf.mxu1  ;;  %v10651_v43 = vpack.c.bf16 %v4498_v40, %v4494_v11  ;;  %v4164_v7 = vadd.f32 %v4163_v29, %v11998_v60  ;;  %7061 = vmatpush2.bf16.msk.msra.mxu1 %vm10583_vm1, %v11991_v8  ;;  %v4355_v34 = vadd.f32 %v4354_v36, %v4162_v19  ;;  %v12000_v36 = vld [vmem:[#allocation25_spill] sm:$0xff]  ;;  %v12003_v60 = vld [vmem:[#allocation114_spill] sm:$0xff] }
 0x2d6   : > { %7064 = vmatprep.subr.msk.bf16.mxu1 %vm10536_vm11, %v11962_v37  ;;  %v4165_v25 = vpop.f32.mrf.mxu0  ;;  %v4501_v37 = vmax.f32 %v4353_v54, 0.0 }
 0x2d7   : > { %11997 = vst [vmem:[#allocation100_spill] sm:$0xff] %v10651_v43  ;;  %v4358_v35 = vpop.f32.mrf.mxu1  ;;  %v4357_v16 = vadd.f32 %v4356_v18, %v4164_v7  ;;  %v4166_v5 = vadd.f32 %v4165_v25, %v3973_v63  ;;  %6906 = vmatprep.mubr.msk.bf16.mxu1 %vm10310_vm8, %v10651_v43  ;;  %v12002_v18 = vld [vmem:[#allocation110_spill] sm:$0xff]  ;;  %v3983_v7 = vadd.f32 %v12003_v60, %v3790_v12  ;;  %v12006_v12 = vld [vmem:[#allocation29_spill] sm:$0xff] }
 0x2d8   : > { %v4169_v13 = vpop.f32.mrf.mxu0  ;;  %6873 = vmatmul.mubr.msk.bf16.gmra.mxu0 %vm10612_vm13, %v11993_v15  ;;  %6909 = vmatmul.mubr.msk.bf16.gmra.mxu1 %vm10310_vm8, %v10647_v28  ;;  %v4502_v15 = vmax.f32 %v4355_v34, 0.0 }
 0x2d9   : > { %v4362_v48 = vpop.f32.mrf.mxu1  ;;  %v4505_v8 = vmax.f32 %v4357_v16, 0.0  ;;  %v4359_v22 = vadd.f32 %v4358_v35, %v4166_v5  ;;  %v4170_v11 = vadd.f32 %v4169_v13, %v12000_v36  ;;  %7067 = vmatpush2.bf16.msk.msra.mxu1 %vm10536_vm11, %v11975_v56  ;;  %v12005_v56 = vld [vmem:[#allocation27_spill] sm:$0xff] }
 0x2da   : > { %7070 = vmatprep.subr.msk.bf16.mxu1 %vm10494_vm15, %v9940_v14  ;;  %v4171_v40 = vpop.f32.mrf.mxu0  ;;  %v12007_v36 = vld [vmem:[#allocation115_spill] sm:$0xff] }
 0x2db   : > { %v4364_v42 = vpop.f32.mrf.mxu1  ;;  %v10678_v19 = vpack.c.bf16 %v4505_v8, %v4501_v37  ;;  %v4506_v29 = vmax.f32 %v4359_v22, 0.0  ;;  %v4172_v49 = vadd.f32 %v4171_v40, %v12002_v18  ;;  %v4363_v35 = vadd.f32 %v4362_v48, %v4170_v11 }
 0x2dc   : > { %v4173_v63 = vpop.f32.mrf.mxu0  ;;  %v3800_v48 = vadd.f32 %v12006_v12, %v10033_v51  ;;  %v12013_v12 = vld [vmem:[#allocation35_spill] sm:$0xff] }
 0x2dd   : > { %12001 = vst [vmem:[#allocation101_spill] sm:$0xff] %v10678_v19  ;;  %v4366_v54 = vpop.f32.mrf.mxu1  ;;  %v10682_v25 = vpack.c.bf16 %v4506_v29, %v4502_v15  ;;  %v4174_v16 = vadd.f32 %v4173_v63, %v12005_v56  ;;  %7073 = vmatpush2.bf16.msk.msra.mxu1 %vm10494_vm15, %v9937_v30  ;;  %v4365_v5 = vadd.f32 %v4364_v42, %v4172_v49  ;;  %v4509_v30 = vmax.f32 %v4363_v35, 0.0  ;;  %v12009_v49 = vld [vmem:[#allocation28_spill] sm:$0xff] }
 0x2de   : > { %7076 = vmatprep.subr.msk.bf16.mxu1 %vm10452_vm5, %v9907_v3  ;;  %v4175_v14 = vpop.f32.mrf.mxu0 }
 0x2df   : > { %12004 = vst [vmem:[#allocation103_spill] sm:$0xff] %v10682_v25  ;;  %v4368_v34 = vpop.f32.mrf.mxu1  ;;  %v4367_v24 = vadd.f32 %v4366_v54, %v4174_v16  ;;  %v4176_v13 = vadd.f32 %v4175_v14, %v3983_v7  ;;  %6912 = vmatprep.mubr.msk.bf16.mxu1 %vm10335_vm12, %v10682_v25  ;;  %v4510_v15 = vmax.f32 %v4365_v5, 0.0  ;;  %v12010_v7 = vld [vmem:[#allocation30_spill] sm:$0xff] }
 0x2e0   : > { %v4179_v37 = vpop.f32.mrf.mxu0  ;;  %6915 = vmatmul.mubr.msk.bf16.gmra.mxu1 %vm10335_vm12, %v10678_v19  ;;  %v3993_v35 = vadd.f32 %v12010_v7, %v3800_v48  ;;  %v3810_v48 = vadd.f32 %v12013_v12, %v10033_v51 }
 0x2e1   : > { %v4372_v8 = vpop.f32.mrf.mxu1  ;;  %v4513_v3 = vmax.f32 %v4367_v24, 0.0  ;;  %v4369_v22 = vadd.f32 %v4368_v34, %v4176_v13  ;;  %v4180_v11 = vadd.f32 %v4179_v37, %v12007_v36  ;;  %7079 = vmatpush2.bf16.msk.msra.mxu1 %vm10452_vm5, %v9901_v58  ;;  %v12012_v58 = vld [vmem:[#allocation32_spill] sm:$0xff]  ;;  %v12015_v36 = vld [vmem:[#allocation13_spill] sm:$0xff] }
 0x2e2   : > { %7082 = vmatprep.subr.msk.bf16.mxu1 %vm10429_vm14, %v9874_v33  ;;  %v4181_v40 = vpop.f32.mrf.mxu0 }
 0x2e3   : > { %v4374_v42 = vpop.f32.mrf.mxu1  ;;  %v10706_v29 = vpack.c.bf16 %v4513_v3, %v4509_v30  ;;  %v4514_v18 = vmax.f32 %v4369_v22, 0.0  ;;  %v4182_v63 = vadd.f32 %v4181_v40, %v12009_v49  ;;  %v4373_v16 = vadd.f32 %v4372_v8, %v4180_v11  ;;  %v12014_v3 = vld [vmem:[#allocation33_spill] sm:$0xff]  ;;  %v12016_v11 = vld [vmem:[#allocation122_spill] sm:$0xff] }
 0x2e4   : > { %v4183_v54 = vpop.f32.mrf.mxu0  ;;  %vm12017_vm2 = vnez %v12016_v11 }
 0x2e5   : > { %12008 = vst [vmem:[#allocation104_spill] sm:$0xff] %v10706_v29  ;;  %v4376_v60 = vpop.f32.mrf.mxu1  ;;  %v10710_v56 = vpack.c.bf16 %v4514_v18, %v4510_v15  ;;  %v4184_v14 = vadd.f32 %v4183_v54, %v12012_v58  ;;  %7085 = vmatpush2.bf16.msk.msra.mxu1 %vm10429_vm14, %v9871_v44  ;;  %v4375_v5 = vadd.f32 %v4374_v42, %v4182_v63  ;;  %v4517_v44 = vmax.f32 %v4373_v16, 0.0  ;;  %v12019_v63 = vld [vmem:[#allocation34_spill] sm:$0xff] }
 0x2e6   : > { %7088 = vmatprep.subr.msk.bf16.mxu1 %vm10410_vm6, %v9841_v6  ;;  %v4185_v33 = vpop.f32.mrf.mxu0 }
 0x2e7   : > { %12011 = vst [vmem:[#allocation108_spill] sm:$0xff] %v10710_v56  ;;  %v4378_v34 = vpop.f32.mrf.mxu1  ;;  %v4377_v24 = vadd.f32 %v4376_v60, %v4184_v14  ;;  %v4186_v13 = vadd.f32 %v4185_v33, %v3993_v35  ;;  %6918 = vmatprep.mubr.msk.bf16.mxu1 %vm10014_vm4, %v10710_v56  ;;  %v4518_v15 = vmax.f32 %v4375_v5, 0.0  ;;  %v12020_v35 = vld [vmem:[#allocation36_spill] sm:$0xff] }
 0x2e8   : > { %v4189_v37 = vpop.f32.mrf.mxu0  ;;  %6921 = vmatmul.mubr.msk.bf16.gmra.mxu1 %vm10014_vm4, %v10706_v29  ;;  %v4003_v16 = vadd.f32 %v12020_v35, %v3810_v48  ;;  %v12024_v48 = vld [vmem:[#allocation41_spill] sm:$0xff] }
 0x2e9   : > { %v4382_v8 = vpop.f32.mrf.mxu1  ;;  %v4521_v6 = vmax.f32 %v4377_v24, 0.0  ;;  %v4379_v30 = vadd.f32 %v4378_v34, %v4186_v13  ;;  %v4190_v22 = vadd.f32 %v4189_v37, %v12014_v3  ;;  %7091 = vmatpush2.bf16.msk.msra.mxu1 %vm10410_vm6, %v9835_v52  ;;  %v12022_v52 = vld [vmem:[#allocation38_spill] sm:$0xff]  ;;  %v12023_v34 = vld [vmem:[#allocation12_spill] sm:$0xff] }
 0x2ea   : > { %7094 = vmatprep.subr.msk.bf16.mxu1 %vm12017_vm2, %v12015_v36  ;;  %v4191_v40 = vpop.f32.mrf.mxu0  ;;  %v12025_v36 = vld [vmem:[#allocation39_spill] sm:$0xff] }
 0x2eb   : > { %v4384_v42 = vpop.f32.mrf.mxu1  ;;  %v10734_v18 = vpack.c.bf16 %v4521_v6, %v4517_v44  ;;  %v4522_v49 = vmax.f32 %v4379_v30, 0.0  ;;  %v4192_v54 = vadd.f32 %v4191_v40, %v12019_v63  ;;  %v4383_v14 = vadd.f32 %v4382_v8, %v4190_v22 }
 0x2ec   : > { %v4193_v60 = vpop.f32.mrf.mxu0  ;;  %v3820_v44 = vadd.f32 %v12024_v48, %v10033_v51 }
 0x2ed   : > { %12018 = vst [vmem:[#allocation109_spill] sm:$0xff] %v10734_v18  ;;  %v4386_v7 = vpop.f32.mrf.mxu1  ;;  %v10738_v58 = vpack.c.bf16 %v4522_v49, %v4518_v15  ;;  %v4194_v33 = vadd.f32 %v4193_v60, %v12022_v52  ;;  %7097 = vmatpush2.bf16.msk.msra.mxu1 %vm12017_vm2, %v12023_v34  ;;  %v4385_v13 = vadd.f32 %v4384_v42, %v4192_v54  ;;  %v4525_v30 = vmax.f32 %v4383_v14, 0.0  ;;  %v12027_v60 = vld [vmem:[#allocation40_spill] sm:$0xff]  ;;  %v12028_v52 = vld [vmem:[#allocation42_spill] sm:$0xff] }
 0x2ee   : > { %v4195_v24 = vpop.f32.mrf.mxu0  ;;  %v12030_v14 = vld [vmem:[#allocation44_spill] sm:$0xff] }
 0x2ef   : > { %12021 = vst [vmem:[#allocation111_spill] sm:$0xff] %v10738_v58  ;;  %v4388_v5 = vpop.f32.mrf.mxu1  ;;  %v4387_v12 = vadd.f32 %v4386_v7, %v4194_v33  ;;  %v4196_v37 = vadd.f32 %v4195_v24, %v4003_v16  ;;  %6924 = vmatprep.mubr.msk.bf16.mxu1 %vm12017_vm2, %v10738_v58  ;;  %v4526_v49 = vmax.f32 %v4385_v13, 0.0  ;;  %v4013_v33 = vadd.f32 %v12028_v52, %v3820_v44  ;;  %v12031_v13 = vld [vmem:[#allocation47_spill] sm:$0xff] }
 0x2f0   : > { %v4199_v6 = vpop.f32.mrf.mxu0  ;;  %6927 = vmatmul.mubr.msk.bf16.gmra.mxu1 %vm12017_vm2, %v10734_v18 }
 0x2f1   : > { %v4392_v8 = vpop.f32.mrf.mxu1  ;;  %v4529_v3 = vmax.f32 %v4387_v12, 0.0  ;;  %v4389_v22 = vadd.f32 %v4388_v5, %v4196_v37  ;;  %v4200_v40 = vadd.f32 %v4199_v6, %v12025_v36 }
 0x2f2   : > { %v4201_v42 = vpop.f32.mrf.mxu0 }
 0x2f3   : > { %v4394_v15 = vpop.f32.mrf.mxu1  ;;  %v10753_v63 = vpack.c.bf16 %v4529_v3, %v4525_v30  ;;  %v4530_v54 = vmax.f32 %v4389_v22, 0.0  ;;  %v4202_v7 = vadd.f32 %v4201_v42, %v12027_v60  ;;  %v4393_v24 = vadd.f32 %v4392_v8, %v4200_v40  ;;  %v12032_v42 = vld [vmem:[#allocation45_spill] sm:$0xff] }
 0x2f4   : > { %v4203_v35 = vpop.f32.mrf.mxu0  ;;  %v3830_v30 = vadd.f32 %v12031_v13, %v10033_v51 }
 0x2f5   : > { %12026 = vst [vmem:[#allocation112_spill] sm:$0xff] %v10753_v63  ;;  %v4396_v16 = vpop.f32.mrf.mxu1  ;;  %v10757_v34 = vpack.c.bf16 %v4530_v54, %v4526_v49  ;;  %v4204_v12 = vadd.f32 %v4203_v35, %v12030_v14  ;;  %v4395_v48 = vadd.f32 %v4394_v15, %v4202_v7  ;;  %v4533_v44 = vmax.f32 %v4393_v24, 0.0  ;;  %v12037_v24 = vld [vmem:[#allocation50_spill] sm:$0xff] }
 0x2f6   : > { %v4205_v5 = vpop.f32.mrf.mxu0 }
 0x2f7   : > { %12029 = vst [vmem:[#allocation116_spill] sm:$0xff] %v10757_v34  ;;  %v4398_v37 = vpop.f32.mrf.mxu1  ;;  %v4397_v6 = vadd.f32 %v4396_v16, %v4204_v12  ;;  %v4206_v36 = vadd.f32 %v4205_v5, %v4013_v33  ;;  %6930 = vmatprep.mubr.msk.bf16.mxu1 %vm10410_vm6, %v10757_v34  ;;  %v4534_v60 = vmax.f32 %v4395_v48, 0.0  ;;  %v12034_v16 = vld [vmem:[#allocation46_spill] sm:$0xff]  ;;  %v12035_v12 = vld [vmem:[#allocation48_spill] sm:$0xff]  ;;  %v12038_v48 = vld [vmem:[#allocation53_spill] sm:$0xff] }
 0x2f8   : > { %v4209_v3 = vpop.f32.mrf.mxu0  ;;  %6933 = vmatmul.mubr.msk.bf16.gmra.mxu1 %vm10410_vm6, %v10753_v63  ;;  %v4023_v5 = vadd.f32 %v12035_v12, %v3830_v30 }
 0x2f9   : > { %v4402_v22 = vpop.f32.mrf.mxu1  ;;  %v4537_v8 = vmax.f32 %v4397_v6, 0.0  ;;  %v4399_v40 = vadd.f32 %v4398_v37, %v4206_v36  ;;  %v4210_v15 = vadd.f32 %v4209_v3, %v12032_v42 }
 0x2fa   : > { %v4211_v49 = vpop.f32.mrf.mxu0 }
 0x2fb   : > { %v4404_v54 = vpop.f32.mrf.mxu1  ;;  %v10769_v7 = vpack.c.bf16 %v4537_v8, %v4533_v44  ;;  %v4538_v35 = vmax.f32 %v4399_v40, 0.0  ;;  %v4212_v52 = vadd.f32 %v4211_v49, %v12034_v16  ;;  %v4403_v45 = vadd.f32 %v4402_v22, %v4210_v15  ;;  %v12039_v49 = vld [vmem:[#allocation51_spill] sm:$0xff] }
 0x2fc   : > { %v4213_v33 = vpop.f32.mrf.mxu0  ;;  %v3840_v44 = vadd.f32 %v12038_v48, %v10033_v51 }
 0x2fd   : > { %12033 = vst [vmem:[#allocation117_spill] sm:$0xff] %v10769_v7  ;;  %v4406_v14 = vpop.f32.mrf.mxu1  ;;  %v10773_v13 = vpack.c.bf16 %v4538_v35, %v4534_v60  ;;  %v4214_v6 = vadd.f32 %v4213_v33, %v12037_v24  ;;  %v4405_v3 = vadd.f32 %v4404_v54, %v4212_v52  ;;  %v4541_v30 = vmax.f32 %v4403_v45, 0.0  ;;  %v12044_v45 = vld [vmem:[#allocation56_spill] sm:$0xff] }
 0x2fe   : > { %v4215_v37 = vpop.f32.mrf.mxu0 }
 0x2ff   : > { %12036 = vst [vmem:[#allocation118_spill] sm:$0xff] %v10773_v13  ;;  %v4408_v36 = vpop.f32.mrf.mxu1  ;;  %v4407_v42 = vadd.f32 %v4406_v14, %v4214_v6  ;;  %v4216_v18 = vadd.f32 %v4215_v37, %v4023_v5  ;;  %6936 = vmatprep.mubr.msk.bf16.mxu1 %vm10429_vm14, %v10773_v13  ;;  %v4542_v16 = vmax.f32 %v4405_v3, 0.0  ;;  %v12041_v14 = vld [vmem:[#allocation52_spill] sm:$0xff]  ;;  %v12042_v6 = vld [vmem:[#allocation54_spill] sm:$0xff]  ;;  %v12045_v3 = vld [vmem:[#allocation59_spill] sm:$0xff] }
 0x300   : > { %v4219_v8 = vpop.f32.mrf.mxu0  ;;  %6939 = vmatmul.mubr.msk.bf16.gmra.mxu1 %vm10429_vm14, %v10769_v7  ;;  %v4033_v37 = vadd.f32 %v12042_v6, %v3840_v44 }
 0x301   : > { %v4412_v40 = vpop.f32.mrf.mxu1  ;;  %v4545_v22 = vmax.f32 %v4407_v42, 0.0  ;;  %v4409_v15 = vadd.f32 %v4408_v36, %v4216_v18  ;;  %v4220_v54 = vadd.f32 %v4219_v8, %v12039_v49 }
 0x302   : > { %v4221_v60 = vpop.f32.mrf.mxu0 }
 0x303   : > { %v4414_v35 = vpop.f32.mrf.mxu1  ;;  %v10785_v52 = vpack.c.bf16 %v4545_v22, %v4541_v30  ;;  %v4546_v33 = vmax.f32 %v4409_v15, 0.0  ;;  %v4222_v12 = vadd.f32 %v4221_v60, %v12041_v14  ;;  %v4413_v11 = vadd.f32 %v4412_v40, %v4220_v54  ;;  %v12046_v60 = vld [vmem:[#allocation57_spill] sm:$0xff] }
 0x304   : > { %v4223_v5 = vpop.f32.mrf.mxu0  ;;  %v3850_v30 = vadd.f32 %v12045_v3, %v10033_v51 }
 0x305   : > { %12040 = vst [vmem:[#allocation119_spill] sm:$0xff] %v10785_v52  ;;  %v4416_v24 = vpop.f32.mrf.mxu1  ;;  %v10789_v48 = vpack.c.bf16 %v4546_v33, %v4542_v16  ;;  %v4224_v42 = vadd.f32 %v4223_v5, %v12044_v45  ;;  %v4415_v8 = vadd.f32 %v4414_v35, %v4222_v12  ;;  %v4549_v44 = vmax.f32 %v4413_v11, 0.0  ;;  %v12051_v11 = vld [vmem:[#allocation61_spill] sm:$0xff] }
 0x306   : > { %v4225_v18 = vpop.f32.mrf.mxu0 }
 0x307   : > { %12043 = vst [vmem:[#allocation120_spill] sm:$0xff] %v10789_v48  ;;  %v4418_v36 = vpop.f32.mrf.mxu1  ;;  %v4417_v49 = vadd.f32 %v4416_v24, %v4224_v42  ;;  %v4226_v58 = vadd.f32 %v4225_v18, %v4033_v37  ;;  %6942 = vmatprep.mubr.msk.bf16.mxu1 %vm10452_vm5, %v10789_v48  ;;  %v4550_v14 = vmax.f32 %v4415_v8, 0.0  ;;  %v12048_v24 = vld [vmem:[#allocation58_spill] sm:$0xff]  ;;  %v12049_v42 = vld [vmem:[#allocation60_spill] sm:$0xff] }
 0x308   : > { %v4229_v22 = vpop.f32.mrf.mxu0  ;;  %6945 = vmatmul.mubr.msk.bf16.gmra.mxu1 %vm10452_vm5, %v10785_v52  ;;  %v4043_v18 = vadd.f32 %v12049_v42, %v3850_v30  ;;  %v12052_v8 = vld [vmem:[#allocation64_spill] sm:$0xff] }
 0x309   : > { %v4422_v15 = vpop.f32.mrf.mxu1  ;;  %v4553_v40 = vmax.f32 %v4417_v49, 0.0  ;;  %v4419_v54 = vadd.f32 %v4418_v36, %v4226_v58  ;;  %v4230_v35 = vadd.f32 %v4229_v22, %v12046_v60 }
 0x30a   : > { %v4231_v16 = vpop.f32.mrf.mxu0 }
 0x30b   : > { %v4424_v33 = vpop.f32.mrf.mxu1  ;;  %v10801_v12 = vpack.c.bf16 %v4553_v40, %v4549_v44  ;;  %v4554_v5 = vmax.f32 %v4419_v54, 0.0  ;;  %v4232_v6 = vadd.f32 %v4231_v16, %v12048_v24  ;;  %v4423_v63 = vadd.f32 %v4422_v15, %v4230_v35  ;;  %v12053_v16 = vld [vmem:[#allocation62_spill] sm:$0xff] }
 0x30c   : > { %v4233_v37 = vpop.f32.mrf.mxu0  ;;  %v3860_v44 = vadd.f32 %v12052_v8, %v10033_v51 }
 0x30d   : > { %12047 = vst [vmem:[#allocation121_spill] sm:$0xff] %v10801_v12  ;;  %v4426_v45 = vpop.f32.mrf.mxu1  ;;  %v10805_v3 = vpack.c.bf16 %v4554_v5, %v4550_v14  ;;  %v4234_v49 = vadd.f32 %v4233_v37, %v12051_v11  ;;  %v4425_v22 = vadd.f32 %v4424_v33, %v4232_v6  ;;  %v4557_v30 = vmax.f32 %v4423_v63, 0.0  ;;  %v12058_v63 = vld [vmem:[#allocation66_spill] sm:$0xff] }
 0x30e   : > { %v4235_v58 = vpop.f32.mrf.mxu0 }
 0x30f   : > { %12050 = vst [vmem:[#allocation94_spill] sm:$0xff] %v10805_v3  ;;  %v4428_v36 = vpop.f32.mrf.mxu1  ;;  %v4427_v60 = vadd.f32 %v4426_v45, %v4234_v49  ;;  %v4236_v10 = vadd.f32 %v4235_v58, %v4043_v18  ;;  %6948 = vmatprep.mubr.msk.bf16.mxu1 %vm10494_vm15, %v10805_v3  ;;  %v4558_v24 = vmax.f32 %v4425_v22, 0.0  ;;  %v12055_v45 = vld [vmem:[#allocation63_spill] sm:$0xff]  ;;  %v12056_v49 = vld [vmem:[#allocation65_spill] sm:$0xff]  ;;  %v12059_v22 = vld [vmem:[#allocation68_spill] sm:$0xff] }
 0x310   : > { %v4239_v40 = vpop.f32.mrf.mxu0  ;;  %6951 = vmatmul.mubr.msk.bf16.gmra.mxu1 %vm10494_vm15, %v10801_v12  ;;  %v4053_v58 = vadd.f32 %v12056_v49, %v3860_v44 }
 0x311   : > { %v4432_v54 = vpop.f32.mrf.mxu1  ;;  %v4561_v15 = vmax.f32 %v4427_v60, 0.0  ;;  %v4429_v35 = vadd.f32 %v4428_v36, %v4236_v10  ;;  %v4240_v33 = vadd.f32 %v4239_v40, %v12053_v16 }
 0x312   : > { %v4241_v14 = vpop.f32.mrf.mxu0 }
 0x313   : > { %v4434_v5 = vpop.f32.mrf.mxu1  ;;  %v10817_v6 = vpack.c.bf16 %v4561_v15, %v4557_v30  ;;  %v4562_v37 = vmax.f32 %v4429_v35, 0.0  ;;  %v4242_v42 = vadd.f32 %v4241_v14, %v12055_v45  ;;  %v4433_v34 = vadd.f32 %v4432_v54, %v4240_v33  ;;  %v12060_v14 = vld [vmem:[#allocation67_spill] sm:$0xff] }
 0x314   : > { %v4243_v18 = vpop.f32.mrf.mxu0  ;;  %v3870_v30 = vadd.f32 %v12059_v22, %v10033_v51 }
 0x315   : > { %12054 = vst [vmem:[#allocation83_spill] sm:$0xff] %v10817_v6  ;;  %v4436_v11 = vpop.f32.mrf.mxu1  ;;  %v10821_v8 = vpack.c.bf16 %v4562_v37, %v4558_v24  ;;  %v4244_v60 = vadd.f32 %v4243_v18, %v12058_v63  ;;  %v4435_v40 = vadd.f32 %v4434_v5, %v4242_v42  ;;  %v4565_v44 = vmax.f32 %v4433_v34, 0.0  ;;  %v12063_v63 = vld [vmem:[#allocation69_spill] sm:$0xff] }
 0x316   : > { %v4245_v10 = vpop.f32.mrf.mxu0  ;;  %v12065_v34 = vld [vmem:[#allocation125_spill] sm:$0xff] }
 0x317   : > { %12057 = vst [vmem:[#allocation90_spill] sm:$0xff] %v10821_v8  ;;  %v4438_v36 = vpop.f32.mrf.mxu1  ;;  %v4437_v16 = vadd.f32 %v4436_v11, %v4244_v60  ;;  %v4246_v7 = vadd.f32 %v4245_v10, %v4053_v58  ;;  %6954 = vmatprep.mubr.msk.bf16.mxu1 %vm10536_vm11, %v10821_v8  ;;  %v4566_v45 = vmax.f32 %v4435_v40, 0.0  ;;  %v12062_v11 = vld [vmem:[#allocation123_spill] sm:$0xff]  ;;  %v4063_v60 = vadd.f32 %v12063_v63, %v3870_v30 }
 0x318   : > { %v4249_v15 = vpop.f32.mrf.mxu0  ;;  %6957 = vmatmul.mubr.msk.bf16.gmra.mxu1 %vm10536_vm11, %v10817_v6 }
 0x319   : > { %v4442_v35 = vpop.f32.mrf.mxu1  ;;  %v4569_v54 = vmax.f32 %v4437_v16, 0.0  ;;  %v4439_v33 = vadd.f32 %v4438_v36, %v4246_v7  ;;  %v4250_v5 = vadd.f32 %v4249_v15, %v12060_v14 }
 0x31a   : > { %v4251_v24 = vpop.f32.mrf.mxu0 }
 0x31b   : > { %v4444_v37 = vpop.f32.mrf.mxu1  ;;  %v10833_v42 = vpack.c.bf16 %v4569_v54, %v4565_v44  ;;  %v4570_v18 = vmax.f32 %v4439_v33, 0.0  ;;  %v4252_v49 = vadd.f32 %v4251_v24, %v12062_v11  ;;  %v4443_v22 = vadd.f32 %v4442_v35, %v4250_v5 }
 0x31c   : > { %v4253_v51 = vpop.f32.mrf.mxu0 }
 0x31d   : > { %12061 = vst [vmem:[#allocation11_spill] sm:$0xff] %v10833_v42  ;;  %v4446_v58 = vpop.f32.mrf.mxu1  ;;  %v10837_v10 = vpack.c.bf16 %v4570_v18, %v4566_v45  ;;  %v4254_v16 = vadd.f32 %v4253_v51, %v12065_v34  ;;  %v4445_v36 = vadd.f32 %v4444_v37, %v4252_v49  ;;  %v4573_v30 = vmax.f32 %v4443_v22, 0.0 }
 0x31e   : > { %v4255_v7 = vpop.f32.mrf.mxu0 }
 0x31f   : > { %12064 = vst [vmem:[#allocation97_spill] sm:$0xff] %v10837_v10  ;;  %v4447_v15 = vadd.f32 %v4446_v58, %v4254_v16  ;;  %v4256_v14 = vadd.f32 %v4255_v7, %v4063_v60  ;;  %6960 = vmatprep.mubr.msk.bf16.mxu1 %vm10583_vm1, %v10837_v10  ;;  %v4448_v40 = vpop.f32.mrf.mxu1  ;;  %v4574_v5 = vmax.f32 %v4445_v36, 0.0  ;;  %v12069_v10 = vsub.s32 1, %v11798_v20 }
 0x320   : > { %v5265_v44 = vpop.f32.mrf.mxu0  ;;  %6963 = vmatmul.mubr.msk.bf16.gmra.mxu1 %vm10583_vm1, %v10833_v42  ;;  %v12068_v42 = vld [vmem:[#allocation71_spill] sm:$0xff] }
 0x321   : > { %v4577_v54 = vmax.f32 %v4447_v15, 0.0  ;;  %v4449_v33 = vadd.f32 %v4448_v40, %v4256_v14  ;;  %v10906_v39 = vrot.slane %v4899_v23, %v12068_v42 }
 0x322   : > { %v5267_v35 = vpop.f32.mrf.mxu0 }
 0x323   : > { %v10846_v24 = vpack.c.bf16 %v4577_v54, %v4573_v30  ;;  %v4578_v37 = vmax.f32 %v4449_v33, 0.0 }
 0x324   : > { %v5269_v45 = vpop.f32.mrf.mxu0 }
 0x325   : > { %12066 = vst [vmem:[#allocation98_spill] sm:$0xff] %v10846_v24  ;;  %v10848_v18 = vpack.c.bf16 %v4578_v37, %v4574_v5  ;;  %v5270_v55 = vadd.f32 %v5269_v45, %v10906_v39 }
 0x326   : > { %v5271_v11 = vpop.f32.mrf.mxu0 }
 0x327   : > { %12067 = vst [vmem:[#allocation18_spill] sm:$0xff] %v10848_v18  ;;  %6966 = vmatprep.mubr.msk.bf16.mxu1 %vm10612_vm13, %v10848_v18  ;;  %v5266_v18 = vadd.f32 %v5265_v44, %v10906_v39 }
 0x328   : > { %v5275_v49 = vpop.f32.mrf.mxu0  ;;  %6969 = vmatmul.mubr.msk.bf16.gmra.mxu1 %vm10612_vm13, %v10846_v24  ;;  %v10910_v24 = vrot.slane %v4899_v23, %v12069_v10 }
 0x329   : > { %v5276_v44 = vadd.f32 %v5275_v49, %v10906_v39 }
 0x32a   : > { %v5277_v51 = vpop.f32.mrf.mxu0  ;;  %v5268_v21 = vadd.f32 %v5267_v35, %v10910_v24  ;;  %v5272_v57 = vadd.f32 %v5271_v11, %v10910_v24 }
 0x32c   : > { %v5279_v58 = vpop.f32.mrf.mxu0 }
 0x32e   : > { %v5281_v63 = vpop.f32.mrf.mxu0 }
 0x330   : > { %v5285_v60 = vpop.f32.mrf.mxu0 }
 0x332   : > { %v10856_v22 = vpop.f32.mrf.mxu0 }
 0x334   : > { %v10858_v34 = vpop.f32.mrf.mxu0 }
 0x336   : > { %v10860_v16 = vpop.f32.mrf.mxu0 }
 0x338   : > { %v10862_v7 = vpop.f32.mrf.mxu0 }
 0x33a   : > { %v10864_v36 = vpop.f32.mrf.mxu0 }
 0x33c   : > { %v10866_v15 = vpop.f32.mrf.mxu0 }
 0x33e   : > { %v10868_v14 = vpop.f32.mrf.mxu0 }
 0x340   : > { %v10870_v40 = vpop.f32.mrf.mxu0 }
 0x342   : > { %v10872_v30 = vpop.f32.mrf.mxu0 }
 0x344   : > { %v10874_v54 = vpop.f32.mrf.mxu0 }
 0x346   : > { %v10876_v33 = vpop.f32.mrf.mxu0 }
 0x348   : > { %v10878_v5 = vpop.f32.mrf.mxu0 }
 0x34a   : > { %v10880_v37 = vpop.f32.mrf.mxu0 }
 0x34c   : > { %v10882_v41 = vpop.f32.mrf.mxu0 }
 0x34e   : > { %v10884_v13 = vpop.f32.mrf.mxu0 }
 0x350   : > { %v10886_v52 = vpop.f32.mrf.mxu0 }
 0x352   : > { %v10888_v17 = vpop.f32.mrf.mxu0 }
 0x354   : > { %v10890_v48 = vpop.f32.mrf.mxu0 }
 0x356   : > { %v10892_v12 = vpop.f32.mrf.mxu0 }
 0x358   : > { %v10894_v9 = vpop.f32.mrf.mxu0 }
 0x35a   : > { %v10896_v3 = vpop.f32.mrf.mxu0 }
 0x35c   : > { %v10898_v6 = vpop.f32.mrf.mxu0 }
 0x35e   : > { %v10903_v8 = vpop.f32.mrf.mxu0 }
 0x360   : > { %v10912_v4 = vpop.f32.mrf.mxu0 }
 0x362   : > { %v10916_v27 = vpop.f32.mrf.mxu0 }
 0x364   : > { %v10920_v10 = vpop.f32.mrf.mxu0 }
 0x366   : > { %v10924_v50 = vpop.f32.mrf.mxu0 }
 0x368   : > { %v10928_v49 = vpop.f32.mrf.mxu0 }
 0x370   : > { %v5458_v62 = vpop.f32.mrf.mxu1 }
 0x371   : > { %v5459_v31 = vadd.f32 %v5458_v62, %v5266_v18  ;;  %v5278_v62 = vadd.f32 %v5277_v51, %v10910_v24  ;;  %v5288_v51 = vadd.f32 %v10856_v22, %v10910_v24 }
 0x372   : > { %v5460_v1 = vpop.f32.mrf.mxu1 }
 0x373   : > { %v5461_v59 = vadd.f32 %v5460_v1, %v5268_v21  ;;  %v5280_v1 = vadd.f32 %v5279_v58, %v10906_v39 }
 0x374   : > { %v5462_v42 = vpop.f32.mrf.mxu1 }
 0x375   : > { %v6970_v20 = vmul.f32 -1.442695, %v5461_v59  ;;  %v5463_v23 = vadd.f32 %v5462_v42, %v5270_v55  ;;  %v5282_v42 = vadd.f32 %v5281_v63, %v10910_v24  ;;  %v5290_v63 = vadd.f32 %v10858_v34, %v10906_v39 }
 0x376   : > { %v5464_v32 = vpop.f32.mrf.mxu1  ;;  %v5296_v34 = vadd.f32 %v10862_v7, %v10906_v39 }
 0x377   : > { %7758 = vpow2.f32 %v6970_v20  ;;  %v5465_v2 = vadd.f32 %v5464_v32, %v5272_v57  ;;  %v5286_v57 = vadd.f32 %v5285_v60, %v10906_v39  ;;  %v5292_v60 = vadd.f32 %v10860_v16, %v10910_v24 }
 0x378   : > { %v5468_v35 = vpop.f32.mrf.mxu1 }
 0x379   : > { %v6971_v18 = vmul.f32 -1.442695, %v5465_v2  ;;  %v5469_v53 = vadd.f32 %v5468_v35, %v5276_v44  ;;  %v10935_v35 = vpop.f32.mrf.mxu0 }
 0x37a   : > { %v5470_v21 = vpop.f32.mrf.mxu1 }
 0x37b   : > { %7760 = vpow2.f32 %v6971_v18  ;;  %v5471_v59 = vadd.f32 %v5470_v21, %v5278_v62  ;;  %v10943_v22 = vpop.f32.mrf.mxu0 }
 0x37c   : > { %v5472_v55 = vpop.f32.mrf.mxu1 }
 0x37d   : > { %v6972_v45 = vmul.f32 -1.442695, %v5471_v59  ;;  %v5473_v11 = vadd.f32 %v5472_v55, %v5280_v1 }
 0x37e   : > { %v5474_v20 = vpop.f32.mrf.mxu1 }
 0x37f   : > { %7762 = vpow2.f32 %v6972_v45  ;;  %v5475_v32 = vadd.f32 %v5474_v20, %v5282_v42 }
 0x380   : > { %v5478_v2 = vpop.f32.mrf.mxu1 }
 0x381   : > { %v6973_v44 = vmul.f32 -1.442695, %v5475_v32  ;;  %v10933_v58 = vadd.f32 %v5478_v2, %v5286_v57  ;;  %v5298_v2 = vadd.f32 %v10864_v36, %v10910_v24 }
 0x382   : > { %v5480_v62 = vpop.f32.mrf.mxu1 }
 0x383   : > { %7764 = vpow2.f32 %v6973_v44  ;;  %v5481_v18 = vadd.f32 %v5480_v62, %v5288_v51  ;;  %v10949_v44 = vpop.f32.mrf.mxu0 }
 0x384   : > { %v7759_v21 = vpop.eup %7758  ;;  %v5482_v1 = vpop.f32.mrf.mxu1  ;;  %7766 = vtanh.f32 %v5459_v31 }
 0x385   : > { %v5745_v59 = vadd.f32 1.0, %v7759_v21  ;;  %v6974_v55 = vmul.f32 -1.442695, %v5481_v18  ;;  %v10941_v42 = vadd.f32 %v5482_v1, %v5290_v63  ;;  %v5300_v21 = vadd.f32 %v10866_v15, %v10906_v39 }
 0x386   : > { %v5484_v45 = vpop.f32.mrf.mxu1  ;;  %v5302_v1 = vadd.f32 %v10868_v14, %v10910_v24 }
 0x387   : > { %7768 = vrcp.f32 %v5745_v59  ;;  %v5485_v20 = vadd.f32 %v5484_v45, %v5292_v60  ;;  %v10957_v59 = vpop.f32.mrf.mxu0 }
 0x388   : > { %v7761_v57 = vpop.eup %7760  ;;  %7770 = vpow2.f32 %v6974_v55  ;;  %v5488_v32 = vpop.f32.mrf.mxu1 }
 0x389   : > { %v5746_v16 = vadd.f32 1.0, %v7761_v57  ;;  %v6975_v51 = vmul.f32 -1.442695, %v5485_v20  ;;  %7772 = vtanh.f32 %v5463_v23  ;;  %v10951_v62 = vadd.f32 %v5488_v32, %v5296_v34 }
 0x38a   : > { %v5490_v31 = vpop.f32.mrf.mxu1  ;;  %v5306_v57 = vadd.f32 %v10870_v40, %v10906_v39  ;;  %v5308_v34 = vadd.f32 %v10872_v30, %v10910_v24  ;;  %v5312_v30 = vadd.f32 %v10876_v33, %v10910_v24 }
 0x38b   : > { %7774 = vrcp.f32 %v5746_v16  ;;  %v5491_v63 = vadd.f32 %v5490_v31, %v5298_v2  ;;  %v10965_v2 = vpop.f32.mrf.mxu0  ;;  %v5310_v31 = vadd.f32 %v10874_v54, %v10906_v39 }
 0x38c   : > { %v7763_v18 = vpop.eup %7762  ;;  %7776 = vpow2.f32 %v6975_v51  ;;  %v5492_v7 = vpop.f32.mrf.mxu1 }
 0x38d   : > { %v5747_v36 = vadd.f32 1.0, %v7763_v18  ;;  %v6976_v60 = vmul.f32 -1.442695, %v5491_v63  ;;  %7778 = vtanh.f32 %v5469_v53  ;;  %v10959_v23 = vadd.f32 %v5492_v7, %v5300_v21 }
 0x38e   : > { %v5494_v55 = vpop.f32.mrf.mxu1 }
 0x38f   : > { %7780 = vrcp.f32 %v5747_v36  ;;  %v5495_v45 = vadd.f32 %v5494_v55, %v5302_v1 }
 0x390   : > { %v7765_v20 = vpop.eup %7764  ;;  %7782 = vpow2.f32 %v6976_v60  ;;  %v5498_v15 = vpop.f32.mrf.mxu1 }
 0x391   : > { %v5748_v14 = vadd.f32 1.0, %v7765_v20  ;;  %v6977_v32 = vmul.f32 -1.442695, %v5495_v45  ;;  %7784 = vtanh.f32 %v5473_v11  ;;  %v10967_v53 = vadd.f32 %v5498_v15, %v5306_v57  ;;  %v7767_v51 = vpop.eup %7766  ;;  %v10975_v11 = vpop.f32.mrf.mxu0 }
 0x392   : > { %v5500_v16 = vpop.f32.mrf.mxu1  ;;  %v5316_v45 = vadd.f32 %v10878_v5, %v10906_v39 }
 0x393   : > { %7786 = vrcp.f32 %v5748_v14  ;;  %v5501_v63 = vadd.f32 %v5500_v16, %v5308_v34  ;;  %v5318_v34 = vadd.f32 %v10880_v37, %v10910_v24 }
 0x394   : > { %v7769_v40 = vpop.eup %7768  ;;  %7788 = vpow2.f32 %v6977_v32  ;;  %v5502_v18 = vpop.f32.mrf.mxu1 }
 0x395   : > { %v7771_v21 = vpop.eup %7770  ;;  %v6978_v7 = vmul.f32 -1.442695, %v5501_v63  ;;  %v10973_v1 = vadd.f32 %v5502_v18, %v5310_v31  ;;  %7790 = vtanh.f32 %v10933_v58  ;;  %v10978_v55 = vmul.f32 %v7769_v40, %v7767_v51  ;;  %v10986_v58 = vpop.f32.mrf.mxu0 }
 0x396   : > { %v5749_v36 = vadd.f32 1.0, %v7771_v21  ;;  %v5504_v60 = vpop.f32.mrf.mxu1  ;;  %v7773_v54 = vpop.eup %7772  ;;  %v5320_v63 = vadd.f32 %v10882_v41, %v10906_v39 }
 0x397   : > { %12070 = vst [vmem:[#allocation10_spill] sm:$0xff] %v10978_v55  ;;  %7792 = vpow2.f32 %v6978_v7  ;;  %v5505_v20 = vadd.f32 %v5504_v60, %v5312_v30  ;;  %v5322_v30 = vadd.f32 %v10884_v13, %v10910_v24 }
 0x398   : > { %v7775_v57 = vpop.eup %7774  ;;  %7794 = vrcp.f32 %v5749_v36  ;;  %v5508_v33 = vpop.f32.mrf.mxu1 }
 0x399   : > { %v7777_v15 = vpop.eup %7776  ;;  %v6979_v14 = vmul.f32 -1.442695, %v5505_v20  ;;  %v10984_v32 = vadd.f32 %v5508_v33, %v5316_v45  ;;  %7796 = vtanh.f32 %v10941_v42  ;;  %v10989_v31 = vmul.f32 %v7775_v57, %v7773_v54  ;;  %v10997_v42 = vpop.f32.mrf.mxu0 }
 0x39a   : > { %v5750_v16 = vadd.f32 1.0, %v7777_v15  ;;  %v5510_v51 = vpop.f32.mrf.mxu1  ;;  %v7779_v5 = vpop.eup %7778  ;;  %v5326_v20 = vadd.f32 %v10886_v52, %v10906_v39 }
 0x39b   : > { %12071 = vst [vmem:[#allocation82_spill] sm:$0xff] %v10989_v31  ;;  %7798 = vpow2.f32 %v6979_v14  ;;  %v5511_v40 = vadd.f32 %v5510_v51, %v5318_v34  ;;  %v5328_v34 = vadd.f32 %v10888_v17, %v10910_v24  ;;  %v11010_v51 = vpop.f32.mrf.mxu0 }
 0x39c   : > { %v7781_v18 = vpop.eup %7780  ;;  %7800 = vrcp.f32 %v5750_v16  ;;  %v5512_v37 = vpop.f32.mrf.mxu1 }
 0x39d   : > { %v7783_v21 = vpop.eup %7782  ;;  %v6980_v7 = vmul.f32 -1.442695, %v5511_v40  ;;  %v10995_v36 = vadd.f32 %v5512_v37, %v5320_v63  ;;  %7802 = vtanh.f32 %v10951_v62  ;;  %v11000_v45 = vmul.f32 %v7781_v18, %v7779_v5 }
 0x39e   : > { %v5751_v60 = vadd.f32 1.0, %v7783_v21  ;;  %v5514_v54 = vpop.f32.mrf.mxu1  ;;  %v7785_v41 = vpop.eup %7784  ;;  %v5330_v40 = vadd.f32 %v10890_v48, %v10906_v39 }
 0x39f   : > { %12072 = vst [vmem:[#allocation20_spill] sm:$0xff] %v11000_v45  ;;  %7804 = vpow2.f32 %v6980_v7  ;;  %v5515_v57 = vadd.f32 %v5514_v54, %v5322_v30  ;;  %v5332_v30 = vadd.f32 %v10892_v12, %v10910_v24 }
 0x3a0   : > { %v7787_v33 = vpop.eup %7786  ;;  %7806 = vrcp.f32 %v5751_v60  ;;  %v5518_v13 = vpop.f32.mrf.mxu1 }
 0x3a1   : > { %v7789_v15 = vpop.eup %7788  ;;  %v6981_v14 = vmul.f32 -1.442695, %v5515_v57  ;;  %v11006_v16 = vadd.f32 %v5518_v13, %v5326_v20  ;;  %v11008_v62 = vmul.f32 %v7787_v33, %v7785_v41  ;;  %7808 = vtanh.f32 %v10959_v23  ;;  %v11019_v23 = vpop.f32.mrf.mxu0 }
 0x3a2   : > { %v5752_v5 = vadd.f32 1.0, %v7789_v15  ;;  %v5520_v52 = vpop.f32.mrf.mxu1  ;;  %v7791_v63 = vpop.eup %7790  ;;  %v5336_v57 = vadd.f32 %v10894_v9, %v10906_v39 }
 0x3a3   : > { %7810 = vpow2.f32 %v6981_v14  ;;  %v5521_v18 = vadd.f32 %v5520_v52, %v5328_v34  ;;  %v5338_v34 = vadd.f32 %v10896_v3, %v10910_v24 }
 0x3a4   : > { %v7793_v37 = vpop.eup %7792  ;;  %7812 = vrcp.f32 %v5752_v5  ;;  %v5522_v17 = vpop.f32.mrf.mxu1 }
 0x3a5   : > { %v7795_v21 = vpop.eup %7794  ;;  %v5753_v7 = vadd.f32 1.0, %v7793_v37  ;;  %v6982_v60 = vmul.f32 -1.442695, %v5521_v18  ;;  %v11017_v54 = vadd.f32 %v5522_v17, %v5330_v40  ;;  %7814 = vtanh.f32 %v10967_v53  ;;  %v11030_v53 = vpop.f32.mrf.mxu0 }
 0x3a6   : > { %v5524_v41 = vpop.f32.mrf.mxu1  ;;  %v11022_v20 = vmul.f32 %v7795_v21, %v7791_v63  ;;  %v7797_v48 = vpop.eup %7796  ;;  %v5340_v18 = vadd.f32 %v10898_v6, %v10906_v39 }
 0x3a7   : > { %7816 = vrcp.f32 %v5753_v7  ;;  %v5525_v33 = vadd.f32 %v5524_v41, %v5332_v30  ;;  %v5342_v30 = vadd.f32 %v10903_v8, %v10910_v24 }
 0x3a8   : > { %v7799_v13 = vpop.eup %7798  ;;  %7818 = vpow2.f32 %v6982_v60  ;;  %v5528_v12 = vpop.f32.mrf.mxu1 }
 0x3a9   : > { %v7801_v15 = vpop.eup %7800  ;;  %v5754_v14 = vadd.f32 1.0, %v7799_v13  ;;  %v6983_v5 = vmul.f32 -1.442695, %v5525_v33  ;;  %v11028_v52 = vadd.f32 %v5528_v12, %v5336_v57  ;;  %7820 = vtanh.f32 %v10973_v1  ;;  %v11041_v1 = vpop.f32.mrf.mxu0 }
 0x3aa   : > { %v5530_v63 = vpop.f32.mrf.mxu1  ;;  %v11033_v40 = vmul.f32 %v7801_v15, %v7797_v48  ;;  %v7803_v9 = vpop.eup %7802  ;;  %v5346_v33 = vadd.f32 %v10912_v4, %v10906_v39 }
 0x3ab   : > { %7822 = vrcp.f32 %v5754_v14  ;;  %v5531_v37 = vadd.f32 %v5530_v63, %v5338_v34  ;;  %v5348_v34 = vadd.f32 %v10916_v27, %v10910_v24 }
 0x3ac   : > { %v7805_v17 = vpop.eup %7804  ;;  %7824 = vpow2.f32 %v6983_v5  ;;  %v5532_v3 = vpop.f32.mrf.mxu1 }
 0x3ad   : > { %v7807_v21 = vpop.eup %7806  ;;  %v5755_v7 = vadd.f32 1.0, %v7805_v17  ;;  %v6984_v60 = vmul.f32 -1.442695, %v5531_v37  ;;  %v11039_v41 = vadd.f32 %v5532_v3, %v5340_v18  ;;  %7826 = vtanh.f32 %v10984_v32  ;;  %v11052_v32 = vpop.f32.mrf.mxu0 }
 0x3ae   : > { %v5534_v48 = vpop.f32.mrf.mxu1  ;;  %v11044_v57 = vmul.f32 %v7807_v21, %v7803_v9  ;;  %v7809_v6 = vpop.eup %7808  ;;  %v5350_v37 = vadd.f32 %v10920_v10, %v10906_v39 }
 0x3af   : > { %7828 = vrcp.f32 %v5755_v7  ;;  %v5535_v13 = vadd.f32 %v5534_v48, %v5342_v30  ;;  %v5352_v30 = vadd.f32 %v10924_v50, %v10910_v24  ;;  %v11065_v48 = vpop.f32.mrf.mxu0 }
 0x3b0   : > { %v7811_v12 = vpop.eup %7810  ;;  %7830 = vpow2.f32 %v6984_v60  ;;  %v5538_v8 = vpop.f32.mrf.mxu1 }
 0x3b1   : > { %v7813_v15 = vpop.eup %7812  ;;  %v5756_v14 = vadd.f32 1.0, %v7811_v12  ;;  %v6985_v5 = vmul.f32 -1.442695, %v5535_v13  ;;  %v11050_v63 = vadd.f32 %v5538_v8, %v5346_v33  ;;  %7832 = vtanh.f32 %v10995_v36 }
 0x3b2   : > { %v5540_v9 = vpop.f32.mrf.mxu1  ;;  %v11055_v18 = vmul.f32 %v7813_v15, %v7809_v6  ;;  %v7815_v4 = vpop.eup %7814  ;;  %v5356_v13 = vadd.f32 %v10928_v49, %v10906_v39 }
 0x3b3   : > { %7834 = vrcp.f32 %v5756_v14  ;;  %v5541_v17 = vadd.f32 %v5540_v9, %v5348_v34  ;;  %v5358_v34 = vadd.f32 %v10935_v35, %v10910_v24 }
 0x3b4   : > { %v7817_v3 = vpop.eup %7816  ;;  %7836 = vpow2.f32 %v6985_v5  ;;  %v5542_v27 = vpop.f32.mrf.mxu1 }
 0x3b5   : > { %v7819_v21 = vpop.eup %7818  ;;  %v6986_v7 = vmul.f32 -1.442695, %v5541_v17  ;;  %v11061_v60 = vadd.f32 %v5542_v27, %v5350_v37  ;;  %v11063_v36 = vmul.f32 %v7817_v3, %v7815_v4  ;;  %7838 = vtanh.f32 %v11006_v16  ;;  %v11076_v16 = vpop.f32.mrf.mxu0 }
 0x3b6   : > { %v5757_v6 = vadd.f32 1.0, %v7819_v21  ;;  %v5544_v10 = vpop.f32.mrf.mxu1  ;;  %v7821_v33 = vpop.eup %7820  ;;  %v5360_v17 = vadd.f32 %v10943_v22, %v10906_v39 }
 0x3b7   : > { %7840 = vpow2.f32 %v6986_v7  ;;  %v5545_v12 = vadd.f32 %v5544_v10, %v5352_v30  ;;  %v5362_v30 = vadd.f32 %v10949_v44, %v10910_v24 }
 0x3b8   : > { %v7823_v8 = vpop.eup %7822  ;;  %7842 = vrcp.f32 %v5757_v6  ;;  %v5548_v50 = vpop.f32.mrf.mxu1 }
 0x3b9   : > { %v7825_v15 = vpop.eup %7824  ;;  %v6987_v14 = vmul.f32 -1.442695, %v5545_v12  ;;  %v11072_v5 = vadd.f32 %v5548_v50, %v5356_v13  ;;  %v11074_v9 = vmul.f32 %v7823_v8, %v7821_v33  ;;  %7844 = vtanh.f32 %v11017_v54  ;;  %v11087_v54 = vpop.f32.mrf.mxu0 }
 0x3ba   : > { %v5758_v4 = vadd.f32 1.0, %v7825_v15  ;;  %v5550_v49 = vpop.f32.mrf.mxu1  ;;  %v7827_v37 = vpop.eup %7826  ;;  %v5366_v12 = vadd.f32 %v10957_v59, %v10906_v39 }
 0x3bb   : > { %7846 = vpow2.f32 %v6987_v14  ;;  %v5551_v3 = vadd.f32 %v5550_v49, %v5358_v34  ;;  %v5368_v34 = vadd.f32 %v10965_v2, %v10910_v24 }
 0x3bc   : > { %v7829_v27 = vpop.eup %7828  ;;  %7848 = vrcp.f32 %v5758_v4  ;;  %v5552_v35 = vpop.f32.mrf.mxu1 }
 0x3bd   : > { %v7831_v21 = vpop.eup %7830  ;;  %v6988_v7 = vmul.f32 -1.442695, %v5551_v3  ;;  %v11083_v6 = vadd.f32 %v5552_v35, %v5360_v17  ;;  %v11085_v10 = vmul.f32 %v7829_v27, %v7827_v37  ;;  %7850 = vtanh.f32 %v11028_v52  ;;  %v11098_v52 = vpop.f32.mrf.mxu0 }
 0x3be   : > { %v5759_v33 = vadd.f32 1.0, %v7831_v21  ;;  %v5554_v22 = vpop.f32.mrf.mxu1  ;;  %v7833_v13 = vpop.eup %7832  ;;  %v5370_v3 = vadd.f32 %v10975_v11, %v10906_v39 }
 0x3bf   : > { %7852 = vpow2.f32 %v6988_v7  ;;  %v5555_v8 = vadd.f32 %v5554_v22, %v5362_v30  ;;  %v5372_v30 = vadd.f32 %v10986_v58, %v10910_v24 }
 0x3c0   : > { %v7835_v50 = vpop.eup %7834  ;;  %7854 = vrcp.f32 %v5759_v33  ;;  %v5558_v44 = vpop.f32.mrf.mxu1 }
 0x3c1   : > { %v7837_v15 = vpop.eup %7836  ;;  %v6989_v14 = vmul.f32 -1.442695, %v5555_v8  ;;  %v11094_v4 = vadd.f32 %v5558_v44, %v5366_v12  ;;  %v11096_v49 = vmul.f32 %v7835_v50, %v7833_v13  ;;  %7856 = vtanh.f32 %v11039_v41  ;;  %v11107_v41 = vpop.f32.mrf.mxu0 }
 0x3c2   : > { %v5760_v37 = vadd.f32 1.0, %v7837_v15  ;;  %v5560_v59 = vpop.f32.mrf.mxu1  ;;  %v7839_v17 = vpop.eup %7838  ;;  %v5376_v8 = vadd.f32 %v10997_v42, %v10906_v39 }
 0x3c3   : > { %7858 = vpow2.f32 %v6989_v14  ;;  %v5561_v27 = vadd.f32 %v5560_v59, %v5368_v34  ;;  %v5378_v34 = vadd.f32 %v11010_v51, %v10910_v24 }
 0x3c4   : > { %v7841_v35 = vpop.eup %7840  ;;  %7860 = vrcp.f32 %v5760_v37  ;;  %v5562_v2 = vpop.f32.mrf.mxu1 }
 0x3c5   : > { %v7843_v21 = vpop.eup %7842  ;;  %v5761_v7 = vadd.f32 1.0, %v7841_v35  ;;  %v6990_v33 = vmul.f32 -1.442695, %v5561_v27  ;;  %v11105_v22 = vadd.f32 %v5562_v2, %v5370_v3  ;;  %7862 = vtanh.f32 %v11050_v63  ;;  %v11118_v63 = vpop.f32.mrf.mxu0 }
 0x3c6   : > { %v5564_v13 = vpop.f32.mrf.mxu1  ;;  %v11110_v12 = vmul.f32 %v7843_v21, %v7839_v17  ;;  %v7845_v11 = vpop.eup %7844  ;;  %v5380_v27 = vadd.f32 %v11019_v23, %v10906_v39  ;;  %v5386_v23 = vadd.f32 %v11041_v1, %v10906_v39  ;;  %v11148_v1 = vld [vmem:[%s11400_s5] sm:$0x1] }
 0x3c7   : > { %7864 = vrcp.f32 %v5761_v7  ;;  %v5565_v50 = vadd.f32 %v5564_v13, %v5372_v30  ;;  %v11127_v13 = vpop.f32.mrf.mxu0  ;;  %12073 = vst [vmem:[#allocation89_spill] sm:$0xff] %v11148_v1  ;;  %7230 = vmatprep.mubr.f32.mxu0 %v11148_v1 }
 0x3c8   : > { %v7847_v44 = vpop.eup %7846  ;;  %7866 = vpow2.f32 %v6990_v33  ;;  %v5568_v58 = vpop.f32.mrf.mxu1 }
 0x3c9   : > { %v7849_v15 = vpop.eup %7848  ;;  %v5762_v14 = vadd.f32 1.0, %v7847_v44  ;;  %v6991_v37 = vmul.f32 -1.442695, %v5565_v50  ;;  %v11116_v59 = vadd.f32 %v5568_v58, %v5376_v8  ;;  %7868 = vtanh.f32 %v11061_v60 }
 0x3ca   : > { %v5570_v17 = vpop.f32.mrf.mxu1  ;;  %v11121_v3 = vmul.f32 %v7849_v15, %v7845_v11  ;;  %v7851_v42 = vpop.eup %7850 }
 0x3cb   : > { %7870 = vrcp.f32 %v5762_v14  ;;  %v5571_v35 = vadd.f32 %v5570_v17, %v5378_v34  ;;  %v11138_v14 = vpop.f32.mrf.mxu0 }
 0x3cc   : > { %v7853_v2 = vpop.eup %7852  ;;  %7872 = vpow2.f32 %v6991_v37  ;;  %v5572_v51 = vpop.f32.mrf.mxu1 }
 0x3cd   : > { %v7855_v21 = vpop.eup %7854  ;;  %v5763_v30 = vadd.f32 1.0, %v7853_v2  ;;  %v6992_v7 = vmul.f32 -1.442695, %v5571_v35  ;;  %v11125_v33 = vadd.f32 %v5572_v51, %v5380_v27  ;;  %7874 = vtanh.f32 %v11072_v5 }
 0x3ce   : > { %v11130_v60 = vpop.f32.mrf.mxu1  ;;  %v11132_v11 = vmul.f32 %v7855_v21, %v7851_v42  ;;  %v7857_v8 = vpop.eup %7856  ;;  %v5390_v42 = vadd.f32 %v11065_v48, %v10906_v39 }
 0x3cf   : > { %7876 = vrcp.f32 %v5763_v30  ;;  %v11157_v21 = vpop.f32.mrf.mxu0 }
 0x3d0   : > { %v7859_v50 = vpop.eup %7858  ;;  %7878 = vpow2.f32 %v6992_v7  ;;  %v5578_v44 = vpop.f32.mrf.mxu1 }
 0x3d1   : > { %v7861_v58 = vpop.eup %7860  ;;  %v5764_v15 = vadd.f32 1.0, %v7859_v50  ;;  %v11136_v34 = vadd.f32 %v5578_v44, %v5386_v23  ;;  %7880 = vtanh.f32 %v11083_v6 }
 0x3d2   : > { %v11141_v5 = vpop.f32.mrf.mxu1  ;;  %v11143_v37 = vmul.f32 %v7861_v58, %v7857_v8  ;;  %v7863_v17 = vpop.eup %7862 }
 0x3d3   : > { %7882 = vrcp.f32 %v5764_v15  ;;  %v5411_v58 = vpop.f32.mrf.mxu0 }
 0x3d4   : > { %v7865_v27 = vpop.eup %7864  ;;  %v5582_v35 = vpop.f32.mrf.mxu1  ;;  %7884 = vtanh.f32 %v11094_v4 }
 0x3d5   : > { %v7867_v2 = vpop.eup %7866  ;;  %v11153_v6 = vadd.f32 %v5582_v35, %v5390_v42  ;;  %v11155_v51 = vmul.f32 %v7865_v27, %v7863_v17  ;;  %v5415_v4 = vpop.f32.mrf.mxu0 }
 0x3d6   : > { %v5765_v30 = vadd.f32 1.0, %v7867_v2  ;;  %v11159_v7 = vpop.f32.mrf.mxu1  ;;  %v7869_v8 = vpop.eup %7868 }
 0x3d7   : > { %12074 = vst [vmem:[#allocation19_spill] sm:$0xff] %v11155_v51 }
 0x3d8   : > { %v7871_v23 = vpop.eup %7870  ;;  %7886 = vrcp.f32 %v5765_v30  ;;  %v11162_v48 = vpop.f32.mrf.mxu1 }
 0x3d9   : > { %v7873_v50 = vpop.eup %7872  ;;  %v11164_v44 = vmul.f32 %v7871_v23, %v7869_v8  ;;  %7888 = vtanh.f32 %v11105_v22  ;;  %v5417_v22 = vpop.f32.mrf.mxu0 }
 0x3da   : > { %v5766_v15 = vadd.f32 1.0, %v7873_v50  ;;  %v5590_v42 = vpop.f32.mrf.mxu1  ;;  %v7875_v17 = vpop.eup %7874 }
 0x3db   : > { %12075 = vst [vmem:[#allocation81_spill] sm:$0xff] %v11164_v44 }
 0x3dc   : > { %v7877_v27 = vpop.eup %7876  ;;  %7890 = vrcp.f32 %v5766_v15  ;;  %v11167_v35 = vpop.f32.mrf.mxu1 }
 0x3dd   : > { %v7879_v2 = vpop.eup %7878  ;;  %v11169_v47 = vmul.f32 %v7877_v27, %v7875_v17  ;;  %7892 = vtanh.f32 %v11116_v59  ;;  %v5419_v17 = vpop.f32.mrf.mxu0  ;;  %v5412_v59 = vadd.f32 %v5411_v58, %v10910_v24 }
 0x3de   : > { %v5767_v30 = vadd.f32 1.0, %v7879_v2  ;;  %v5594_v61 = vpop.f32.mrf.mxu1  ;;  %v7881_v0 = vpop.eup %7880 }
 0x3df   : > { %12076 = vst [vmem:[#allocation91_spill] sm:$0xff] %v11169_v47  ;;  %v5421_v29 = vpop.f32.mrf.mxu0 }
 0x3e0   : > { %v7883_v8 = vpop.eup %7882  ;;  %7894 = vrcp.f32 %v5767_v30  ;;  %v11172_v23 = vpop.f32.mrf.mxu1  ;;  %v5418_v30 = vadd.f32 %v5417_v22, %v10910_v24  ;;  %v5422_v31 = vadd.f32 %v5421_v29, %v10910_v24  ;;  %v5392_v29 = vadd.f32 %v11076_v16, %v10910_v24 }
 0x3e1   : > { %v11174_v50 = vmul.f32 %v7883_v8, %v7881_v0  ;;  %v7885_v15 = vpop.eup %7884  ;;  %v5416_v16 = vadd.f32 %v5415_v4, %v10906_v39 }
 0x3e2   : > { %v5600_v28 = vpop.f32.mrf.mxu1 }
 0x3e4   : > { %v11176_v38 = vpop.f32.mrf.mxu1 }
 0x3e5   : > { %v7887_v43 = vpop.eup %7886 }
 0x3e6   : > { %v5604_v27 = vpop.f32.mrf.mxu1  ;;  %v11178_v19 = vmul.f32 %v7887_v43, %v7885_v15  ;;  %v7889_v2 = vpop.eup %7888  ;;  %v5408_v15 = vadd.f32 %v11138_v14, %v10910_v24 }
 0x3e7   : > { %v5605_v1 = vadd.f32 %v5604_v27, %v5412_v59  ;;  %v5402_v27 = vadd.f32 %v11118_v63, %v10910_v24 }
 0x3e8   : > { %v5608_v46 = vpop.f32.mrf.mxu1  ;;  %v5601_v47 = vadd.f32 %v5600_v28, %v5408_v15  ;;  %v5585_v28 = vadd.f32 %v11159_v7, %v5392_v29  ;;  %v5382_v7 = vadd.f32 %v11030_v53, %v10910_v24  ;;  %v5874_v29 = vld [vmem:[#allocation5] sm:$0x1] }
 0x3e9   : > { %v7891_v25 = vpop.eup %7890  ;;  %v6999_v58 = vmul.f32 -1.442695, %v5605_v1 }
 0x3ea   : > { %v5610_v0 = vpop.f32.mrf.mxu1  ;;  %v11182_v8 = vmul.f32 %v7891_v25, %v7889_v2  ;;  %v7893_v56 = vpop.eup %7892  ;;  %v5595_v2 = vadd.f32 %v5594_v61, %v5402_v27  ;;  %v6998_v59 = vmul.f32 -1.442695, %v5601_v47  ;;  %v5388_v61 = vadd.f32 %v11052_v32, %v10910_v24 }
 0x3eb   : > { %v5611_v26 = vadd.f32 %v5610_v0, %v5418_v30  ;;  %v6995_v47 = vmul.f32 -1.442695, %v5585_v28 }
 0x3ec   : > { %v5612_v55 = vpop.f32.mrf.mxu1  ;;  %v6997_v14 = vmul.f32 -1.442695, %v5595_v2 }
 0x3ed   : > { %v7895_v51 = vpop.eup %7894  ;;  %v7000_v43 = vmul.f32 -1.442695, %v5611_v26  ;;  %v5398_v26 = vadd.f32 %v11098_v52, %v10910_v24  ;;  %v5581_v52 = vadd.f32 %v11141_v5, %v5388_v61 }
 0x3ee   : > { %v5614_v44 = vpop.f32.mrf.mxu1  ;;  %v11187_v45 = vmul.f32 %v7895_v51, %v7893_v56 }
 0x3ef   : > { %v5615_v22 = vadd.f32 %v5614_v44, %v5422_v31  ;;  %7896 = vpow2.f32 %v7000_v43  ;;  %v5591_v56 = vadd.f32 %v5590_v42, %v5398_v26  ;;  %v5420_v31 = vadd.f32 %v5419_v17, %v10906_v39 }
 0x3f0   : > { %7898 = vpow2.f32 %v6999_v58  ;;  %v5609_v17 = vadd.f32 %v5608_v46, %v5416_v16  ;;  %v5575_v43 = vadd.f32 %v11130_v60, %v5382_v7  ;;  %v6994_v32 = vmul.f32 -1.442695, %v5581_v52 }
 0x3f1   : > { %v7001_v25 = vmul.f32 -1.442695, %v5615_v22  ;;  %v6996_v1 = vmul.f32 -1.442695, %v5591_v56  ;;  %v5613_v51 = vadd.f32 %v5612_v55, %v5420_v31  ;;  %v5410_v55 = vadd.f32 %v11157_v21, %v10906_v39 }
 0x3f2   : > { %v6993_v58 = vmul.f32 -1.442695, %v5575_v43  ;;  %v5406_v46 = vadd.f32 %v11127_v13, %v10906_v39  ;;  %v5400_v21 = vadd.f32 %v11107_v41, %v10906_v39  ;;  %v5396_v13 = vadd.f32 %v11087_v54, %v10906_v39 }
 0x3f3   : > { %7900 = vpow2.f32 %v7001_v25  ;;  %v5603_v4 = vadd.f32 %v11176_v38, %v5410_v55  ;;  %v12090_v55 = vld [vmem:[#allocation100_spill] sm:$0xff] }
 0x3f4   : > { %7902 = vpow2.f32 %v6998_v59  ;;  %v5599_v60 = vadd.f32 %v11172_v23, %v5406_v46  ;;  %v5593_v27 = vadd.f32 %v11167_v35, %v5400_v21  ;;  %v5589_v56 = vadd.f32 %v11162_v48, %v5396_v13  ;;  %v12095_v46 = vld [vmem:[#allocation92_spill] sm:$0xff] }
 0x3f5   : > { %7904 = vpow2.f32 %v6997_v14  ;;  %v7999_v14 = vmov 0   ;;  %v12099_v21 = vld [vmem:[#allocation80_spill] sm:$0xff] }
 0x3f6   : > { %7906 = vpow2.f32 %v6996_v1  ;;  %7276 = vset.pattern.permute.xlu0 %v7999_v14  ;;  %7277 = vset.pattern.permute.xlu1 %v7999_v14 }
 0x3f7   : > { %7908 = vpow2.f32 %v6995_v47  ;;  %5877 = vperm.xlu0 %7276, %v5874_v29  }
 0x3f8   : > { %7910 = vtanh.f32 %v5613_v51 }
 0x3fc   : > { %v7897_v63 = vpop.eup %7896 }
 0x3fd   : > { %v5775_v44 = vadd.f32 1.0, %v7897_v63  ;;  %v7899_v30 = vpop.eup %7898 }
 0x3fe   : > { %v5774_v5 = vadd.f32 1.0, %v7899_v30 }
 0x3ff   : > { %7912 = vrcp.f32 %v5775_v44 }
 0x400   : > { %v7901_v42 = vpop.eup %7900 }
 0x401   : > { %v5776_v0 = vadd.f32 1.0, %v7901_v42  ;;  %v7903_v15 = vpop.eup %7902 }
 0x402   : > { %v5773_v24 = vadd.f32 1.0, %v7903_v15  ;;  %v7905_v53 = vpop.eup %7904  ;;  %v12092_v15 = vld [vmem:[#allocation96_spill] sm:$0xff] }
 0x403   : > { %7914 = vrcp.f32 %v5776_v0  ;;  %v5772_v22 = vadd.f32 1.0, %v7905_v53  ;;  %v7907_v25 = vpop.eup %7906 }
 0x404   : > { %7916 = vtanh.f32 %v5609_v17  ;;  %v7909_v38 = vpop.eup %7908  ;;  %v5771_v26 = vadd.f32 1.0, %v7907_v25  ;;  %v12102_v25 = vld [vmem:[#allocation79_spill] sm:$0xff] }
 0x405   : > { %7918 = vpow2.f32 %v6994_v32  ;;  %v7911_v2 = vpop.eup %7910  ;;  %v5770_v31 = vadd.f32 1.0, %v7909_v38  ;;  %v12103_v38 = vld [vmem:[#allocation76_spill] sm:$0xff] }
 0x406   : > { %7920 = vrcp.f32 %v5774_v5 }
 0x407   : > { %7922 = vtanh.f32 %v5603_v4  ;;  %v12093_v4 = vld [vmem:[#allocation95_spill] sm:$0xff] }
 0x408   : > { %7924 = vpow2.f32 %v6993_v58  ;;  %v5987_v58 = vld [vmem:[#allocation2] sm:$0x1] }
 0x409   : > { %7926 = vrcp.f32 %v5773_v24  ;;  %v12096_v24 = vld [vmem:[#allocation87_spill] sm:$0xff] }
 0x40a   : > { %7928 = vtanh.f32 %v5599_v60  ;;  %v12098_v60 = vld [vmem:[#allocation85_spill] sm:$0xff] }
 0x40b   : > { %7930 = vrcp.f32 %v5772_v22  ;;  %v12100_v22 = vld [vmem:[#allocation31_spill] sm:$0xff] }
 0x40c   : > { %v7913_v59 = vpop.eup %7912  ;;  %7932 = vtanh.f32 %v5593_v27 }
 0x40d   : > { %7934 = vrcp.f32 %v5771_v26  ;;  %v12108_v26 = vld [vmem:[#allocation72_spill] sm:$0xff] }
 0x40e   : > { %7936 = vtanh.f32 %v5589_v56  ;;  %v12111_v56 = vld [vmem:[#allocation98_spill] sm:$0xff] }
 0x40f   : > { %7938 = vrcp.f32 %v5770_v31 }
 0x410   : > { %v7915_v23 = vpop.eup %7914  ;;  %7940 = vtanh.f32 %v11153_v6 }
 0x411   : > { %v5872_v41 = vmul.f32 %v7915_v23, %v7911_v2  ;;  %v7917_v28 = vpop.eup %7916  ;;  %v12105_v2 = vld [vmem:[#allocation75_spill] sm:$0xff]  ;;  %v12109_v23 = vld [vmem:[#allocation18_spill] sm:$0xff] }
 0x412   : > { %v7919_v35 = vpop.eup %7918  ;;  %v5871_v1 = vmul.f32 %v7917_v28, %v7913_v59  ;;  %v12106_v59 = vld [vmem:[#allocation73_spill] sm:$0xff]  ;;  %v12114_v28 = vld [vmem:[#allocation11_spill] sm:$0xff] }
 0x413   : > { %7198 = vmatprep.subr.mxu0 %v5872_v41  ;;  %v7921_v63 = vpop.eup %7920  ;;  %v5769_v48 = vadd.f32 1.0, %v7919_v35  ;;  %v12112_v41 = vld [vmem:[#allocation97_spill] sm:$0xff]  ;;  %v12115_v35 = vld [vmem:[#allocation90_spill] sm:$0xff] }
 0x414   : > { %7199 = vmatpush3.xpose.msra.mxu0 %v11143_v37  ;;  %v7923_v39 = vpop.eup %7922 }
 0x415   : > { %7200 = vmatprep.subr.mxu0 %v5871_v1  ;;  %v7925_v54 = vpop.eup %7924  ;;  %v5870_v61 = vmul.f32 %v7923_v39, %v7921_v63  ;;  %7942 = vrcp.f32 %v5769_v48  ;;  %v12117_v1 = vld [vmem:[#allocation83_spill] sm:$0xff]  ;;  %v12118_v63 = vld [vmem:[#allocation94_spill] sm:$0xff]  ;;  %v12121_v48 = vld [vmem:[#allocation120_spill] sm:$0xff] }
 0x416   : > { %v7927_v47 = vpop.eup %7926  ;;  %v5768_v52 = vadd.f32 1.0, %v7925_v54  ;;  %7944 = vtanh.f32 %v11136_v34  ;;  %v12120_v54 = vld [vmem:[#allocation121_spill] sm:$0xff] }
 0x417   : > { %v7929_v51 = vpop.eup %7928 }
 0x418   : > { %7201 = vmatpush3.xpose.msra.mxu0 %v11132_v11  ;;  %v5869_v44 = vmul.f32 %v7929_v51, %v7927_v47  ;;  %v7931_v30 = vpop.eup %7930  ;;  %7946 = vrcp.f32 %v5768_v52  ;;  %v12123_v47 = vld [vmem:[#allocation119_spill] sm:$0xff]  ;;  %v12124_v51 = vld [vmem:[#allocation118_spill] sm:$0xff] }
 0x419   : > { %7202 = vmatprep.subr.mxu0 %v5870_v61  ;;  %v7933_v37 = vpop.eup %7932  ;;  %7948 = vtanh.f32 %v11125_v33 }
 0x41a   : > { %v5868_v16 = vmul.f32 %v7933_v37, %v7931_v30  ;;  %v7935_v42 = vpop.eup %7934  ;;  %v12127_v30 = vld [vmem:[#allocation116_spill] sm:$0xff] }
 0x41b   : > { %v7937_v11 = vpop.eup %7936 }
 0x41c   : > { %7203 = vmatpush3.xpose.msra.mxu0 %v11121_v3  ;;  %v5867_v6 = vmul.f32 %v7937_v11, %v7935_v42  ;;  %v7939_v7 = vpop.eup %7938  ;;  %v12130_v42 = vld [vmem:[#allocation111_spill] sm:$0xff] }
 0x41d   : > { %7204 = vmatprep.subr.mxu0 %v5869_v44  ;;  %v7941_v17 = vpop.eup %7940  ;;  %v12126_v44 = vld [vmem:[#allocation117_spill] sm:$0xff] }
 0x41e   : > { %v5866_v3 = vmul.f32 %v7941_v17, %v7939_v7  ;;  %v12133_v7 = vlaneseq }
 0x420   : > { %7205 = vmatpush3.xpose.msra.mxu0 %v11110_v12  ;;  %v5979_v17 = vand.u32 127, %v12133_v7 }
 0x421   : > { %7206 = vmatprep.subr.mxu0 %v5868_v16  ;;  %v12129_v16 = vld [vmem:[#allocation112_spill] sm:$0xff] }
 0x422   : > { %v7943_v0 = vpop.eup %7942 }
 0x423   : > { %v7945_v34 = vpop.eup %7944 }
 0x424   : > { %7207 = vmatpush3.xpose.msra.mxu0 %v11096_v49  ;;  %v5865_v43 = vmul.f32 %v7945_v34, %v7943_v0  ;;  %v12086_v49 = vld [vmem:[#allocation104_spill] sm:$0xff]  ;;  %v5980_v0 = vadd.s32 128, %v5979_v17  ;;  %v8000_v34 = vmov 1966171168  }
 0x425   : > { %7208 = vmatprep.subr.mxu0 %v5867_v6  ;;  %v7947_v32 = vpop.eup %7946  ;;  %v12132_v6 = vld [vmem:[#allocation109_spill] sm:$0xff] }
 0x426   : > { %v7949_v12 = vpop.eup %7948 }
 0x427   : > { %v5864_v33 = vmul.f32 %v7949_v12, %v7947_v32  ;;  %v12134_v32 = vld [vmem:[#allocation86_spill] sm:$0xff] }
 0x428   : > { %7209 = vmatpush3.xpose.msra.mxu0 %v11085_v10  ;;  %v12082_v10 = vld [vmem:[#allocation10_spill] sm:$0xff]  ;;  %v5981_v12 = vadd.s32 %v5979_v17, %v12134_v32 }
 0x429   : > { %7210 = vmatprep.subr.mxu0 %v5866_v3 }
 0x42c   : > { %7211 = vmatpush3.xpose.msra.mxu0 %v11074_v9  ;;  %v12078_v9 = vld [vmem:[#allocation20_spill] sm:$0xff] }
 0x42d   : > { %7212 = vmatprep.subr.mxu0 %v5865_v43  ;;  %v5959_v43 = vunpack.c.l.s4 %v8000_v34 }
 0x430   : > { %7213 = vmatpush3.xpose.msra.mxu0 %v11063_v36  ;;  %v12077_v36 = vld [vmem:[#allocation91_spill] sm:$0xff] }
 0x431   : > { %7214 = vmatprep.subr.mxu0 %v5864_v33  ;;  %v12135_v33 = vld [vmem:[#allocation71_spill] sm:$0xff] }
 0x434   : > { %7215 = vmatpush3.xpose.msra.mxu0 %v11055_v18  ;;  %v12079_v18 = vld [vmem:[#allocation81_spill] sm:$0xff] }
 0x435   : > { %7216 = vmatprep.subr.mxu0 %v11187_v45  ;;  %v12080_v45 = vld [vmem:[#allocation82_spill] sm:$0xff] }
 0x438   : > { %7217 = vmatpush3.xpose.msra.mxu0 %v11044_v57  ;;  %v12081_v57 = vld [vmem:[#allocation19_spill] sm:$0xff] }
 0x439   : > { %7218 = vmatprep.subr.mxu0 %v11182_v8  ;;  %v12089_v8 = vld [vmem:[#allocation101_spill] sm:$0xff] }
 0x43c   : > { %7219 = vmatpush3.xpose.msra.mxu0 %v11033_v40  ;;  %v12083_v40 = vld [vmem:[#allocation108_spill] sm:$0xff] }
 0x43d   : > { %7220 = vmatprep.subr.mxu0 %v11178_v19 }
 0x440   : > { %7221 = vmatpush3.xpose.msra.mxu0 %v11022_v20  ;;  %v12085_v20 = vld [vmem:[#allocation89_spill] sm:$0xff] }
 0x441   : > { %7222 = vmatprep.subr.mxu0 %v11174_v50 }
 0x444   : > { %7223 = vmatpush3.xpose.msra.mxu0 %v11008_v62  ;;  %v12087_v62 = vld [vmem:[#allocation103_spill] sm:$0xff] }
 0x445   : > { %7224 = vmatprep.subr.mxu0 %v12077_v36 }
 0x448   : > { %7225 = vmatpush3.xpose.msra.mxu0 %v12078_v9  ;;  %v5982_v9 = vadd.s32 %v5980_v0, %v12134_v32 }
 0x449   : > { %7226 = vmatprep.subr.mxu0 %v12079_v18  ;;  %v5960_v18 = vunpack.c.0.s8 %v5959_v43 }
 0x44c   : > { %7227 = vmatpush3.xpose.msra.mxu0 %v12080_v45 }
 0x44d   : > { %7228 = vmatprep.subr.mxu0 %v12081_v57 }
 0x450   : > { %7229 = vmatpush3.xpose.msra.mxu0 %v12082_v10 }
 0x451   : > { %7100 = vmatprep.subr.msk.bf16.mxu0 %vm10014_vm4, %v12083_v40 }
 0x453   : > { %7231 = vmatmul.mubr.f32.vlgmr.msra.gmra.mxu0 %v12085_v20  ;;  %v12136_v20 = vld [vmem:[#allocation70_spill] sm:$0xff] }
 0x454   : > { %7103 = vmatpush1.bf16.msk.msra.mxu0 %vm10014_vm4, %v12086_v49  ;;  %vm12101_vm4 = vnez %v12100_v22  ;;  %v11344_v49 = vsub.s32 %v5960_v18, %v12136_v20 }
 0x455   : > { %7106 = vmatprep.subr.msk.bf16.mxu0 %vm10335_vm12, %v12087_v62 }
 0x458   : > { %7109 = vmatpush1.bf16.msk.msra.mxu0 %vm10335_vm12, %v12089_v8 }
 0x459   : > { %7112 = vmatprep.subr.msk.bf16.mxu0 %vm10310_vm8, %v12090_v55 }
 0x45c   : > { %7115 = vmatpush1.bf16.msk.msra.mxu0 %vm10310_vm8, %v12092_v15  ;;  %vm6148_vm8 = vcmp.lt.s32.totalorder %v12133_v7, 512 }
 0x45d   : > { %7118 = vmatprep.subr.msk.bf16.mxu0 %vm10283_vm3, %v12093_v4 }
 0x460   : > { %7121 = vmatpush1.bf16.msk.msra.mxu0 %vm10283_vm3, %v12095_v46  ;;  %vm6021_vm3 = vcmask 0  }
 0x461   : > { %7124 = vmatprep.subr.msk.bf16.mxu0 %vm10256_vm0, %v12096_v24 }
 0x464   : > { %7127 = vmatpush1.bf16.msk.msra.mxu0 %vm10256_vm0, %v12098_v60  ;;  %vm5975_vm0 = vcmp.lt.s32.totalorder %v12133_v7, 256 }
 0x465   : > { %7130 = vmatprep.subr.msk.bf16.mxu0 %vm12101_vm4, %v12099_v21 }
 0x468   : > { %7133 = vmatpush1.bf16.msk.msra.mxu0 %vm12101_vm4, %v12102_v25 }
 0x469   : > { %7136 = vmatprep.subr.msk.bf16.mxu0 %vm10202_vm10, %v12103_v38 }
 0x46c   : > { %7139 = vmatpush1.bf16.msk.msra.mxu0 %vm10202_vm10, %v12105_v2  ;;  %vm5984_vm10 = vcmp.lt.s32.totalorder %v5982_v9, 700 }
 0x46d   : > { %7142 = vmatprep.subr.msk.bf16.mxu0 %vm10176_vm7, %v12106_v59 }
 0x470   : > { %7145 = vmatpush1.bf16.msk.msra.mxu0 %vm10176_vm7, %v12108_v26  ;;  %vm5983_vm7 = vcmp.lt.s32.totalorder %v5981_v12, 700 }
 0x471   : > { %7148 = vmatprep.subr.msk.bf16.mxu0 %vm10612_vm13, %v12109_v23 }
 0x472   : > { %v5878_v3 = vpop.permute.xlu0 %5877 }
 0x473   : > { %v5883_v36 = vrot.slane %v5878_v3, %v12135_v33 }
 0x474   : > { %7151 = vmatpush2.bf16.msk.msra.mxu0 %vm10612_vm13, %v12111_v56  ;;  %vm5988_vm13 = vcmask 1040384  }
 0x475   : > { %7154 = vmatprep.subr.msk.bf16.mxu0 %vm10583_vm1, %v12112_v41 }
 0x478   : > { %7157 = vmatpush2.bf16.msk.msra.mxu0 %vm10583_vm1, %v12114_v28  ;;  %v6013_v28 = vld [vmem:[#allocation3] sm:$0x1] }
 0x479   : > { %7160 = vmatprep.subr.msk.bf16.mxu0 %vm10536_vm11, %v12115_v35 }
 0x47c   : > { %7163 = vmatpush2.bf16.msk.msra.mxu0 %vm10536_vm11, %v12117_v1 }
 0x47d   : > { %7166 = vmatprep.subr.msk.bf16.mxu0 %vm10494_vm15, %v12118_v63 }
 0x480   : > { %7169 = vmatpush2.bf16.msk.msra.mxu0 %vm10494_vm15, %v12120_v54 }
 0x481   : > { %7172 = vmatprep.subr.msk.bf16.mxu0 %vm10452_vm5, %v12121_v48 }
 0x484   : > { %7175 = vmatpush2.bf16.msk.msra.mxu0 %vm10452_vm5, %v12123_v47 }
 0x485   : > { %7178 = vmatprep.subr.msk.bf16.mxu0 %vm10429_vm14, %v12124_v51 }
 0x488   : > { %7181 = vmatpush2.bf16.msk.msra.mxu0 %vm10429_vm14, %v12126_v44 }
 0x489   : > { %7184 = vmatprep.subr.msk.bf16.mxu0 %vm10410_vm6, %v12127_v30 }
 0x48c   : > { %7187 = vmatpush2.bf16.msk.msra.mxu0 %vm10410_vm6, %v12129_v16 }
 0x48d   : > { %7190 = vmatprep.subr.msk.bf16.mxu0 %vm12017_vm2, %v12130_v42  ;;  %v6023_v42 = vld [vmem:[#allocation4] sm:$0xf] }
 0x490   : > { %7193 = vmatpush2.bf16.msk.msra.mxu0 %vm12017_vm2, %v12132_v6 }
 0x513   : > { %v5950_v45 = vpop.f32.mrf.mxu0 }
 0x514   : > { %v5951_v57 = vadd.f32 %v5950_v45, %v5883_v36 }
 0x515   : > { %v5952_v10 = vpop.f32.mrf.mxu0 }
 0x516   : > { %v5985_v40 = vsel %vm5983_vm7, %v5951_v57, -inf  ;;  %v5953_v19 = vadd.f32 %v5952_v10, %v5883_v36 }
 0x517   : > { %v5989_v8 = vsel %vm5988_vm13, %v5985_v40, -inf }
 0x518   : > { %v5957_v62 = vcombine.low %v5951_v57, %v5953_v19  ;;  %v5986_v50 = vsel %vm5984_vm10, %v5953_v19, -inf }
 0x519   : > { %v5990_v55 = vsel %vm5988_vm13, %v5986_v50, -inf }
 0x51a   : > { %v5964_v5 = vrot.slane %v5957_v62, %v11344_v49  ;;  %v5991_v15 = vmax.f32 %v5989_v8, %v5990_v55 }
 0x51c   : > { %v5971_v4 = vrot.slane %v5964_v5, %v11344_v49  ;;  %5992 = vmax.xlane.f32.xlu0 %v5991_v15 }
 0x51e   : > { %5977 = vst.msk [vmem:[%s12137_s24] sm:$0x3] %vm5975_vm0, %v5971_v4 }
 0x5a5   : > { %v5993_v46 = vpop.xlane.xlu0 %5992 }
 0x5a6   : > { %v5994_v24 = vmax.f32 %v5987_v58, %v5993_v46 }
 0x5a8   : > { %v5995_v53 = vsub.f32 %v5987_v58, %v5994_v24  ;;  %6151 = vst.msk [vmem:[#allocation2] sm:$0x1] %vm6021_vm3, %v5994_v24  ;;  %6000 = vperm.xlu1 %7277, %v5994_v24  }
 0x5aa   : > { %v5996_v60 = vmul.f32 1.442695, %v5995_v53 }
 0x5ac   : > { %7950 = vpow2.f32 %v5996_v60 }
 0x5b9   : > { %v7951_v21 = vpop.eup %7950 }
 0x5ba   : > { %6026 = vperm.xlu0 %7276, %v7951_v21   ;;  %v6014_v35 = vmul.f32 %v7951_v21, %v6013_v28 }
 0x623   : > { %v6001_v22 = vpop.permute.xlu1 %6000 }
 0x624   : > { %v6006_v25 = vrot.slane %v6001_v22, %v12135_v33 }
 0x626   : > { %v6007_v38 = vsub.f32 %v5985_v40, %v6006_v25  ;;  %v6008_v27 = vsub.f32 %v5986_v50, %v6006_v25 }
 0x628   : > { %v6009_v2 = vmul.f32 1.442695, %v6007_v38  ;;  %v6011_v59 = vmul.f32 1.442695, %v6008_v27 }
 0x62a   : > { %7952 = vpow2.f32 %v6009_v2 }
 0x62b   : > { %7954 = vpow2.f32 %v6011_v59 }
 0x635   : > { %v6027_v54 = vpop.permute.xlu0 %6026 }
 0x636   : > { %v6032_v30 = vrot.slane %v6027_v54, %v12135_v33 }
 0x637   : > { %v7953_v13 = vpop.eup %7952 }
 0x638   : > { %v7955_v26 = vpop.eup %7954  ;;  %v6034_v23 = vpack.c.bf16 %v7953_v13, %v7953_v13  ;;  %v6015_v29 = vsel %vm5988_vm13, %v7953_v13, 0.0  ;;  %v6033_v3 = vmul.f32 %v6032_v30, %v6023_v42 }
 0x639   : > { %v6035_v56 = vpack.c.bf16 %v7955_v26, %v7955_v26  ;;  %v6016_v41 = vsel %vm5988_vm13, %v7955_v26, 0.0 }
 0x63a   : > { %v6017_v14 = vadd.f32 %v6016_v41, %v6015_v29 }
 0x63b   : > { %6068 = vmatprep.mubr.bf16.mxu1 %v6035_v56  ;;  %6109 = vmatprep.mubr.bf16.mxu0 %v6035_v56 }
 0x63c   : > { %6069 = vmatmul.mubr.bf16.vlgmr.msra.gmra.mxu1 %v6034_v23  ;;  %6110 = vmatmul.mubr.bf16.vlgmr.msra.gmra.mxu0 %v6034_v23 }
 0x63d   : > { %6018 = vadd.xlane.f32.xlu1 %v6017_v14 }
 0x6c6   : > { %v6019_v31 = vpop.xlane.xlu1 %6018 }
 0x6c7   : > { %v6020_v1 = vadd.f32 %v6019_v31, %v6014_v35 }
 0x6c9   : > { %6022 = vst.msk [vmem:[#allocation3] sm:$0x1] %vm6021_vm3, %v6020_v1 }
 0x6fc   : > { %v6070_v63 = vpop.f32.mrf.mxu1  ;;  %v6111_v39 = vpop.f32.mrf.mxu0 }
 0x6fe   : > { %v6072_v48 = vpop.f32.mrf.mxu1  ;;  %v6113_v61 = vpop.f32.mrf.mxu0 }
 0x6ff   : > { %v6122_v47 = vcombine.low %v6070_v63, %v6072_v48  ;;  %v6123_v51 = vcombine.low %v6111_v39, %v6113_v61 }
 0x700   : > { %v6074_v52 = vpop.f32.mrf.mxu1  ;;  %v6115_v44 = vpop.f32.mrf.mxu0 }
 0x701   : > { %v6130_v37 = vrot.slane %v6122_v47, %v11344_v49  ;;  %v6137_v16 = vrot.slane %v6123_v51, %v11344_v49 }
 0x702   : > { %v6075_v11 = vpop.f32.mrf.mxu1  ;;  %v6116_v6 = vpop.f32.mrf.mxu0 }
 0x703   : > { %v6138_v17 = vcombine.low %v6130_v37, %v6137_v16 }
 0x705   : > { %v6145_v0 = vrot.slane %v6138_v17, %v11344_v49  ;;  %6155 = sbr.rel (%p7194_p10) target bundleno = 1810 (0x712), region = 56 }
 0x707   : > { %v6147_v34 = vadd.f32 %v6145_v0, %v6033_v3 }
 0x709   : > { %6150 = vst.msk [vmem:[#allocation4] sm:$0xf] %vm6148_vm8, %v6147_v34 }
 0x70a   : > { %v6156_v43 = vld [vmem:[#allocation2] sm:$0x1]  ;;  %v6158_v32 = vld [vmem:[#allocation3] sm:$0x1] }
 0x70b   : > { %6157 = vst.msk [vmem:[%s460_s11] sm:$0x1] %vm6021_vm3, %v6156_v43  ;;  %6159 = vst.msk [vmem:[%s463_s14] sm:$0x1] %vm6021_vm3, %v6158_v32 }
 0x710   : > { %v6160_v12 = vld [vmem:[#allocation4] sm:$0xf] }
 0x711   : > { %6161 = vst.msk [vmem:[%s8122_s18] sm:$0xf] %vm6148_vm8, %v6160_v12 }
 0x712 PF: > { %s23_s19 = sadd.s32 1, %s7995_s19   ;;  %s12138_s16 = sld [smem:[#allocation6_spill]] }
 0x713   : > { %p20_p11 = scmp.ge.s32.totalorder %s23_s19, 6   ;;  %s12139_s25 = sld [smem:[#allocation7_spill]] }
 0x714   : > { %s12140_s18 = sld [smem:[#allocation8_spill]]  ;;  %s12141_s15 = smov %s7987_s17 }
 0x715   :  { %22 = sbr.rel (!%p20_p11) target bundleno = 3 (0x3), region = 122 }
 0x719   : > { %s12142_s17 = smov %s12139_s25 }

</bundles_post_ra>
